<compile_context>
chip_gen: v7x
topology: tpu7x:2x2x1
jax: 0.10.0
libtpu: 0.0.40
codegen_flags: <defaults>
</compile_context>

<pallas_src>
import functools

import jax
import jax.numpy as jnp
from jax.experimental import pallas as pl
from jax.experimental.pallas import tpu as pltpu

EPS = 1e-5                       # nn.BatchNorm2d default eps
LANES = 128                      # TPU lane width; channels padded to a multiple
_VMEM_LIMIT = 32 * 1024 * 1024   # fits v5e / v6e / v7x scoped-VMEM budgets


def _round_up(n, m=LANES):
    return ((n + m - 1) // m) * m


def _pick_row_tile(m, max_rows=2048):
    """Largest power-of-two row tile <= max_rows dividing m with >= 2 tiles."""
    for t in (2048, 1024, 512, 256, 128, 64, 32, 16, 8):
        if t <= max_rows and m % t == 0 and m // t >= 2:
            return t
    return m


def _compiler_params():
    return pltpu.CompilerParams(dimension_semantics=("parallel",),
                                vmem_limit_bytes=_VMEM_LIMIT)


# ---------------------------------------------------------------------------
# Kernels
# ---------------------------------------------------------------------------
def _pointwise_kernel(*refs, fuse_bn):
    """relu6((x[*s + t]) @ W + b); emits pre-BN tile + per-tile BN partial sums.

    fuse_bn=True : refs = x, s, t, w, b, y, sum, sq
    fuse_bn=False: refs = x,       w, b, y, sum, sq   (stage 1, no prior BN)
    x: [tm, Cin_p] bf16   s/t: [1, Cin_p] f32   w: [Cin_p, Cout_p] bf16
    b: [1, Cout_p] f32    y: [tm, Cout_p]       sum/sq: [1, 1, Cout_p] f32
    """
    if fuse_bn:
        x_ref, s_ref, t_ref, w_ref, b_ref, y_ref, sum_ref, sq_ref = refs
        x = (x_ref[...].astype(jnp.float32) * s_ref[...] + t_ref[...]
             ).astype(jnp.bfloat16)
    else:
        x_ref, w_ref, b_ref, y_ref, sum_ref, sq_ref = refs
        x = x_ref[...]
    y = jnp.dot(x, w_ref[...], preferred_element_type=jnp.float32) + b_ref[...]
    y = jnp.clip(y, 0.0, 6.0)                    # ReLU6 (before BN, as in module)
    y_ref[...] = y.astype(y_ref.dtype)
    sum_ref[0] = jnp.sum(y, axis=0, keepdims=True)
    sq_ref[0] = jnp.sum(y * y, axis=0, keepdims=True)


def _depthwise_kernel(x_ref, s_ref, t_ref, w_ref, b_ref,
                      y_ref, sum_ref, sq_ref, xpad_ref, *, H, W):
    """BN-normalize + depthwise 3x3 (pad=1) + bias + ReLU6 + BN partial sums.

    One image, flattened to [H*W, C].  A VMEM scratch holds the image with W+1
    zero rows above and below; tap (dy, dx) is then the window starting at row
    dy*W + dx.  The cross-row bleed of the left/right taps (dx=0 / dx=2) is
    killed with a single column mask per side applied to the summed column
    accumulator (2 selects total instead of 6).
    """
    HW, C = x_ref.shape
    xn = x_ref[...].astype(jnp.float32) * s_ref[...] + t_ref[...]

    zrow = jnp.zeros((W + 1, C), jnp.float32)
    xpad_ref[0:W + 1, :] = zrow                           # top halo
    xpad_ref[W + 1:W + 1 + HW, :] = xn                    # image
    xpad_ref[W + 1 + HW:HW + 2 * W + 2, :] = zrow         # bottom halo

    col = jax.lax.broadcasted_iota(jnp.int32, (HW, C), 0) % W
    mask_l = col >= 1        # dx=0 reads x[., w-1]: invalid at w == 0
    mask_r = col <= W - 2    # dx=2 reads x[., w+1]: invalid at w == W-1

    w_taps = w_ref[...]                                   # [9, C] f32
    acc_l = jnp.zeros((HW, C), jnp.float32)
    acc_c = jnp.zeros((HW, C), jnp.float32)
    acc_r = jnp.zeros((HW, C), jnp.float32)
    for dy in range(3):
        base = dy * W
        acc_l = acc_l + xpad_ref[base + 0:base + 0 + HW, :] * w_taps[dy * 3 + 0:dy * 3 + 1, :]
        acc_c = acc_c + xpad_ref[base + 1:base + 1 + HW, :] * w_taps[dy * 3 + 1:dy * 3 + 2, :]
        acc_r = acc_r + xpad_ref[base + 2:base + 2 + HW, :] * w_taps[dy * 3 + 2:dy * 3 + 3, :]
    acc = acc_c + jnp.where(mask_l, acc_l, 0.0) + jnp.where(mask_r, acc_r, 0.0)

    y = jnp.clip(acc + b_ref[...], 0.0, 6.0)              # ReLU6 before BN
    y_ref[...] = y.astype(y_ref.dtype)
    sum_ref[0] = jnp.sum(y, axis=0, keepdims=True)
    sq_ref[0] = jnp.sum(y * y, axis=0, keepdims=True)


def _bn_apply_kernel(x_ref, s_ref, t_ref, o_ref):
    """Final BN apply: lane-dense elementwise scale/shift."""
    o_ref[...] = x_ref[...].astype(jnp.float32) * s_ref[...] + t_ref[...]


# ---------------------------------------------------------------------------
# pallas_call wrappers
# ---------------------------------------------------------------------------
def _pointwise_stage(x2d, w, b, out_dtype, tm, scale=None, shift=None):
    m, cin = x2d.shape
    cout = w.shape[1]
    nt = m // tm
    fuse = scale is not None

    in_specs = [pl.BlockSpec((tm, cin), lambda i: (i, 0))]
    operands = [x2d]
    if fuse:
        in_specs += [pl.BlockSpec((1, cin), lambda i: (0, 0)),
                     pl.BlockSpec((1, cin), lambda i: (0, 0))]
        operands += [scale, shift]
    in_specs += [pl.BlockSpec((cin, cout), lambda i: (0, 0)),
                 pl.BlockSpec((1, cout), lambda i: (0, 0))]
    operands += [w, b]

    return pl.pallas_call(
        functools.partial(_pointwise_kernel, fuse_bn=fuse),
        out_shape=(jax.ShapeDtypeStruct((m, cout), out_dtype),
                   jax.ShapeDtypeStruct((nt, 1, cout), jnp.float32),
                   jax.ShapeDtypeStruct((nt, 1, cout), jnp.float32)),
        grid=(nt,),
        in_specs=in_specs,
        out_specs=(pl.BlockSpec((tm, cout), lambda i: (i, 0)),
                   pl.BlockSpec((1, 1, cout), lambda i: (i, 0, 0)),
                   pl.BlockSpec((1, 1, cout), lambda i: (i, 0, 0))),
        compiler_params=_compiler_params(),
    )(*operands)


def _depthwise_stage(x2d, scale, shift, w9, b, n, h, w_dim, out_dtype):
    m, c = x2d.shape
    hw = h * w_dim
    return pl.pallas_call(
        functools.partial(_depthwise_kernel, H=h, W=w_dim),
        out_shape=(jax.ShapeDtypeStruct((m, c), out_dtype),
                   jax.ShapeDtypeStruct((n, 1, c), jnp.float32),
                   jax.ShapeDtypeStruct((n, 1, c), jnp.float32)),
        grid=(n,),
        in_specs=[pl.BlockSpec((hw, c), lambda i: (i, 0)),
                  pl.BlockSpec((1, c), lambda i: (0, 0)),
                  pl.BlockSpec((1, c), lambda i: (0, 0)),
                  pl.BlockSpec((9, c), lambda i: (0, 0)),
                  pl.BlockSpec((1, c), lambda i: (0, 0))],
        out_specs=(pl.BlockSpec((hw, c), lambda i: (i, 0)),
                   pl.BlockSpec((1, 1, c), lambda i: (i, 0, 0)),
                   pl.BlockSpec((1, 1, c), lambda i: (i, 0, 0))),
        scratch_shapes=[pltpu.VMEM((hw + 2 * w_dim + 2, c), jnp.float32)],
        compiler_params=_compiler_params(),
    )(x2d, scale, shift, w9, b)


def _bn_apply(x2d, scale, shift, tm):
    m, c = x2d.shape
    return pl.pallas_call(
        _bn_apply_kernel,
        out_shape=jax.ShapeDtypeStruct((m, c), jnp.float32),
        grid=(m // tm,),
        in_specs=[pl.BlockSpec((tm, c), lambda i: (i, 0)),
                  pl.BlockSpec((1, c), lambda i: (0, 0)),
                  pl.BlockSpec((1, c), lambda i: (0, 0))],
        out_specs=pl.BlockSpec((tm, c), lambda i: (i, 0)),
        compiler_params=_compiler_params(),
    )(x2d, scale, shift)


def _finalize_bn(sum_partials, sq_partials, count, gamma, beta):
    """Fold batch stats into per-channel scale/shift: y_norm = y*scale + shift."""
    mean = jnp.sum(sum_partials[:, 0, :], axis=0) / count
    var = jnp.maximum(jnp.sum(sq_partials[:, 0, :], axis=0) / count - mean * mean, 0.0)
    scale = gamma.reshape(-1) * jax.lax.rsqrt(var + EPS)
    shift = beta.reshape(-1) - mean * scale
    return scale.reshape(1, -1), shift.reshape(1, -1)


def _pad2(a, rows, cols):
    return jnp.pad(a, ((0, rows - a.shape[0]), (0, cols - a.shape[1])))


# ---------------------------------------------------------------------------
# Forward pass
# ---------------------------------------------------------------------------
def inverted_residual_block(x_nchw, params):
    f32, bf16 = jnp.float32, jnp.bfloat16
    x = jnp.transpose(x_nchw, (0, 2, 3, 1)).astype(f32)       # NCHW -> NHWC
    N, H, W, Cin = x.shape
    Cmid = params["w1"].shape[1]
    Cout = params["w3"].shape[1]
    M = N * H * W
    cin_p, cmid_p, cout_p = _round_up(Cin), _round_up(Cmid), _round_up(Cout)
    tm = _pick_row_tile(M)

    # Lane-dense packing: channels padded to multiples of 128.  Padded channels
    # stay exactly zero through every stage (their weights, biases, gammas and
    # betas are all zero-padded).
    x2d = _pad2(x.reshape(M, Cin), M, cin_p).astype(bf16)
    w1 = _pad2(params["w1"], cin_p, cmid_p).astype(bf16)
    w2 = _pad2(params["w2"], 9, cmid_p).astype(f32)
    w3 = _pad2(params["w3"], cmid_p, cout_p).astype(bf16)
    b1, g1, be1 = (_pad2(params[k], 1, cmid_p) for k in ("b1", "g1", "be1"))
    b2, g2, be2 = (_pad2(params[k], 1, cmid_p) for k in ("b2", "g2", "be2"))
    b3, g3, be3 = (_pad2(params[k], 1, cout_p) for k in ("b3", "g3", "be3"))

    # stage 1: 1x1 expand conv + ReLU6 -> pre-BN activation (bf16) + stat partials
    z1, s1_sum, s1_sq = _pointwise_stage(x2d, w1, b1, bf16, tm)
    sc1, sh1 = _finalize_bn(s1_sum, s1_sq, M, g1, be1)

    # stage 2: BN1-normalize fused into depthwise 3x3 conv + ReLU6 (halo in-kernel)
    z2, s2_sum, s2_sq = _depthwise_stage(z1, sc1, sh1, w2, b2, N, H, W, bf16)
    sc2, sh2 = _finalize_bn(s2_sum, s2_sq, M, g2, be2)

    # stage 3: BN2-normalize fused into 1x1 project conv + ReLU6
    z3, s3_sum, s3_sq = _pointwise_stage(z2, w3, b3, bf16, tm, sc2, sh2)
    sc3, sh3 = _finalize_bn(s3_sum, s3_sq, M, g3, be3)

    # stage 4: apply BN3 (lane-dense elementwise pass, bf16 in -> f32 out)
    y = _bn_apply(z3, sc3, sh3, tm)

    y = y.reshape(N, H, W, cout_p)[..., :Cout]
    return jnp.transpose(y, (0, 3, 1, 2))                     # NHWC -> NCHW


# ---------------------------------------------------------------------------
# Deterministic parameter init (PyTorch-like, unpadded shapes)
# ---------------------------------------------------------------------------
def init_params(key, in_channels, expansion_ratio, out_channels):
    hidden = int(expansion_ratio * in_channels)
    ks = jax.random.split(key, 12)

    def rnd(k, shape, scale=0.1):
        return scale * jax.random.normal(k, shape, jnp.float32)

    return dict(
        # stage 1: 1x1 conv Cin -> hidden (weight stored as [Cin, hidden])
        w1=rnd(ks[0], (in_channels, hidden)),
        b1=rnd(ks[1], (1, hidden)),
        g1=1.0 + rnd(ks[2], (1, hidden)),
        be1=rnd(ks[3], (1, hidden)),
        # stage 2: depthwise 3x3 conv (taps stored as [9, hidden], row-major)
        w2=rnd(ks[4], (9, hidden)),
        b2=rnd(ks[5], (1, hidden)),
        g2=1.0 + rnd(ks[6], (1, hidden)),
        be2=rnd(ks[7], (1, hidden)),
        # stage 3: 1x1 conv hidden -> Cout (weight stored as [hidden, Cout])
        w3=rnd(ks[8], (hidden, out_channels)),
        b3=rnd(ks[9], (1, out_channels)),
        g3=1.0 + rnd(ks[10], (1, out_channels)),
        be3=rnd(ks[11], (1, out_channels)),
    )


# ---------------------------------------------------------------------------
# Pure-JAX reference (module math in f32 with the same bf16-storage casts)
# ---------------------------------------------------------------------------
def _reference(x_nchw, p):
    f32, bf16 = jnp.float32, jnp.bfloat16
    x = jnp.transpose(x_nchw, (0, 2, 3, 1)).astype(f32)
    N, H, W, _ = x.shape

    def scale_shift(y, g, b):
        mean = jnp.mean(y, axis=(0, 1, 2))
        var = jnp.mean(y * y, axis=(0, 1, 2)) - mean * mean
        s = g.reshape(-1) * jax.lax.rsqrt(var + EPS)
        return s, b.reshape(-1) - mean * s

    # stage 1
    h = jnp.einsum("nhwc,cd->nhwd", x.astype(bf16), p["w1"].astype(bf16),
                   preferred_element_type=f32) + p["b1"].reshape(-1)
    h = jnp.clip(h, 0.0, 6.0)
    s, t = scale_shift(h, p["g1"], p["be1"])
    h = h.astype(bf16).astype(f32) * s + t        # kernels store pre-BN act in bf16

    # stage 2 (depthwise 3x3, pad=1, f32)
    C = h.shape[-1]
    hp = jnp.pad(h, ((0, 0), (1, 1), (1, 1), (0, 0)))
    acc = jnp.zeros_like(h)
    for dy in range(3):
        for dx in range(3):
            acc = acc + hp[:, dy:dy + H, dx:dx + W, :] * p["w2"][dy * 3 + dx].reshape(1, 1, 1, C)
    h = jnp.clip(acc + p["b2"].reshape(-1), 0.0, 6.0)
    s, t = scale_shift(h, p["g2"], p["be2"])
    h = h.astype(bf16).astype(f32) * s + t

    # stage 3
    h = jnp.einsum("nhwc,cd->nhwd", h.astype(bf16), p["w3"].astype(bf16),
                   preferred_element_type=f32) + p["b3"].reshape(-1)
    h = jnp.clip(h, 0.0, 6.0)
    s, t = scale_shift(h, p["g3"], p["be3"])
    h = h.astype(bf16).astype(f32) * s + t
    return jnp.transpose(h, (0, 3, 1, 2))


if __name__ == "__main__":
    key = jax.random.PRNGKey(0)
    kx, kp = jax.random.split(key)

    in_channels, expansion_ratio, out_channels, stride = 4, 6, 8, 1
    N, H, W = 2, 16, 16

    x = jax.random.normal(kx, (N, in_channels, H, W), jnp.float32)  # NCHW, like PyTorch
    params = init_params(kp, in_channels, expansion_ratio, out_channels)

    fwd = jax.jit(inverted_residual_block)
    y = jax.block_until_ready(fwd(x, params))

    assert y.shape == (N, out_channels, H, W), y.shape
    assert bool(jnp.all(jnp.isfinite(y)))

    y_ref = jax.jit(_reference)(x, params)
    max_err = float(jnp.max(jnp.abs(y - y_ref)))
    assert max_err < 8e-2, f"max |err| vs reference = {max_err}"

    print("KERNEL_OK")
</pallas_src>

<mosaic_0001>
module attributes {stable_mosaic.version = 11 : i64} {
  func.func @_bn_apply_kernel(%arg0: i32, %arg1: memref<256x128xbf16, #tpu.memory_space<vmem>>, %arg2: memref<1x128xf32, #tpu.memory_space<vmem>>, %arg3: memref<1x128xf32, #tpu.memory_space<vmem>>, %arg4: memref<256x128xf32, #tpu.memory_space<vmem>>) attributes {dimension_semantics = [#tpu.dimension_semantics<parallel>], iteration_bounds = array<i64: 2>, scalar_prefetch = 0 : i64, scratch_operands = 0 : i64, tpu.core_type = #tpu.core_type<tc>, window_params = [{transform_indices = @transform_0, window_bounds = array<i64: 256, 128>}, {pipeline_mode = #tpu.pipeline_mode<synchronous>, transform_indices = @transform_1, window_bounds = array<i64: 1, 128>}, {pipeline_mode = #tpu.pipeline_mode<synchronous>, transform_indices = @transform_2, window_bounds = array<i64: 1, 128>}, {transform_indices = @transform_3, window_bounds = array<i64: 256, 128>}]} {
    %c0 = arith.constant 0 : index
    %c0_0 = arith.constant 0 : index
    %0 = vector.load %arg1[%c0, %c0_0] : memref<256x128xbf16, #tpu.memory_space<vmem>>, vector<256x128xbf16>
    %1 = arith.extf %0 : vector<256x128xbf16> to vector<256x128xf32>
    %c0_1 = arith.constant 0 : index
    %c0_2 = arith.constant 0 : index
    %2 = vector.load %arg2[%c0_1, %c0_2] : memref<1x128xf32, #tpu.memory_space<vmem>>, vector<1x128xf32>
    %3 = vector.broadcast %2 : vector<1x128xf32> to vector<256x128xf32>
    %4 = arith.mulf %1, %3 : vector<256x128xf32>
    %c0_3 = arith.constant 0 : index
    %c0_4 = arith.constant 0 : index
    %5 = vector.load %arg3[%c0_3, %c0_4] : memref<1x128xf32, #tpu.memory_space<vmem>>, vector<1x128xf32>
    %6 = vector.broadcast %5 : vector<1x128xf32> to vector<256x128xf32>
    %7 = arith.addf %4, %6 : vector<256x128xf32>
    %c0_5 = arith.constant 0 : index
    %c0_6 = arith.constant 0 : index
    %8 = vector.load %arg4[%c0_5, %c0_6] : memref<256x128xf32, #tpu.memory_space<vmem>>, vector<256x128xf32>
    tpu.vector_store %arg4[%c0_5, %c0_6], %7 {strides = array<i32>} : memref<256x128xf32, #tpu.memory_space<vmem>>, vector<256x128xf32>,
    return
  }
  func.func @transform_0(%arg0: i32) -> (i32, i32) {
    %c0_i32 = arith.constant 0 : i32
    %c0_i32_0 = arith.constant 0 : i32
    return %arg0, %c0_i32 : i32, i32
  }
  func.func @transform_1(%arg0: i32) -> (i32, i32) {
    %c0_i32 = arith.constant 0 : i32
    %c0_i32_0 = arith.constant 0 : i32
    %c0_i32_1 = arith.constant 0 : i32
    return %c0_i32, %c0_i32_0 : i32, i32
  }
  func.func @transform_2(%arg0: i32) -> (i32, i32) {
    %c0_i32 = arith.constant 0 : i32
    %c0_i32_0 = arith.constant 0 : i32
    %c0_i32_1 = arith.constant 0 : i32
    return %c0_i32, %c0_i32_0 : i32, i32
  }
  func.func @transform_3(%arg0: i32) -> (i32, i32) {
    %c0_i32 = arith.constant 0 : i32
    %c0_i32_0 = arith.constant 0 : i32
    return %arg0, %c0_i32 : i32, i32
  }
}

module attributes {stable_mosaic.version = 11 : i64} {
  func.func @_pointwise_kernel(%arg0: i32, %arg1: memref<256x128xbf16, #tpu.memory_space<vmem>>, %arg2: memref<128x128xbf16, #tpu.memory_space<vmem>>, %arg3: memref<1x128xf32, #tpu.memory_space<vmem>>, %arg4: memref<256x128xbf16, #tpu.memory_space<vmem>>, %arg5: memref<1x1x128xf32, #tpu.memory_space<vmem>>, %arg6: memref<1x1x128xf32, #tpu.memory_space<vmem>>) attributes {dimension_semantics = [#tpu.dimension_semantics<parallel>], iteration_bounds = array<i64: 2>, scalar_prefetch = 0 : i64, scratch_operands = 0 : i64, tpu.core_type = #tpu.core_type<tc>, window_params = [{transform_indices = @transform_0, window_bounds = array<i64: 256, 128>}, {pipeline_mode = #tpu.pipeline_mode<synchronous>, transform_indices = @transform_1, window_bounds = array<i64: 128, 128>}, {pipeline_mode = #tpu.pipeline_mode<synchronous>, transform_indices = @transform_2, window_bounds = array<i64: 1, 128>}, {transform_indices = @transform_3, window_bounds = array<i64: 256, 128>}, {transform_indices = @transform_4, window_bounds = array<i64: 1, 1, 128>}, {transform_indices = @transform_5, window_bounds = array<i64: 1, 1, 128>}]} {
    %c0 = arith.constant 0 : index
    %c0_0 = arith.constant 0 : index
    %0 = vector.load %arg1[%c0, %c0_0] : memref<256x128xbf16, #tpu.memory_space<vmem>>, vector<256x128xbf16>
    %c0_1 = arith.constant 0 : index
    %c0_2 = arith.constant 0 : index
    %1 = vector.load %arg2[%c0_1, %c0_2] : memref<128x128xbf16, #tpu.memory_space<vmem>>, vector<128x128xbf16>
    %cst = arith.constant dense<0.000000e+00> : vector<256x128xf32>
    %2 = tpu.matmul %0, %1, %cst {dimension_numbers = #tpu.dot_dimension_numbers<[1], [0], [0], [1], [0, 0, 1, 1], [], []>} : vector<256x128xbf16>, vector<128x128xbf16>, vector<256x128xf32> -> vector<256x128xf32>
    %c0_3 = arith.constant 0 : index
    %c0_4 = arith.constant 0 : index
    %3 = vector.load %arg3[%c0_3, %c0_4] : memref<1x128xf32, #tpu.memory_space<vmem>>, vector<1x128xf32>
    %4 = vector.broadcast %3 : vector<1x128xf32> to vector<256x128xf32>
    %5 = arith.addf %2, %4 : vector<256x128xf32>
    %cst_5 = arith.constant 0.000000e+00 : f32
    %cst_6 = arith.constant 6.000000e+00 : f32
    %6 = vector.broadcast %cst_5 : f32 to vector<256x128xf32>
    %7 = arith.maximumf %6, %5 : vector<256x128xf32>
    %8 = vector.broadcast %cst_6 : f32 to vector<256x128xf32>
    %9 = arith.minimumf %8, %7 : vector<256x128xf32>
    %10 = arith.truncf %9 : vector<256x128xf32> to vector<256x128xbf16>
    %c0_7 = arith.constant 0 : index
    %c0_8 = arith.constant 0 : index
    %11 = vector.load %arg4[%c0_7, %c0_8] : memref<256x128xbf16, #tpu.memory_space<vmem>>, vector<256x128xbf16>
    tpu.vector_store %arg4[%c0_7, %c0_8], %10 {strides = array<i32>} : memref<256x128xbf16, #tpu.memory_space<vmem>>, vector<256x128xbf16>,
    %cst_9 = arith.constant dense<0.000000e+00> : vector<128xf32>
    %12 = vector.multi_reduction <add>, %9, %cst_9 [0] : vector<256x128xf32> to vector<128xf32>
    %13 = vector.shape_cast %12 : vector<128xf32> to vector<1x128xf32>
    %c0_10 = arith.constant 0 : index
    %c0_11 = arith.constant 0 : index
    %c0_12 = arith.constant 0 : index
    %14 = vector.load %arg5[%c0_10, %c0_11, %c0_12] : memref<1x1x128xf32, #tpu.memory_space<vmem>>, vector<1x1x128xf32>
    %15 = vector.shape_cast %14 : vector<1x1x128xf32> to vector<1x128xf32>
    %16 = vector.shape_cast %13 : vector<1x128xf32> to vector<1x1x128xf32>
    tpu.vector_store %arg5[%c0_10, %c0_11, %c0_12], %16 {strides = array<i32>} : memref<1x1x128xf32, #tpu.memory_space<vmem>>, vector<1x1x128xf32>,
    %17 = arith.mulf %9, %9 : vector<256x128xf32>
    %cst_13 = arith.constant dense<0.000000e+00> : vector<128xf32>
    %18 = vector.multi_reduction <add>, %17, %cst_13 [0] : vector<256x128xf32> to vector<128xf32>
    %19 = vector.shape_cast %18 : vector<128xf32> to vector<1x128xf32>
    %c0_14 = arith.constant 0 : index
    %c0_15 = arith.constant 0 : index
    %c0_16 = arith.constant 0 : index
    %20 = vector.load %arg6[%c0_14, %c0_15, %c0_16] : memref<1x1x128xf32, #tpu.memory_space<vmem>>, vector<1x1x128xf32>
    %21 = vector.shape_cast %20 : vector<1x1x128xf32> to vector<1x128xf32>
    %22 = vector.shape_cast %19 : vector<1x128xf32> to vector<1x1x128xf32>
    tpu.vector_store %arg6[%c0_14, %c0_15, %c0_16], %22 {strides = array<i32>} : memref<1x1x128xf32, #tpu.memory_space<vmem>>, vector<1x1x128xf32>,
    return
  }
  func.func @transform_0(%arg0: i32) -> (i32, i32) {
    %c0_i32 = arith.constant 0 : i32
    %c0_i32_0 = arith.constant 0 : i32
    return %arg0, %c0_i32 : i32, i32
  }
  func.func @transform_1(%arg0: i32) -> (i32, i32) {
    %c0_i32 = arith.constant 0 : i32
    %c0_i32_0 = arith.constant 0 : i32
    %c0_i32_1 = arith.constant 0 : i32
    return %c0_i32, %c0_i32_0 : i32, i32
  }
  func.func @transform_2(%arg0: i32) -> (i32, i32) {
    %c0_i32 = arith.constant 0 : i32
    %c0_i32_0 = arith.constant 0 : i32
    %c0_i32_1 = arith.constant 0 : i32
    return %c0_i32, %c0_i32_0 : i32, i32
  }
  func.func @transform_3(%arg0: i32) -> (i32, i32) {
    %c0_i32 = arith.constant 0 : i32
    %c0_i32_0 = arith.constant 0 : i32
    return %arg0, %c0_i32 : i32, i32
  }
  func.func @transform_4(%arg0: i32) -> (i32, i32, i32) {
    %c0_i32 = arith.constant 0 : i32
    %c0_i32_0 = arith.constant 0 : i32
    %c0_i32_1 = arith.constant 0 : i32
    return %arg0, %c0_i32, %c0_i32_0 : i32, i32, i32
  }
  func.func @transform_5(%arg0: i32) -> (i32, i32, i32) {
    %c0_i32 = arith.constant 0 : i32
    %c0_i32_0 = arith.constant 0 : i32
    %c0_i32_1 = arith.constant 0 : i32
    return %arg0, %c0_i32, %c0_i32_0 : i32, i32, i32
  }
}

module attributes {stable_mosaic.version = 11 : i64} {
  func.func @_depthwise_kernel(%arg0: i32, %arg1: memref<256x128xbf16, #tpu.memory_space<vmem>>, %arg2: memref<1x128xf32, #tpu.memory_space<vmem>>, %arg3: memref<1x128xf32, #tpu.memory_space<vmem>>, %arg4: memref<9x128xf32, #tpu.memory_space<vmem>>, %arg5: memref<1x128xf32, #tpu.memory_space<vmem>>, %arg6: memref<256x128xbf16, #tpu.memory_space<vmem>>, %arg7: memref<1x1x128xf32, #tpu.memory_space<vmem>>, %arg8: memref<1x1x128xf32, #tpu.memory_space<vmem>>, %arg9: memref<290x128xf32, #tpu.memory_space<vmem>>) attributes {dimension_semantics = [#tpu.dimension_semantics<parallel>], iteration_bounds = array<i64: 2>, scalar_prefetch = 0 : i64, scratch_operands = 1 : i64, tpu.core_type = #tpu.core_type<tc>, window_params = [{transform_indices = @transform_0, window_bounds = array<i64: 256, 128>}, {pipeline_mode = #tpu.pipeline_mode<synchronous>, transform_indices = @transform_1, window_bounds = array<i64: 1, 128>}, {pipeline_mode = #tpu.pipeline_mode<synchronous>, transform_indices = @transform_2, window_bounds = array<i64: 1, 128>}, {pipeline_mode = #tpu.pipeline_mode<synchronous>, transform_indices = @transform_3, window_bounds = array<i64: 9, 128>}, {pipeline_mode = #tpu.pipeline_mode<synchronous>, transform_indices = @transform_4, window_bounds = array<i64: 1, 128>}, {transform_indices = @transform_5, window_bounds = array<i64: 256, 128>}, {transform_indices = @transform_6, window_bounds = array<i64: 1, 1, 128>}, {transform_indices = @transform_7, window_bounds = array<i64: 1, 1, 128>}]} {
    %c0 = arith.constant 0 : index
    %c0_0 = arith.constant 0 : index
    %0 = vector.load %arg1[%c0, %c0_0] : memref<256x128xbf16, #tpu.memory_space<vmem>>, vector<256x128xbf16>
    %1 = arith.extf %0 : vector<256x128xbf16> to vector<256x128xf32>
    %c0_1 = arith.constant 0 : index
    %c0_2 = arith.constant 0 : index
    %2 = vector.load %arg2[%c0_1, %c0_2] : memref<1x128xf32, #tpu.memory_space<vmem>>, vector<1x128xf32>
    %3 = vector.broadcast %2 : vector<1x128xf32> to vector<256x128xf32>
    %4 = arith.mulf %1, %3 : vector<256x128xf32>
    %c0_3 = arith.constant 0 : index
    %c0_4 = arith.constant 0 : index
    %5 = vector.load %arg3[%c0_3, %c0_4] : memref<1x128xf32, #tpu.memory_space<vmem>>, vector<1x128xf32>
    %6 = vector.broadcast %5 : vector<1x128xf32> to vector<256x128xf32>
    %7 = arith.addf %4, %6 : vector<256x128xf32>
    %cst = arith.constant 0.000000e+00 : f32
    %8 = vector.broadcast %cst : f32 to vector<17x128xf32>
    %c0_5 = arith.constant 0 : index
    %c0_6 = arith.constant 0 : index
    %9 = vector.load %arg9[%c0_5, %c0_6] : memref<290x128xf32, #tpu.memory_space<vmem>>, vector<17x128xf32>
    tpu.vector_store %arg9[%c0_5, %c0_6], %8 {strides = array<i32>} : memref<290x128xf32, #tpu.memory_space<vmem>>, vector<17x128xf32>,
    %c17 = arith.constant 17 : index
    %c0_7 = arith.constant 0 : index
    %10 = vector.load %arg9[%c17, %c0_7] : memref<290x128xf32, #tpu.memory_space<vmem>>, vector<256x128xf32>
    tpu.vector_store %arg9[%c17, %c0_7], %7 {strides = array<i32>} : memref<290x128xf32, #tpu.memory_space<vmem>>, vector<256x128xf32>,
    %c273 = arith.constant 273 : index
    %c0_8 = arith.constant 0 : index
    %11 = vector.load %arg9[%c273, %c0_8] : memref<290x128xf32, #tpu.memory_space<vmem>>, vector<17x128xf32>
    tpu.vector_store %arg9[%c273, %c0_8], %8 {strides = array<i32>} : memref<290x128xf32, #tpu.memory_space<vmem>>, vector<17x128xf32>,
    %12 = tpu.iota {dimensions = array<i32: 0>} : vector<256x128xi32>
    %c16_i32 = arith.constant 16 : i32
    %c0_i32 = arith.constant 0 : i32
    %13 = arith.cmpi eq, %c16_i32, %c0_i32 : i32
    %c1_i32 = arith.constant 1 : i32
    %14 = arith.select %13, %c1_i32, %c16_i32 : i32
    %15 = vector.broadcast %14 : i32 to vector<256x128xi32>
    %16 = arith.remsi %12, %15 : vector<256x128xi32>
    %c0_i32_9 = arith.constant 0 : i32
    %17 = vector.broadcast %c0_i32_9 : i32 to vector<256x128xi32>
    %18 = arith.cmpi ne, %16, %17 : vector<256x128xi32>
    %c0_i32_10 = arith.constant 0 : i32
    %19 = vector.broadcast %c0_i32_10 : i32 to vector<256x128xi32>
    %20 = arith.cmpi slt, %16, %19 : vector<256x128xi32>
    %c0_i32_11 = arith.constant 0 : i32
    %21 = arith.cmpi slt, %14, %c0_i32_11 : i32
    %22 = vector.broadcast %21 : i1 to vector<256x128xi1>
    %23 = vector.broadcast %22 : vector<256x128xi1> to vector<256x128xi1>
    %24 = arith.xori %20, %23 : vector<256x128xi1>
    %25 = arith.andi %24, %18 : vector<256x128xi1>
    %26 = vector.broadcast %14 : i32 to vector<256x128xi32>
    %27 = arith.addi %16, %26 : vector<256x128xi32>
    %28 = arith.select %25, %27, %16 : vector<256x128xi1>, vector<256x128xi32>
    %c1_i32_12 = arith.constant 1 : i32
    %29 = vector.broadcast %c1_i32_12 : i32 to vector<256x128xi32>
    %30 = arith.cmpi sge, %28, %29 : vector<256x128xi32>
    %c14_i32 = arith.constant 14 : i32
    %31 = vector.broadcast %c14_i32 : i32 to vector<256x128xi32>
    %32 = arith.cmpi sle, %28, %31 : vector<256x128xi32>
    %c0_13 = arith.constant 0 : index
    %c0_14 = arith.constant 0 : index
    %33 = vector.load %arg4[%c0_13, %c0_14] : memref<9x128xf32, #tpu.memory_space<vmem>>, vector<9x128xf32>
    %cst_15 = arith.constant 0.000000e+00 : f32
    %34 = vector.broadcast %cst_15 : f32 to vector<256x128xf32>
    %cst_16 = arith.constant 0.000000e+00 : f32
    %35 = vector.broadcast %cst_16 : f32 to vector<256x128xf32>
    %cst_17 = arith.constant 0.000000e+00 : f32
    %36 = vector.broadcast %cst_17 : f32 to vector<256x128xf32>
    %c0_18 = arith.constant 0 : index
    %c0_19 = arith.constant 0 : index
    %37 = vector.load %arg9[%c0_18, %c0_19] : memref<290x128xf32, #tpu.memory_space<vmem>>, vector<256x128xf32>
    %38 = vector.extract_strided_slice %33 {offsets = [0, 0], sizes = [1, 128], strides = [1, 1]} : vector<9x128xf32> to vector<1x128xf32>
    %39 = vector.broadcast %38 : vector<1x128xf32> to vector<256x128xf32>
    %40 = arith.mulf %37, %39 : vector<256x128xf32>
    %41 = arith.addf %34, %40 : vector<256x128xf32>
    %c1 = arith.constant 1 : index
    %c0_20 = arith.constant 0 : index
    %42 = vector.load %arg9[%c1, %c0_20] : memref<290x128xf32, #tpu.memory_space<vmem>>, vector<256x128xf32>
    %43 = vector.extract_strided_slice %33 {offsets = [1, 0], sizes = [1, 128], strides = [1, 1]} : vector<9x128xf32> to vector<1x128xf32>
    %44 = vector.broadcast %43 : vector<1x128xf32> to vector<256x128xf32>
    %45 = arith.mulf %42, %44 : vector<256x128xf32>
    %46 = arith.addf %35, %45 : vector<256x128xf32>
    %c2 = arith.constant 2 : index
    %c0_21 = arith.constant 0 : index
    %47 = vector.load %arg9[%c2, %c0_21] : memref<290x128xf32, #tpu.memory_space<vmem>>, vector<256x128xf32>
    %48 = vector.extract_strided_slice %33 {offsets = [2, 0], sizes = [1, 128], strides = [1, 1]} : vector<9x128xf32> to vector<1x128xf32>
    %49 = vector.broadcast %48 : vector<1x128xf32> to vector<256x128xf32>
    %50 = arith.mulf %47, %49 : vector<256x128xf32>
    %51 = arith.addf %36, %50 : vector<256x128xf32>
    %c16 = arith.constant 16 : index
    %c0_22 = arith.constant 0 : index
    %52 = vector.load %arg9[%c16, %c0_22] : memref<290x128xf32, #tpu.memory_space<vmem>>, vector<256x128xf32>
    %53 = vector.extract_strided_slice %33 {offsets = [3, 0], sizes = [1, 128], strides = [1, 1]} : vector<9x128xf32> to vector<1x128xf32>
    %54 = vector.broadcast %53 : vector<1x128xf32> to vector<256x128xf32>
    %55 = arith.mulf %52, %54 : vector<256x128xf32>
    %56 = arith.addf %41, %55 : vector<256x128xf32>
    %c17_23 = arith.constant 17 : index
    %c0_24 = arith.constant 0 : index
    %57 = vector.load %arg9[%c17_23, %c0_24] : memref<290x128xf32, #tpu.memory_space<vmem>>, vector<256x128xf32>
    %58 = vector.extract_strided_slice %33 {offsets = [4, 0], sizes = [1, 128], strides = [1, 1]} : vector<9x128xf32> to vector<1x128xf32>
    %59 = vector.broadcast %58 : vector<1x128xf32> to vector<256x128xf32>
    %60 = arith.mulf %57, %59 : vector<256x128xf32>
    %61 = arith.addf %46, %60 : vector<256x128xf32>
    %c18 = arith.constant 18 : index
    %c0_25 = arith.constant 0 : index
    %62 = vector.load %arg9[%c18, %c0_25] : memref<290x128xf32, #tpu.memory_space<vmem>>, vector<256x128xf32>
    %63 = vector.extract_strided_slice %33 {offsets = [5, 0], sizes = [1, 128], strides = [1, 1]} : vector<9x128xf32> to vector<1x128xf32>
    %64 = vector.broadcast %63 : vector<1x128xf32> to vector<256x128xf32>
    %65 = arith.mulf %62, %64 : vector<256x128xf32>
    %66 = arith.addf %51, %65 : vector<256x128xf32>
    %c32 = arith.constant 32 : index
    %c0_26 = arith.constant 0 : index
    %67 = vector.load %arg9[%c32, %c0_26] : memref<290x128xf32, #tpu.memory_space<vmem>>, vector<256x128xf32>
    %68 = vector.extract_strided_slice %33 {offsets = [6, 0], sizes = [1, 128], strides = [1, 1]} : vector<9x128xf32> to vector<1x128xf32>
    %69 = vector.broadcast %68 : vector<1x128xf32> to vector<256x128xf32>
    %70 = arith.mulf %67, %69 : vector<256x128xf32>
    %71 = arith.addf %56, %70 : vector<256x128xf32>
    %c33 = arith.constant 33 : index
    %c0_27 = arith.constant 0 : index
    %72 = vector.load %arg9[%c33, %c0_27] : memref<290x128xf32, #tpu.memory_space<vmem>>, vector<256x128xf32>
    %73 = vector.extract_strided_slice %33 {offsets = [7, 0], sizes = [1, 128], strides = [1, 1]} : vector<9x128xf32> to vector<1x128xf32>
    %74 = vector.broadcast %73 : vector<1x128xf32> to vector<256x128xf32>
    %75 = arith.mulf %72, %74 : vector<256x128xf32>
    %76 = arith.addf %61, %75 : vector<256x128xf32>
    %c34 = arith.constant 34 : index
    %c0_28 = arith.constant 0 : index
    %77 = vector.load %arg9[%c34, %c0_28] : memref<290x128xf32, #tpu.memory_space<vmem>>, vector<256x128xf32>
    %78 = vector.extract_strided_slice %33 {offsets = [8, 0], sizes = [1, 128], strides = [1, 1]} : vector<9x128xf32> to vector<1x128xf32>
    %79 = vector.broadcast %78 : vector<1x128xf32> to vector<256x128xf32>
    %80 = arith.mulf %77, %79 : vector<256x128xf32>
    %81 = arith.addf %66, %80 : vector<256x128xf32>
    %cst_29 = arith.constant 0.000000e+00 : f32
    %82 = vector.broadcast %cst_29 : f32 to vector<256x128xf32>
    %83 = arith.select %30, %71, %82 : vector<256x128xi1>, vector<256x128xf32>
    %84 = arith.addf %76, %83 : vector<256x128xf32>
    %cst_30 = arith.constant 0.000000e+00 : f32
    %85 = vector.broadcast %cst_30 : f32 to vector<256x128xf32>
    %86 = arith.select %32, %81, %85 : vector<256x128xi1>, vector<256x128xf32>
    %87 = arith.addf %84, %86 : vector<256x128xf32>
    %c0_31 = arith.constant 0 : index
    %c0_32 = arith.constant 0 : index
    %88 = vector.load %arg5[%c0_31, %c0_32] : memref<1x128xf32, #tpu.memory_space<vmem>>, vector<1x128xf32>
    %89 = vector.broadcast %88 : vector<1x128xf32> to vector<256x128xf32>
    %90 = arith.addf %87, %89 : vector<256x128xf32>
    %cst_33 = arith.constant 0.000000e+00 : f32
    %cst_34 = arith.constant 6.000000e+00 : f32
    %91 = vector.broadcast %cst_33 : f32 to vector<256x128xf32>
    %92 = arith.maximumf %91, %90 : vector<256x128xf32>
    %93 = vector.broadcast %cst_34 : f32 to vector<256x128xf32>
    %94 = arith.minimumf %93, %92 : vector<256x128xf32>
    %95 = arith.truncf %94 : vector<256x128xf32> to vector<256x128xbf16>
    %c0_35 = arith.constant 0 : index
    %c0_36 = arith.constant 0 : index
    %96 = vector.load %arg6[%c0_35, %c0_36] : memref<256x128xbf16, #tpu.memory_space<vmem>>, vector<256x128xbf16>
    tpu.vector_store %arg6[%c0_35, %c0_36], %95 {strides = array<i32>} : memref<256x128xbf16, #tpu.memory_space<vmem>>, vector<256x128xbf16>,
    %cst_37 = arith.constant dense<0.000000e+00> : vector<128xf32>
    %97 = vector.multi_reduction <add>, %94, %cst_37 [0] : vector<256x128xf32> to vector<128xf32>
    %98 = vector.shape_cast %97 : vector<128xf32> to vector<1x128xf32>
    %c0_38 = arith.constant 0 : index
    %c0_39 = arith.constant 0 : index
    %c0_40 = arith.constant 0 : index
    %99 = vector.load %arg7[%c0_38, %c0_39, %c0_40] : memref<1x1x128xf32, #tpu.memory_space<vmem>>, vector<1x1x128xf32>
    %100 = vector.shape_cast %99 : vector<1x1x128xf32> to vector<1x128xf32>
    %101 = vector.shape_cast %98 : vector<1x128xf32> to vector<1x1x128xf32>
    tpu.vector_store %arg7[%c0_38, %c0_39, %c0_40], %101 {strides = array<i32>} : memref<1x1x128xf32, #tpu.memory_space<vmem>>, vector<1x1x128xf32>,
    %102 = arith.mulf %94, %94 : vector<256x128xf32>
    %cst_41 = arith.constant dense<0.000000e+00> : vector<128xf32>
    %103 = vector.multi_reduction <add>, %102, %cst_41 [0] : vector<256x128xf32> to vector<128xf32>
    %104 = vector.shape_cast %103 : vector<128xf32> to vector<1x128xf32>
    %c0_42 = arith.constant 0 : index
    %c0_43 = arith.constant 0 : index
    %c0_44 = arith.constant 0 : index
    %105 = vector.load %arg8[%c0_42, %c0_43, %c0_44] : memref<1x1x128xf32, #tpu.memory_space<vmem>>, vector<1x1x128xf32>
    %106 = vector.shape_cast %105 : vector<1x1x128xf32> to vector<1x128xf32>
    %107 = vector.shape_cast %104 : vector<1x128xf32> to vector<1x1x128xf32>
    tpu.vector_store %arg8[%c0_42, %c0_43, %c0_44], %107 {strides = array<i32>} : memref<1x1x128xf32, #tpu.memory_space<vmem>>, vector<1x1x128xf32>,
    return
  }
  func.func @transform_0(%arg0: i32) -> (i32, i32) {
    %c0_i32 = arith.constant 0 : i32
    %c0_i32_0 = arith.constant 0 : i32
    return %arg0, %c0_i32 : i32, i32
  }
  func.func @transform_1(%arg0: i32) -> (i32, i32) {
    %c0_i32 = arith.constant 0 : i32
    %c0_i32_0 = arith.constant 0 : i32
    %c0_i32_1 = arith.constant 0 : i32
    return %c0_i32, %c0_i32_0 : i32, i32
  }
  func.func @transform_2(%arg0: i32) -> (i32, i32) {
    %c0_i32 = arith.constant 0 : i32
    %c0_i32_0 = arith.constant 0 : i32
    %c0_i32_1 = arith.constant 0 : i32
    return %c0_i32, %c0_i32_0 : i32, i32
  }
  func.func @transform_3(%arg0: i32) -> (i32, i32) {
    %c0_i32 = arith.constant 0 : i32
    %c0_i32_0 = arith.constant 0 : i32
    %c0_i32_1 = arith.constant 0 : i32
    return %c0_i32, %c0_i32_0 : i32, i32
  }
  func.func @transform_4(%arg0: i32) -> (i32, i32) {
    %c0_i32 = arith.constant 0 : i32
    %c0_i32_0 = arith.constant 0 : i32
    %c0_i32_1 = arith.constant 0 : i32
    return %c0_i32, %c0_i32_0 : i32, i32
  }
  func.func @transform_5(%arg0: i32) -> (i32, i32) {
    %c0_i32 = arith.constant 0 : i32
    %c0_i32_0 = arith.constant 0 : i32
    return %arg0, %c0_i32 : i32, i32
  }
  func.func @transform_6(%arg0: i32) -> (i32, i32, i32) {
    %c0_i32 = arith.constant 0 : i32
    %c0_i32_0 = arith.constant 0 : i32
    %c0_i32_1 = arith.constant 0 : i32
    return %arg0, %c0_i32, %c0_i32_0 : i32, i32, i32
  }
  func.func @transform_7(%arg0: i32) -> (i32, i32, i32) {
    %c0_i32 = arith.constant 0 : i32
    %c0_i32_0 = arith.constant 0 : i32
    %c0_i32_1 = arith.constant 0 : i32
    return %arg0, %c0_i32, %c0_i32_0 : i32, i32, i32
  }
}

module attributes {stable_mosaic.version = 11 : i64} {
  func.func @_pointwise_kernel(%arg0: i32, %arg1: memref<256x128xbf16, #tpu.memory_space<vmem>>, %arg2: memref<1x128xf32, #tpu.memory_space<vmem>>, %arg3: memref<1x128xf32, #tpu.memory_space<vmem>>, %arg4: memref<128x128xbf16, #tpu.memory_space<vmem>>, %arg5: memref<1x128xf32, #tpu.memory_space<vmem>>, %arg6: memref<256x128xbf16, #tpu.memory_space<vmem>>, %arg7: memref<1x1x128xf32, #tpu.memory_space<vmem>>, %arg8: memref<1x1x128xf32, #tpu.memory_space<vmem>>) attributes {dimension_semantics = [#tpu.dimension_semantics<parallel>], iteration_bounds = array<i64: 2>, scalar_prefetch = 0 : i64, scratch_operands = 0 : i64, tpu.core_type = #tpu.core_type<tc>, window_params = [{transform_indices = @transform_0, window_bounds = array<i64: 256, 128>}, {pipeline_mode = #tpu.pipeline_mode<synchronous>, transform_indices = @transform_1, window_bounds = array<i64: 1, 128>}, {pipeline_mode = #tpu.pipeline_mode<synchronous>, transform_indices = @transform_2, window_bounds = array<i64: 1, 128>}, {pipeline_mode = #tpu.pipeline_mode<synchronous>, transform_indices = @transform_3, window_bounds = array<i64: 128, 128>}, {pipeline_mode = #tpu.pipeline_mode<synchronous>, transform_indices = @transform_4, window_bounds = array<i64: 1, 128>}, {transform_indices = @transform_5, window_bounds = array<i64: 256, 128>}, {transform_indices = @transform_6, window_bounds = array<i64: 1, 1, 128>}, {transform_indices = @transform_7, window_bounds = array<i64: 1, 1, 128>}]} {
    %c0 = arith.constant 0 : index
    %c0_0 = arith.constant 0 : index
    %0 = vector.load %arg1[%c0, %c0_0] : memref<256x128xbf16, #tpu.memory_space<vmem>>, vector<256x128xbf16>
    %1 = arith.extf %0 : vector<256x128xbf16> to vector<256x128xf32>
    %c0_1 = arith.constant 0 : index
    %c0_2 = arith.constant 0 : index
    %2 = vector.load %arg2[%c0_1, %c0_2] : memref<1x128xf32, #tpu.memory_space<vmem>>, vector<1x128xf32>
    %3 = vector.broadcast %2 : vector<1x128xf32> to vector<256x128xf32>
    %4 = arith.mulf %1, %3 : vector<256x128xf32>
    %c0_3 = arith.constant 0 : index
    %c0_4 = arith.constant 0 : index
    %5 = vector.load %arg3[%c0_3, %c0_4] : memref<1x128xf32, #tpu.memory_space<vmem>>, vector<1x128xf32>
    %6 = vector.broadcast %5 : vector<1x128xf32> to vector<256x128xf32>
    %7 = arith.addf %4, %6 : vector<256x128xf32>
    %8 = arith.truncf %7 : vector<256x128xf32> to vector<256x128xbf16>
    %c0_5 = arith.constant 0 : index
    %c0_6 = arith.constant 0 : index
    %9 = vector.load %arg4[%c0_5, %c0_6] : memref<128x128xbf16, #tpu.memory_space<vmem>>, vector<128x128xbf16>
    %cst = arith.constant dense<0.000000e+00> : vector<256x128xf32>
    %10 = tpu.matmul %8, %9, %cst {dimension_numbers = #tpu.dot_dimension_numbers<[1], [0], [0], [1], [0, 0, 1, 1], [], []>} : vector<256x128xbf16>, vector<128x128xbf16>, vector<256x128xf32> -> vector<256x128xf32>
    %c0_7 = arith.constant 0 : index
    %c0_8 = arith.constant 0 : index
    %11 = vector.load %arg5[%c0_7, %c0_8] : memref<1x128xf32, #tpu.memory_space<vmem>>, vector<1x128xf32>
    %12 = vector.broadcast %11 : vector<1x128xf32> to vector<256x128xf32>
    %13 = arith.addf %10, %12 : vector<256x128xf32>
    %cst_9 = arith.constant 0.000000e+00 : f32
    %cst_10 = arith.constant 6.000000e+00 : f32
    %14 = vector.broadcast %cst_9 : f32 to vector<256x128xf32>
    %15 = arith.maximumf %14, %13 : vector<256x128xf32>
    %16 = vector.broadcast %cst_10 : f32 to vector<256x128xf32>
    %17 = arith.minimumf %16, %15 : vector<256x128xf32>
    %18 = arith.truncf %17 : vector<256x128xf32> to vector<256x128xbf16>
    %c0_11 = arith.constant 0 : index
    %c0_12 = arith.constant 0 : index
    %19 = vector.load %arg6[%c0_11, %c0_12] : memref<256x128xbf16, #tpu.memory_space<vmem>>, vector<256x128xbf16>
    tpu.vector_store %arg6[%c0_11, %c0_12], %18 {strides = array<i32>} : memref<256x128xbf16, #tpu.memory_space<vmem>>, vector<256x128xbf16>,
    %cst_13 = arith.constant dense<0.000000e+00> : vector<128xf32>
    %20 = vector.multi_reduction <add>, %17, %cst_13 [0] : vector<256x128xf32> to vector<128xf32>
    %21 = vector.shape_cast %20 : vector<128xf32> to vector<1x128xf32>
    %c0_14 = arith.constant 0 : index
    %c0_15 = arith.constant 0 : index
    %c0_16 = arith.constant 0 : index
    %22 = vector.load %arg7[%c0_14, %c0_15, %c0_16] : memref<1x1x128xf32, #tpu.memory_space<vmem>>, vector<1x1x128xf32>
    %23 = vector.shape_cast %22 : vector<1x1x128xf32> to vector<1x128xf32>
    %24 = vector.shape_cast %21 : vector<1x128xf32> to vector<1x1x128xf32>
    tpu.vector_store %arg7[%c0_14, %c0_15, %c0_16], %24 {strides = array<i32>} : memref<1x1x128xf32, #tpu.memory_space<vmem>>, vector<1x1x128xf32>,
    %25 = arith.mulf %17, %17 : vector<256x128xf32>
    %cst_17 = arith.constant dense<0.000000e+00> : vector<128xf32>
    %26 = vector.multi_reduction <add>, %25, %cst_17 [0] : vector<256x128xf32> to vector<128xf32>
    %27 = vector.shape_cast %26 : vector<128xf32> to vector<1x128xf32>
    %c0_18 = arith.constant 0 : index
    %c0_19 = arith.constant 0 : index
    %c0_20 = arith.constant 0 : index
    %28 = vector.load %arg8[%c0_18, %c0_19, %c0_20] : memref<1x1x128xf32, #tpu.memory_space<vmem>>, vector<1x1x128xf32>
    %29 = vector.shape_cast %28 : vector<1x1x128xf32> to vector<1x128xf32>
    %30 = vector.shape_cast %27 : vector<1x128xf32> to vector<1x1x128xf32>
    tpu.vector_store %arg8[%c0_18, %c0_19, %c0_20], %30 {strides = array<i32>} : memref<1x1x128xf32, #tpu.memory_space<vmem>>, vector<1x1x128xf32>,
    return
  }
  func.func @transform_0(%arg0: i32) -> (i32, i32) {
    %c0_i32 = arith.constant 0 : i32
    %c0_i32_0 = arith.constant 0 : i32
    return %arg0, %c0_i32 : i32, i32
  }
  func.func @transform_1(%arg0: i32) -> (i32, i32) {
    %c0_i32 = arith.constant 0 : i32
    %c0_i32_0 = arith.constant 0 : i32
    %c0_i32_1 = arith.constant 0 : i32
    return %c0_i32, %c0_i32_0 : i32, i32
  }
  func.func @transform_2(%arg0: i32) -> (i32, i32) {
    %c0_i32 = arith.constant 0 : i32
    %c0_i32_0 = arith.constant 0 : i32
    %c0_i32_1 = arith.constant 0 : i32
    return %c0_i32, %c0_i32_0 : i32, i32
  }
  func.func @transform_3(%arg0: i32) -> (i32, i32) {
    %c0_i32 = arith.constant 0 : i32
    %c0_i32_0 = arith.constant 0 : i32
    %c0_i32_1 = arith.constant 0 : i32
    return %c0_i32, %c0_i32_0 : i32, i32
  }
  func.func @transform_4(%arg0: i32) -> (i32, i32) {
    %c0_i32 = arith.constant 0 : i32
    %c0_i32_0 = arith.constant 0 : i32
    %c0_i32_1 = arith.constant 0 : i32
    return %c0_i32, %c0_i32_0 : i32, i32
  }
  func.func @transform_5(%arg0: i32) -> (i32, i32) {
    %c0_i32 = arith.constant 0 : i32
    %c0_i32_0 = arith.constant 0 : i32
    return %arg0, %c0_i32 : i32, i32
  }
  func.func @transform_6(%arg0: i32) -> (i32, i32, i32) {
    %c0_i32 = arith.constant 0 : i32
    %c0_i32_0 = arith.constant 0 : i32
    %c0_i32_1 = arith.constant 0 : i32
    return %arg0, %c0_i32, %c0_i32_0 : i32, i32, i32
  }
  func.func @transform_7(%arg0: i32) -> (i32, i32, i32) {
    %c0_i32 = arith.constant 0 : i32
    %c0_i32_0 = arith.constant 0 : i32
    %c0_i32_1 = arith.constant 0 : i32
    return %arg0, %c0_i32, %c0_i32_0 : i32, i32, i32
  }
}

</mosaic_0001>

<bundles_post_ra>
// kernel: inverted_residual_block.7
= control target key start
LH: loop header
LB: loop body
LE: loop exit
PB: predicated region body
PF: predicated region fallthrough
CT: control target
= control target key end

     0   :  { %s532_s12 = smov 0   ;;  %s675_s0 = inlined_call_operand.vmem [shape: bf16[512,128], index: 0, kind: input, shape index: {}]   ;;  %s676_s1 = inlined_call_operand.vmem [shape: f32[1,128], index: 1, kind: input, shape index: {}]   ;;  %s677_s2 = inlined_call_operand.vmem [shape: f32[1,128], index: 2, kind: input, shape index: {}]   ;;  %s678_s3 = inlined_call_operand.vmem [shape: f32[512,128], index: 3, kind: output, shape index: {}]  }
   0x1 LB: > { %s404_s13 = sadd.s32 4294967295, %s510_s12   ;;  %p408_p0 = scmp.ge.s32.totalorder %s510_s12, 1  ;;  %s510_s12 = sphi %s532_s12, %s13_s12  }
   0x2   : > { %p138_p1 = scmp.lt.s32.totalorder %s510_s12, 3 }
   0x4   : > { %p139_p2 = pnand %p408_p0, %p138_p1 }
   0x5   : > { %s409_s14 = sshll.u32 (!%p139_p2), %s404_s13, 5  ;;  %v548_v0 = vld [vmem:[%s676_s1] ss:$0 sm:$0xff] (!%p139_p2) }
   0x6   : > { %142 = sbr.rel (%p139_p2) target bundleno = 45 (0x2d), region = 32  ;;  %p163_p3 = scmp.lt.s32.totalorder (!%p139_p2), %s409_s14, 63  ;;  %v557_v9 = vld [vmem:[%s677_s2] ss:$0 sm:$0xff] (!%p139_p2) }
   0xd   : > { %s680_s14 = smov (!%p163_p3, %s409_s14), 63 }
   0xe   : > { %s410_s15 = sshll.u32 %s680_s14, 2  ;;  %s412_s21 = sshll.u32 %s680_s14, 3 }
   0xf   : > { %s543_s18 = scalar_lea.vmem %s675_s0, %s410_s15  ;;  %s566_s26 = scalar_lea.vmem %s678_s3, %s412_s21 }
  0x10   : > { %v418_v1 = vld [vmem:[%s543_s18] sm:$0xff]   ;;  %v481_v2 = vld [vmem:[%s543_s18 + $0x8] sm:$0xff]   ;;  %v482_v3 = vld [vmem:[%s543_s18 + $0x10] sm:$0xff]  }
  0x11   : > { %v419_v4 = vunpack.c.l.bf16 %v418_v1  ;;  %v420_v5 = vunpack.c.h.bf16 %v418_v1  ;;  %v423_v6 = vunpack.c.l.bf16 %v481_v2  ;;  %v424_v7 = vunpack.c.h.bf16 %v481_v2  ;;  %v483_v8 = vld [vmem:[%s543_s18 + $0x18] sm:$0xff]   ;;  %v484_v22 = vld [vmem:[%s543_s18 + $0x20] sm:$0xff]   ;;  %v485_v23 = vld [vmem:[%s543_s18 + $0x28] sm:$0xff]  }
  0x12   : > { %v427_v10 = vunpack.c.l.bf16 %v482_v3  ;;  %v428_v11 = vunpack.c.h.bf16 %v482_v3  ;;  %v431_v12 = vunpack.c.l.bf16 %v483_v8  ;;  %v432_v13 = vunpack.c.h.bf16 %v483_v8  ;;  %v486_v28 = vld [vmem:[%s543_s18 + $0x30] sm:$0xff]   ;;  %v487_v29 = vld [vmem:[%s543_s18 + $0x38] sm:$0xff]   ;;  %v488_v50 = vld [vmem:[%s543_s18 + $0x40] sm:$0xff]  }
  0x13   : > { %v245_v14 = vmul.f32 %v419_v4, %v548_v0  ;;  %v246_v15 = vmul.f32 %v420_v5, %v548_v0  ;;  %v247_v16 = vmul.f32 %v423_v6, %v548_v0  ;;  %v248_v17 = vmul.f32 %v424_v7, %v548_v0  ;;  %v489_v51 = vld [vmem:[%s543_s18 + $0x48] sm:$0xff]   ;;  %v490_v56 = vld [vmem:[%s543_s18 + $0x50] sm:$0xff]   ;;  %v491_v57 = vld [vmem:[%s543_s18 + $0x58] sm:$0xff]  }
  0x14   : > { %v249_v18 = vmul.f32 %v427_v10, %v548_v0  ;;  %v250_v19 = vmul.f32 %v428_v11, %v548_v0  ;;  %v251_v20 = vmul.f32 %v431_v12, %v548_v0  ;;  %v252_v21 = vmul.f32 %v432_v13, %v548_v0 }
  0x15   : > { %v284_v24 = vadd.f32 %v557_v9, %v245_v14  ;;  %v285_v25 = vadd.f32 %v557_v9, %v246_v15  ;;  %v286_v26 = vadd.f32 %v557_v9, %v247_v16  ;;  %v287_v27 = vadd.f32 %v557_v9, %v248_v17  ;;  %v492_v16 = vld [vmem:[%s543_s18 + $0x60] sm:$0xff]   ;;  %v493_v17 = vld [vmem:[%s543_s18 + $0x68] sm:$0xff]  }
  0x16   : > { %v288_v30 = vadd.f32 %v557_v9, %v249_v18  ;;  %v289_v31 = vadd.f32 %v557_v9, %v250_v19  ;;  %v290_v32 = vadd.f32 %v557_v9, %v251_v20  ;;  %v291_v33 = vadd.f32 %v557_v9, %v252_v21 }
  0x17   : > { %316 = vst [vmem:[%s566_s26] sm:$0xff] %v284_v24  ;;  %317 = vst [vmem:[%s566_s26 + $0x8] sm:$0xff] %v285_v25  ;;  %v435_v34 = vunpack.c.l.bf16 %v484_v22  ;;  %v436_v35 = vunpack.c.h.bf16 %v484_v22  ;;  %v439_v36 = vunpack.c.l.bf16 %v485_v23  ;;  %v440_v37 = vunpack.c.h.bf16 %v485_v23  ;;  %v494_v22 = vld [vmem:[%s543_s18 + $0x70] sm:$0xff]   ;;  %v495_v23 = vld [vmem:[%s543_s18 + $0x78] sm:$0xff]  }
  0x18   : > { %318 = vst [vmem:[%s566_s26 + $0x10] sm:$0xff] %v286_v26  ;;  %319 = vst [vmem:[%s566_s26 + $0x18] sm:$0xff] %v287_v27  ;;  %v443_v38 = vunpack.c.l.bf16 %v486_v28  ;;  %v444_v39 = vunpack.c.h.bf16 %v486_v28  ;;  %v447_v40 = vunpack.c.l.bf16 %v487_v29  ;;  %v448_v41 = vunpack.c.h.bf16 %v487_v29 }
  0x19   : > { %320 = vst [vmem:[%s566_s26 + $0x20] sm:$0xff] %v288_v30  ;;  %321 = vst [vmem:[%s566_s26 + $0x28] sm:$0xff] %v289_v31  ;;  %v253_v42 = vmul.f32 %v435_v34, %v548_v0  ;;  %v254_v43 = vmul.f32 %v436_v35, %v548_v0  ;;  %v255_v44 = vmul.f32 %v439_v36, %v548_v0  ;;  %v451_v62 = vunpack.c.l.bf16 %v488_v50 }
  0x1a   : > { %322 = vst [vmem:[%s566_s26 + $0x30] sm:$0xff] %v290_v32  ;;  %323 = vst [vmem:[%s566_s26 + $0x38] sm:$0xff] %v291_v33  ;;  %v256_v45 = vmul.f32 %v440_v37, %v548_v0  ;;  %v257_v46 = vmul.f32 %v443_v38, %v548_v0  ;;  %v258_v47 = vmul.f32 %v444_v39, %v548_v0  ;;  %v452_v63 = vunpack.c.h.bf16 %v488_v50 }
  0x1b   : > { %v259_v48 = vmul.f32 %v447_v40, %v548_v0  ;;  %v260_v49 = vmul.f32 %v448_v41, %v548_v0  ;;  %v292_v52 = vadd.f32 %v557_v9, %v253_v42  ;;  %v293_v53 = vadd.f32 %v557_v9, %v254_v43 }
  0x1c   : > { %v294_v54 = vadd.f32 %v557_v9, %v255_v44  ;;  %v295_v55 = vadd.f32 %v557_v9, %v256_v45  ;;  %v296_v58 = vadd.f32 %v557_v9, %v257_v46  ;;  %v297_v59 = vadd.f32 %v557_v9, %v258_v47 }
  0x1d   : > { %v298_v60 = vadd.f32 %v557_v9, %v259_v48  ;;  %v299_v61 = vadd.f32 %v557_v9, %v260_v49  ;;  %324 = vst [vmem:[%s566_s26 + $0x40] sm:$0xff] %v292_v52  ;;  %325 = vst [vmem:[%s566_s26 + $0x48] sm:$0xff] %v293_v53  ;;  %v455_v1 = vunpack.c.l.bf16 %v489_v51  ;;  %v456_v2 = vunpack.c.h.bf16 %v489_v51 }
  0x1e   : > { %326 = vst [vmem:[%s566_s26 + $0x50] sm:$0xff] %v294_v54  ;;  %327 = vst [vmem:[%s566_s26 + $0x58] sm:$0xff] %v295_v55  ;;  %v459_v3 = vunpack.c.l.bf16 %v490_v56  ;;  %v460_v4 = vunpack.c.h.bf16 %v490_v56  ;;  %v463_v5 = vunpack.c.l.bf16 %v491_v57  ;;  %v464_v6 = vunpack.c.h.bf16 %v491_v57 }
  0x1f   : > { %328 = vst [vmem:[%s566_s26 + $0x60] sm:$0xff] %v296_v58  ;;  %329 = vst [vmem:[%s566_s26 + $0x68] sm:$0xff] %v297_v59  ;;  %v261_v7 = vmul.f32 %v451_v62, %v548_v0  ;;  %v262_v8 = vmul.f32 %v452_v63, %v548_v0  ;;  %v263_v10 = vmul.f32 %v455_v1, %v548_v0  ;;  %v467_v28 = vunpack.c.l.bf16 %v492_v16 }
  0x20   : > { %330 = vst [vmem:[%s566_s26 + $0x70] sm:$0xff] %v298_v60  ;;  %331 = vst [vmem:[%s566_s26 + $0x78] sm:$0xff] %v299_v61  ;;  %v264_v11 = vmul.f32 %v456_v2, %v548_v0  ;;  %v265_v12 = vmul.f32 %v459_v3, %v548_v0  ;;  %v266_v13 = vmul.f32 %v460_v4, %v548_v0  ;;  %v468_v29 = vunpack.c.h.bf16 %v492_v16 }
  0x21   : > { %v267_v14 = vmul.f32 %v463_v5, %v548_v0  ;;  %v268_v15 = vmul.f32 %v464_v6, %v548_v0  ;;  %v300_v18 = vadd.f32 %v557_v9, %v261_v7  ;;  %v301_v19 = vadd.f32 %v557_v9, %v262_v8 }
  0x22   : > { %v302_v20 = vadd.f32 %v557_v9, %v263_v10  ;;  %v303_v21 = vadd.f32 %v557_v9, %v264_v11  ;;  %v304_v24 = vadd.f32 %v557_v9, %v265_v12  ;;  %v305_v25 = vadd.f32 %v557_v9, %v266_v13 }
  0x23   : > { %v306_v26 = vadd.f32 %v557_v9, %v267_v14  ;;  %v307_v27 = vadd.f32 %v557_v9, %v268_v15  ;;  %332 = vst [vmem:[%s566_s26 + $0x80] sm:$0xff] %v300_v18  ;;  %333 = vst [vmem:[%s566_s26 + $0x88] sm:$0xff] %v301_v19  ;;  %v471_v30 = vunpack.c.l.bf16 %v493_v17  ;;  %v472_v31 = vunpack.c.h.bf16 %v493_v17 }
  0x24   : > { %334 = vst [vmem:[%s566_s26 + $0x90] sm:$0xff] %v302_v20  ;;  %335 = vst [vmem:[%s566_s26 + $0x98] sm:$0xff] %v303_v21  ;;  %v475_v32 = vunpack.c.l.bf16 %v494_v22  ;;  %v476_v33 = vunpack.c.h.bf16 %v494_v22  ;;  %v479_v34 = vunpack.c.l.bf16 %v495_v23  ;;  %v480_v35 = vunpack.c.h.bf16 %v495_v23 }
  0x25   : > { %336 = vst [vmem:[%s566_s26 + $0xa0] sm:$0xff] %v304_v24  ;;  %337 = vst [vmem:[%s566_s26 + $0xa8] sm:$0xff] %v305_v25  ;;  %v269_v36 = vmul.f32 %v467_v28, %v548_v0  ;;  %v270_v37 = vmul.f32 %v468_v29, %v548_v0  ;;  %v271_v38 = vmul.f32 %v471_v30, %v548_v0 }
  0x26   : > { %338 = vst [vmem:[%s566_s26 + $0xb0] sm:$0xff] %v306_v26  ;;  %339 = vst [vmem:[%s566_s26 + $0xb8] sm:$0xff] %v307_v27  ;;  %v272_v39 = vmul.f32 %v472_v31, %v548_v0  ;;  %v273_v40 = vmul.f32 %v475_v32, %v548_v0  ;;  %v274_v41 = vmul.f32 %v476_v33, %v548_v0 }
  0x27   : > { %v275_v42 = vmul.f32 %v479_v34, %v548_v0  ;;  %v276_v43 = vmul.f32 %v480_v35, %v548_v0  ;;  %v308_v44 = vadd.f32 %v557_v9, %v269_v36  ;;  %v309_v45 = vadd.f32 %v557_v9, %v270_v37 }
  0x28   : > { %v310_v46 = vadd.f32 %v557_v9, %v271_v38  ;;  %v311_v47 = vadd.f32 %v557_v9, %v272_v39  ;;  %v312_v48 = vadd.f32 %v557_v9, %v273_v40  ;;  %v313_v49 = vadd.f32 %v557_v9, %v274_v41 }
  0x29   : > { %v314_v50 = vadd.f32 %v557_v9, %v275_v42  ;;  %v315_v51 = vadd.f32 %v557_v9, %v276_v43  ;;  %340 = vst [vmem:[%s566_s26 + $0xc0] sm:$0xff] %v308_v44  ;;  %341 = vst [vmem:[%s566_s26 + $0xc8] sm:$0xff] %v309_v45 }
  0x2a   : > { %342 = vst [vmem:[%s566_s26 + $0xd0] sm:$0xff] %v310_v46  ;;  %343 = vst [vmem:[%s566_s26 + $0xd8] sm:$0xff] %v311_v47 }
  0x2b   : > { %344 = vst [vmem:[%s566_s26 + $0xe0] sm:$0xff] %v312_v48  ;;  %345 = vst [vmem:[%s566_s26 + $0xe8] sm:$0xff] %v313_v49 }
  0x2c   : > { %346 = vst [vmem:[%s566_s26 + $0xf0] sm:$0xff] %v314_v50  ;;  %347 = vst [vmem:[%s566_s26 + $0xf8] sm:$0xff] %v315_v51 }
  0x2d PF: > { %s13_s12 = sadd.s32 1, %s510_s12  }
  0x2e   : > { %p10_p4 = scmp.ge.s32.totalorder %s13_s12, 4  }
  0x30   :  { %12 = sbr.rel (!%p10_p4) target bundleno = 1 (0x1), region = 62 }

// kernel: inverted_residual_block.4
= control target key start
LH: loop header
LB: loop body
LE: loop exit
PB: predicated region body
PF: predicated region fallthrough
CT: control target
= control target key end

     0   :  { %s1397_s18 = smov 0   ;;  %s1595_s0 = inlined_call_operand.vmem [shape: bf16[512,128], index: 0, kind: input, shape index: {}]   ;;  %s1596_s1 = inlined_call_operand.vmem [shape: bf16[128,128], index: 1, kind: input, shape index: {}]   ;;  %s1597_s2 = inlined_call_operand.vmem [shape: f32[1,128], index: 2, kind: input, shape index: {}]   ;;  %s1598_s3 = inlined_call_operand.vmem [shape: bf16[512,128], index: 3, kind: output, shape index: {0}]   ;;  %s1599_s4 = inlined_call_operand.vmem [shape: f32[2,1,128], index: 4, kind: output, shape index: {1}]   ;;  %s1600_s5 = inlined_call_operand.vmem [shape: f32[2,1,128], index: 5, kind: output, shape index: {2}]  }
   0x1 LB: > { %s1403_s19 = sadd.s32 4294967295, %s1365_s18   ;;  %p1048_p0 = scmp.ge.s32.totalorder %s1365_s18, 1  ;;  %s1365_s18 = sphi %s1397_s18, %s16_s18  }
   0x2   : > { %p193_p1 = scmp.lt.s32.totalorder %s1365_s18, 3 }
   0x4   : > { %p194_p2 = pnand %p1048_p0, %p193_p1 }
   0x5   : > { %v1335_v0 = vld [vmem:[%s1596_s1] sm:$0xff] (!%p194_p2)   ;;  %s1049_s22 = sshll.u32 (!%p194_p2), %s1403_s19, 5  ;;  %v1336_v1 = vld [vmem:[%s1596_s1 + $0x8] sm:$0xff] (!%p194_p2)   ;;  %v1337_v2 = vld [vmem:[%s1596_s1 + $0x10] sm:$0xff] (!%p194_p2)   ;;  %p239_p4 = scmp.lt.s32.totalorder (!%p194_p2), %s1403_s19, 1 }
   0x6   : > { %197 = sbr.rel (%p194_p2) target bundleno = 337 (0x151), region = 32  ;;  %p228_p3 = scmp.lt.s32.totalorder (!%p194_p2), %s1049_s22, 63  ;;  %1263 = vmatprep.subr.bf16.mxu0 (!%p194_p2), %v1335_v0  ;;  %1311 = vmatprep.subr.bf16.mxu1 (!%p194_p2), %v1335_v0  ;;  %v1338_v3 = vld [vmem:[%s1596_s1 + $0x18] sm:$0xff] (!%p194_p2)   ;;  %v1339_v5 = vld [vmem:[%s1596_s1 + $0x20] sm:$0xff] (!%p194_p2)   ;;  %v1340_v6 = vld [vmem:[%s1596_s1 + $0x28] sm:$0xff] (!%p194_p2)  }
   0x7   : > { %1264 = vmatpush3.bf16.msra.mxu0 (!%p194_p2), %v1335_v0  ;;  %1319 = vmatpush3.bf16.msra.mxu1 (!%p194_p2), %v1335_v0  ;;  %v1341_v8 = vld [vmem:[%s1596_s1 + $0x30] sm:$0xff] (!%p194_p2)   ;;  %v1342_v9 = vld [vmem:[%s1596_s1 + $0x38] sm:$0xff] (!%p194_p2)   ;;  %v1461_v24 = vld [vmem:[%s1597_s2] ss:$0 sm:$0xff] (!%p194_p2) }
   0x8   : > { %1265 = vmatprep.subr.bf16.mxu0 (!%p194_p2), %v1336_v1  ;;  %1312 = vmatprep.subr.bf16.mxu1 (!%p194_p2), %v1336_v1 }
   0xb   : > { %1266 = vmatpush3.bf16.msra.mxu0 (!%p194_p2), %v1336_v1  ;;  %1320 = vmatpush3.bf16.msra.mxu1 (!%p194_p2), %v1336_v1 }
   0xc   : > { %1267 = vmatprep.subr.bf16.mxu0 (!%p194_p2), %v1337_v2  ;;  %1313 = vmatprep.subr.bf16.mxu1 (!%p194_p2), %v1337_v2 }
   0xd   : > { %s1602_s22 = smov (!%p228_p3, %s1049_s22), 63  ;;  %s1604_s19 = smov (!%p239_p4, %s1403_s19), 1 }
   0xe   : > { %s1050_s27 = sshll.u32 %s1602_s22, 2  ;;  %s241_s25 = scalar_lea.vmem %s1599_s4, %s1604_s19 }
   0xf   : > { %s1425_s30 = scalar_lea.vmem %s1595_s0, %s1050_s27  ;;  %1268 = vmatpush3.bf16.msra.mxu0 %v1337_v2  ;;  %1321 = vmatpush3.bf16.msra.mxu1 %v1337_v2  ;;  %s1482_s23 = scalar_lea.vmem %s1598_s3, %s1050_s27 }
  0x10   : > { %v1343_v4 = vld [vmem:[%s1425_s30] sm:$0xff]   ;;  %1269 = vmatprep.subr.bf16.mxu0 %v1338_v3  ;;  %1314 = vmatprep.subr.bf16.mxu1 %v1338_v3  ;;  %v1344_v10 = vld [vmem:[%s1425_s30 + $0x8] sm:$0xff]   ;;  %v1345_v12 = vld [vmem:[%s1425_s30 + $0x10] sm:$0xff]   ;;  %s244_s28 = scalar_lea.vmem %s1600_s5, %s1604_s19 }
  0x11   : > { %1279 = vmatprep.mubr.bf16.mxu0 %v1343_v4  ;;  %v1351_v7 = vld [vmem:[%s1425_s30 + $0x40] sm:$0xff]   ;;  %v1352_v11 = vld [vmem:[%s1425_s30 + $0x48] sm:$0xff]   ;;  %v1353_v13 = vld [vmem:[%s1425_s30 + $0x50] sm:$0xff]  }
  0x12   : > { %1295 = vmatprep.mubr.bf16.mxu1 %v1351_v7  ;;  %v1346_v14 = vld [vmem:[%s1425_s30 + $0x18] sm:$0xff]   ;;  %v1347_v16 = vld [vmem:[%s1425_s30 + $0x20] sm:$0xff]   ;;  %v1348_v18 = vld [vmem:[%s1425_s30 + $0x28] sm:$0xff]  }
  0x13   : > { %1270 = vmatpush3.bf16.msra.mxu0 %v1338_v3  ;;  %1322 = vmatpush3.bf16.msra.mxu1 %v1338_v3  ;;  %v1354_v15 = vld [vmem:[%s1425_s30 + $0x58] sm:$0xff]   ;;  %v1355_v17 = vld [vmem:[%s1425_s30 + $0x60] sm:$0xff]   ;;  %v1356_v19 = vld [vmem:[%s1425_s30 + $0x68] sm:$0xff]  }
  0x14   : > { %1271 = vmatprep.subr.bf16.mxu0 %v1339_v5  ;;  %1315 = vmatprep.subr.bf16.mxu1 %v1339_v5  ;;  %v1349_v20 = vld [vmem:[%s1425_s30 + $0x30] sm:$0xff]   ;;  %v1350_v22 = vld [vmem:[%s1425_s30 + $0x38] sm:$0xff]  }
  0x15   : > { %v1357_v21 = vld [vmem:[%s1425_s30 + $0x70] sm:$0xff]   ;;  %v1358_v23 = vld [vmem:[%s1425_s30 + $0x78] sm:$0xff]  }
  0x17   : > { %1272 = vmatpush3.bf16.msra.mxu0 %v1339_v5  ;;  %1323 = vmatpush3.bf16.msra.mxu1 %v1339_v5 }
  0x18   : > { %1273 = vmatprep.subr.bf16.mxu0 %v1340_v6  ;;  %1316 = vmatprep.subr.bf16.mxu1 %v1340_v6 }
  0x1b   : > { %1274 = vmatpush3.bf16.msra.mxu0 %v1340_v6  ;;  %1324 = vmatpush3.bf16.msra.mxu1 %v1340_v6 }
  0x1c   : > { %1275 = vmatprep.subr.bf16.mxu0 %v1341_v8  ;;  %1317 = vmatprep.subr.bf16.mxu1 %v1341_v8 }
  0x1f   : > { %1276 = vmatpush3.bf16.msra.mxu0 %v1341_v8  ;;  %1325 = vmatpush3.bf16.msra.mxu1 %v1341_v8 }
  0x20   : > { %1277 = vmatprep.subr.bf16.mxu0 %v1342_v9  ;;  %1318 = vmatprep.subr.bf16.mxu1 %v1342_v9 }
  0x23   : > { %1278 = vmatpush3.bf16.msra.mxu0 %v1342_v9  ;;  %1326 = vmatpush3.bf16.msra.mxu1 %v1342_v9 }
  0x26   : > { %1280 = vmatmul.mubr.bf16.vlgmr.msra.gmra.mrb[0].mxu0 %v1344_v10  ;;  %1296 = vmatmul.mubr.bf16.vlgmr.msra.gmra.mrb[0].mxu1 %v1352_v11 }
  0x27   : > { %1283 = vmatprep.mubr.bf16.mxu0 %v1345_v12  ;;  %1299 = vmatprep.mubr.bf16.mxu1 %v1353_v13 }
  0x2e   : > { %1284 = vmatmul.mubr.bf16.gmra.mrb[4].mxu0 %v1346_v14  ;;  %1300 = vmatmul.mubr.bf16.gmra.mrb[4].mxu1 %v1354_v15 }
  0x2f   : > { %1287 = vmatprep.mubr.bf16.mxu0 %v1347_v16  ;;  %1303 = vmatprep.mubr.bf16.mxu1 %v1355_v17 }
  0x36   : > { %1288 = vmatmul.mubr.bf16.gmra.mrb[8].mxu0 %v1348_v18  ;;  %1304 = vmatmul.mubr.bf16.gmra.mrb[8].mxu1 %v1356_v19 }
  0x37   : > { %1291 = vmatprep.mubr.bf16.mxu0 %v1349_v20  ;;  %1307 = vmatprep.mubr.bf16.mxu1 %v1357_v21 }
  0x3e   : > { %1292 = vmatmul.mubr.bf16.gmra.mrb[12].mxu0 %v1350_v22  ;;  %1308 = vmatmul.mubr.bf16.gmra.mrb[12].mxu1 %v1358_v23 }
  0xf9   : > { %v1281_v25 = vpop.f32.mrb[0].mxu0  ;;  %v1297_v26 = vpop.f32.mrb[0].mxu1 }
  0xfa   : > { %v488_v27 = vadd.f32 %v1281_v25, %v1461_v24  ;;  %v479_v28 = vpop.f32.mrb[1].mxu0  ;;  %v552_v29 = vadd.f32 %v1297_v26, %v1461_v24  ;;  %v543_v30 = vpop.f32.mrb[1].mxu1 }
  0xfb   : > { %v480_v31 = vadd.f32 %v1461_v24, %v479_v28  ;;  %v1282_v32 = vpop.f32.mrb[2].mxu0  ;;  %v544_v33 = vadd.f32 %v1461_v24, %v543_v30  ;;  %v1298_v34 = vpop.f32.mrb[2].mxu1 }
  0xfc   : > { %v608_v35 = vmax.f32 %v488_v27, 0.0  ;;  %v491_v36 = vadd.f32 %v1282_v32, %v1461_v24  ;;  %v482_v37 = vpop.f32.mrb[3].mxu0  ;;  %v624_v38 = vmax.f32 %v552_v29, 0.0  ;;  %v555_v39 = vadd.f32 %v1298_v34, %v1461_v24  ;;  %v546_v40 = vpop.f32.mrb[3].mxu1 }
  0xfd   : > { %v606_v41 = vmax.f32 %v480_v31, 0.0  ;;  %v483_v42 = vadd.f32 %v1461_v24, %v482_v37  ;;  %v622_v43 = vmax.f32 %v544_v33, 0.0  ;;  %v547_v44 = vadd.f32 %v1461_v24, %v546_v40 }
  0xfe   : > { %v609_v45 = vmax.f32 %v491_v36, 0.0  ;;  %v1471_v46 = vmin.f32 %v624_v38, 6.0  ;;  %v625_v47 = vmax.f32 %v555_v39, 0.0  ;;  %v640_v51 = vmin.f32 %v608_v35, 6.0 }
  0xff   : > { %v638_v48 = vmin.f32 %v606_v41, 6.0  ;;  %v607_v49 = vmax.f32 %v483_v42, 0.0  ;;  %v623_v50 = vmax.f32 %v547_v44, 0.0  ;;  %v1473_v53 = vmin.f32 %v622_v43, 6.0 }
 0x100   : > { %v641_v52 = vmin.f32 %v609_v45, 6.0  ;;  %v1475_v54 = vmin.f32 %v625_v47, 6.0  ;;  %v870_v7 = vmul.f32 %v640_v51, %v640_v51 }
 0x101   : > { %v639_v55 = vmin.f32 %v607_v49, 6.0  ;;  %v1285_v56 = vpop.f32.mrb[4].mxu0  ;;  %v1484_v57 = vmin.f32 %v623_v50, 6.0  ;;  %v1301_v58 = vpop.f32.mrb[4].mxu1  ;;  %v868_v59 = vmul.f32 %v638_v48, %v638_v48 }
 0x102   : > { %v1152_v60 = vpack.c.bf16 %v641_v52, %v640_v51  ;;  %v504_v61 = vadd.f32 %v1285_v56, %v1461_v24  ;;  %v495_v62 = vpop.f32.mrb[5].mxu0  ;;  %v1192_v63 = vpack.c.bf16 %v1475_v54, %v1471_v46  ;;  %v559_v0 = vpop.f32.mrb[5].mxu1  ;;  %v871_v17 = vmul.f32 %v641_v52, %v641_v52 }
 0x103   : > { %v1147_v1 = vpack.c.bf16 %v639_v55, %v638_v48  ;;  %v830_v2 = vadd.f32 %v639_v55, %v638_v48  ;;  %v869_v3 = vmul.f32 %v639_v55, %v639_v55  ;;  %v496_v4 = vadd.f32 %v1461_v24, %v495_v62  ;;  %v1286_v5 = vpop.f32.mrb[6].mxu0  ;;  %v1302_v6 = vpop.f32.mrb[6].mxu1 }
 0x104   : > { %1224 = vst [vmem:[%s1482_s23 + $0x8] sm:$0xff] %v1152_v60   ;;  %v612_v8 = vmax.f32 %v504_v61, 0.0  ;;  %v507_v9 = vadd.f32 %v1286_v5, %v1461_v24  ;;  %v498_v10 = vpop.f32.mrb[7].mxu0  ;;  %1232 = vst [vmem:[%s1482_s23 + $0x48] sm:$0xff] %v1192_v63   ;;  %v1187_v11 = vpack.c.bf16 %v1484_v57, %v1473_v53  ;;  %v562_v12 = vpop.f32.mrb[7].mxu1  ;;  %v568_v26 = vadd.f32 %v1301_v58, %v1461_v24 }
 0x105   : > { %1148 = vst [vmem:[%s1482_s23] sm:$0xff] %v1147_v1   ;;  %v831_v13 = vadd.f32 %v830_v2, %v640_v51  ;;  %v900_v14 = vadd.f32 %v869_v3, %v868_v59  ;;  %v610_v15 = vmax.f32 %v496_v4, 0.0  ;;  %v499_v16 = vadd.f32 %v1461_v24, %v498_v10 }
 0x106   : > { %v644_v18 = vmin.f32 %v612_v8, 6.0  ;;  %v613_v19 = vmax.f32 %v507_v9, 0.0  ;;  %1231 = vst [vmem:[%s1482_s23 + $0x40] sm:$0xff] %v1187_v11   ;;  %v560_v27 = vadd.f32 %v1461_v24, %v559_v0  ;;  %v628_v50 = vmax.f32 %v568_v26, 0.0 }
 0x107   : > { %v901_v20 = vadd.f32 %v900_v14, %v870_v7  ;;  %v642_v21 = vmin.f32 %v610_v15, 6.0  ;;  %v832_v22 = vadd.f32 %v831_v13, %v641_v52  ;;  %v611_v23 = vmax.f32 %v499_v16, 0.0 }
 0x108   : > { %v645_v25 = vmin.f32 %v613_v19, 6.0  ;;  %v874_v34 = vmul.f32 %v644_v18, %v644_v18  ;;  %v626_v58 = vmax.f32 %v560_v27, 0.0  ;;  %v571_v62 = vadd.f32 %v1302_v6, %v1461_v24 }
 0x109   : > { %v833_v28 = vadd.f32 %v832_v22, %v642_v21  ;;  %v872_v29 = vmul.f32 %v642_v21, %v642_v21  ;;  %v902_v30 = vadd.f32 %v901_v20, %v871_v17  ;;  %v643_v31 = vmin.f32 %v611_v23, 6.0  ;;  %v1289_v32 = vpop.f32.mrb[8].mxu0  ;;  %v1500_v33 = vpop.f32.mrb[8].mxu1 }
 0x10a   : > { %v1162_v35 = vpack.c.bf16 %v645_v25, %v644_v18  ;;  %v520_v36 = vadd.f32 %v1289_v32, %v1461_v24  ;;  %v511_v37 = vpop.f32.mrb[9].mxu0  ;;  %v1503_v38 = vpop.f32.mrb[9].mxu1  ;;  %v875_v63 = vmul.f32 %v645_v25, %v645_v25  ;;  %v1515_v5 = vmin.f32 %v628_v50, 6.0 }
 0x10b   : > { %v903_v39 = vadd.f32 %v902_v30, %v872_v29  ;;  %v1157_v40 = vpack.c.bf16 %v643_v31, %v642_v21  ;;  %v834_v41 = vadd.f32 %v833_v28, %v643_v31  ;;  %v873_v42 = vmul.f32 %v643_v31, %v643_v31  ;;  %v1290_v43 = vpop.f32.mrb[10].mxu0  ;;  %v1505_v44 = vpop.f32.mrb[10].mxu1 }
 0x10c   : > { %1226 = vst [vmem:[%s1482_s23 + $0x18] sm:$0xff] %v1162_v35   ;;  %v616_v45 = vmax.f32 %v520_v36, 0.0  ;;  %v512_v47 = vadd.f32 %v1461_v24, %v511_v37  ;;  %v523_v48 = vadd.f32 %v1290_v43, %v1461_v24  ;;  %v514_v49 = vpop.f32.mrb[11].mxu0  ;;  %v1510_v51 = vpop.f32.mrb[11].mxu1  ;;  %v629_v7 = vmax.f32 %v571_v62, 0.0 }
 0x10d   : > { %1225 = vst [vmem:[%s1482_s23 + $0x10] sm:$0xff] %v1157_v40   ;;  %v835_v52 = vadd.f32 %v834_v41, %v644_v18  ;;  %v904_v55 = vadd.f32 %v903_v39, %v873_v42  ;;  %v515_v56 = vadd.f32 %v1461_v24, %v514_v49  ;;  %v1517_v11 = vmin.f32 %v626_v58, 6.0 }
 0x10e   : > { %v648_v59 = vmin.f32 %v616_v45, 6.0  ;;  %v614_v60 = vmax.f32 %v512_v47, 0.0  ;;  %v617_v61 = vmax.f32 %v523_v48, 0.0  ;;  %v563_v13 = vadd.f32 %v1461_v24, %v562_v12 }
 0x10f   : > { %v905_v0 = vadd.f32 %v904_v55, %v874_v34  ;;  %v836_v1 = vadd.f32 %v835_v52, %v645_v25  ;;  %v615_v2 = vmax.f32 %v515_v56, 0.0  ;;  %v1526_v30 = vmin.f32 %v629_v7, 6.0 }
 0x110   : > { %v646_v3 = vmin.f32 %v614_v60, 6.0  ;;  %v649_v4 = vmin.f32 %v617_v61, 6.0  ;;  %v878_v15 = vmul.f32 %v648_v59, %v648_v59  ;;  %v627_v36 = vmax.f32 %v563_v13, 0.0 }
 0x111   : > { %v906_v8 = vadd.f32 %v905_v0, %v875_v63  ;;  %v647_v9 = vmin.f32 %v615_v2, 6.0  ;;  %v1293_v10 = vpop.f32.mrb[12].mxu0  ;;  %v1309_v14 = vpop.f32.mrb[12].mxu1  ;;  %v1202_v41 = vpack.c.bf16 %v1526_v30, %v1515_v5  ;;  %v584_v58 = vadd.f32 %v1500_v33, %v1461_v24 }
 0x112   : > { %v837_v6 = vadd.f32 %v836_v1, %v646_v3  ;;  %v876_v16 = vmul.f32 %v646_v3, %v646_v3  ;;  %v1172_v17 = vpack.c.bf16 %v649_v4, %v648_v59  ;;  %v527_v18 = vpop.f32.mrb[13].mxu0  ;;  %v591_v19 = vpop.f32.mrb[13].mxu1  ;;  %v536_v22 = vadd.f32 %v1293_v10, %v1461_v24 }
 0x113   : > { %v1167_v20 = vpack.c.bf16 %v647_v9, %v646_v3  ;;  %v877_v21 = vmul.f32 %v647_v9, %v647_v9  ;;  %v528_v23 = vadd.f32 %v1461_v24, %v527_v18  ;;  %v1294_v25 = vpop.f32.mrb[14].mxu0  ;;  %v1522_v26 = vpop.f32.mrb[14].mxu1  ;;  %v879_v42 = vmul.f32 %v649_v4, %v649_v4  ;;  %1234 = vst [vmem:[%s1482_s23 + $0x58] sm:$0xff] %v1202_v41  }
 0x114   : > { %v907_v27 = vadd.f32 %v906_v8, %v876_v16  ;;  %1228 = vst [vmem:[%s1482_s23 + $0x28] sm:$0xff] %v1172_v17   ;;  %v838_v12 = vadd.f32 %v837_v6, %v647_v9  ;;  %v539_v28 = vadd.f32 %v1294_v25, %v1461_v24  ;;  %v530_v29 = vpop.f32.mrb[15].mxu0  ;;  %v1528_v31 = vpop.f32.mrb[15].mxu1  ;;  %v620_v32 = vmax.f32 %v536_v22, 0.0 }
 0x115   : > { %1227 = vst [vmem:[%s1482_s23 + $0x20] sm:$0xff] %v1167_v20   ;;  %v618_v34 = vmax.f32 %v528_v23, 0.0  ;;  %v531_v35 = vadd.f32 %v1461_v24, %v530_v29  ;;  %v1535_v52 = vmin.f32 %v627_v36, 6.0  ;;  %v632_v3 = vmax.f32 %v584_v58, 0.0 }
 0x116   : > { %v839_v37 = vadd.f32 %v838_v12, %v648_v59  ;;  %v908_v39 = vadd.f32 %v907_v27, %v877_v21  ;;  %v621_v40 = vmax.f32 %v539_v28, 0.0  ;;  %v652_v43 = vmin.f32 %v620_v32, 6.0 }
 0x117   : > { %v650_v45 = vmin.f32 %v618_v34, 6.0  ;;  %v619_v47 = vmax.f32 %v531_v35, 0.0  ;;  %v1197_v0 = vpack.c.bf16 %v1535_v52, %v1517_v11  ;;  %v884_v7 = vmul.f32 %v1473_v53, %v1473_v53 }
 0x118   : > { %v909_v48 = vadd.f32 %v908_v39, %v878_v15  ;;  %v840_v49 = vadd.f32 %v839_v37, %v649_v4  ;;  %v653_v50 = vmin.f32 %v621_v40, 6.0  ;;  %v576_v4 = vadd.f32 %v1461_v24, %v1503_v38 }
 0x119   : > { %v880_v55 = vmul.f32 %v650_v45, %v650_v45  ;;  %v651_v56 = vmin.f32 %v619_v47, 6.0  ;;  %1233 = vst [vmem:[%s1482_s23 + $0x50] sm:$0xff] %v1197_v0   ;;  %v587_v33 = vadd.f32 %v1505_v44, %v1461_v24  ;;  %v579_v8 = vadd.f32 %v1461_v24, %v1510_v51 }
 0x11a   : > { %v841_v59 = vadd.f32 %v840_v49, %v650_v45  ;;  %v910_v60 = vadd.f32 %v909_v48, %v879_v42  ;;  %v1182_v61 = vpack.c.bf16 %v653_v50, %v652_v43  ;;  %v600_v9 = vadd.f32 %v1309_v14, %v1461_v24 }
 0x11b   : > { %v1177_v62 = vpack.c.bf16 %v651_v56, %v650_v45  ;;  %v881_v63 = vmul.f32 %v651_v56, %v651_v56  ;;  %v882_v10 = vmul.f32 %v652_v43, %v652_v43  ;;  %v630_v6 = vmax.f32 %v576_v4, 0.0 }
 0x11c   : > { %v911_v1 = vadd.f32 %v910_v60, %v880_v55  ;;  %1230 = vst [vmem:[%s1482_s23 + $0x38] sm:$0xff] %v1182_v61   ;;  %v842_v2 = vadd.f32 %v841_v59, %v651_v56  ;;  %v664_v16 = vmin.f32 %v632_v3, 6.0  ;;  %v633_v17 = vmax.f32 %v587_v33, 0.0 }
 0x11d   : > { %1229 = vst [vmem:[%s1482_s23 + $0x30] sm:$0xff] %v1177_v62   ;;  %v631_v38 = vmax.f32 %v579_v8, 0.0  ;;  %v592_v18 = vadd.f32 %v1461_v24, %v591_v19  ;;  %v883_v20 = vmul.f32 %v653_v50, %v653_v50  ;;  %v662_v44 = vmin.f32 %v630_v6, 6.0 }
 0x11e   : > { %v843_v13 = vadd.f32 %v842_v2, %v652_v43  ;;  %v912_v15 = vadd.f32 %v911_v1, %v881_v63  ;;  %v665_v23 = vmin.f32 %v633_v17, 6.0  ;;  %v636_v51 = vmax.f32 %v600_v9, 0.0 }
 0x11f   : > { %v663_v25 = vmin.f32 %v631_v38, 6.0  ;;  %v603_v12 = vadd.f32 %v1522_v26, %v1461_v24  ;;  %v634_v32 = vmax.f32 %v592_v18, 0.0  ;;  %v885_v35 = vmul.f32 %v1484_v57, %v1484_v57 }
 0x120   : > { %v913_v21 = vadd.f32 %v912_v15, %v882_v10  ;;  %v844_v22 = vadd.f32 %v843_v13, %v653_v50  ;;  %v1212_v28 = vpack.c.bf16 %v665_v23, %v664_v16  ;;  %v668_v36 = vmin.f32 %v636_v51, 6.0 }
 0x121   : > { %v1207_v29 = vpack.c.bf16 %v663_v25, %v662_v44  ;;  %v637_v37 = vmax.f32 %v603_v12, 0.0  ;;  %v886_v26 = vmul.f32 %v1471_v46, %v1471_v46  ;;  %v666_v41 = vmin.f32 %v634_v32, 6.0 }
 0x122   : > { %v845_v14 = vadd.f32 %v844_v22, %v1473_v53  ;;  %v914_v27 = vadd.f32 %v913_v21, %v883_v20  ;;  %1236 = vst [vmem:[%s1482_s23 + $0x68] sm:$0xff] %v1212_v28   ;;  %v595_v53 = vadd.f32 %v1461_v24, %v1528_v31  ;;  %v888_v48 = vmul.f32 %v1517_v11, %v1517_v11 }
 0x123   : > { %1235 = vst [vmem:[%s1482_s23 + $0x60] sm:$0xff] %v1207_v29   ;;  %v669_v42 = vmin.f32 %v637_v37, 6.0  ;;  %v889_v58 = vmul.f32 %v1535_v52, %v1535_v52  ;;  %v891_v61 = vmul.f32 %v1526_v30, %v1526_v30  ;;  %v892_v63 = vmul.f32 %v662_v44, %v662_v44 }
 0x124   : > { %v915_v34 = vadd.f32 %v914_v27, %v884_v7  ;;  %v846_v19 = vadd.f32 %v845_v14, %v1484_v57  ;;  %v635_v43 = vmax.f32 %v595_v53, 0.0  ;;  %v887_v57 = vmul.f32 %v1475_v54, %v1475_v54 }
 0x125   : > { %v1222_v24 = vpack.c.bf16 %v669_v42, %v668_v36  ;;  %v893_v4 = vmul.f32 %v663_v25, %v663_v25  ;;  %v895_v8 = vmul.f32 %v665_v23, %v665_v23  ;;  %v896_v10 = vmul.f32 %v666_v41, %v666_v41 }
 0x126   : > { %v847_v39 = vadd.f32 %v846_v19, %v1471_v46  ;;  %v916_v40 = vadd.f32 %v915_v34, %v885_v35  ;;  %v667_v31 = vmin.f32 %v635_v43, 6.0  ;;  %v898_v38 = vmul.f32 %v668_v36, %v668_v36 }
 0x127   : > { %1238 = vst [vmem:[%s1482_s23 + $0x78] sm:$0xff] %v1222_v24   ;;  %v899_v21 = vmul.f32 %v669_v42, %v669_v42 }
 0x128   : > { %v917_v45 = vadd.f32 %v916_v40, %v886_v26  ;;  %v848_v47 = vadd.f32 %v847_v39, %v1475_v54  ;;  %v1217_v46 = vpack.c.bf16 %v667_v31, %v666_v41  ;;  %v890_v54 = vmul.f32 %v1515_v5, %v1515_v5 }
 0x12a   : > { %v849_v49 = vadd.f32 %v848_v47, %v1517_v11  ;;  %v918_v50 = vadd.f32 %v917_v45, %v887_v57  ;;  %1237 = vst [vmem:[%s1482_s23 + $0x70] sm:$0xff] %v1217_v46  }
 0x12c   : > { %v919_v55 = vadd.f32 %v918_v50, %v888_v48  ;;  %v850_v56 = vadd.f32 %v849_v49, %v1535_v52  ;;  %v894_v52 = vmul.f32 %v664_v16, %v664_v16 }
 0x12e   : > { %v851_v59 = vadd.f32 %v850_v56, %v1515_v5  ;;  %v920_v60 = vadd.f32 %v919_v55, %v889_v58 }
 0x130   : > { %v921_v11 = vadd.f32 %v920_v60, %v890_v54  ;;  %v852_v62 = vadd.f32 %v851_v59, %v1526_v30  ;;  %v897_v30 = vmul.f32 %v667_v31, %v667_v31 }
 0x132   : > { %v853_v0 = vadd.f32 %v852_v62, %v662_v44  ;;  %v922_v1 = vadd.f32 %v921_v11, %v891_v61 }
 0x134   : > { %v923_v2 = vadd.f32 %v922_v1, %v892_v63  ;;  %v854_v3 = vadd.f32 %v853_v0, %v663_v25 }
 0x136   : > { %v855_v7 = vadd.f32 %v854_v3, %v664_v16  ;;  %v924_v33 = vadd.f32 %v923_v2, %v893_v4 }
 0x138   : > { %v925_v9 = vadd.f32 %v924_v33, %v894_v52  ;;  %v856_v5 = vadd.f32 %v855_v7, %v665_v23 }
 0x13a   : > { %v857_v13 = vadd.f32 %v856_v5, %v666_v41  ;;  %v926_v15 = vadd.f32 %v925_v9, %v895_v8 }
 0x13c   : > { %v927_v6 = vadd.f32 %v926_v15, %v896_v10  ;;  %v858_v17 = vadd.f32 %v857_v13, %v667_v31 }
 0x13e   : > { %v859_v18 = vadd.f32 %v858_v17, %v668_v36  ;;  %v928_v20 = vadd.f32 %v927_v6, %v897_v30 }
 0x140   : > { %v860_v22 = vadd.f32 %v859_v18, %v669_v42  ;;  %v929_v44 = vadd.f32 %v928_v20, %v898_v38 }
 0x142   : > { %v861_v25 = vrot.slane %v860_v22, 4  ;;  %v930_v16 = vadd.f32 %v929_v44, %v899_v21 }
 0x144   : > { %v862_v51 = vadd.f32 %v861_v25, %v860_v22  ;;  %v931_v14 = vrot.slane %v930_v16, 4 }
 0x146   : > { %v863_v27 = vrot.slane %v862_v51, 2  ;;  %v932_v23 = vadd.f32 %v931_v14, %v930_v16 }
 0x148   : > { %v864_v12 = vadd.f32 %v863_v27, %v862_v51  ;;  %v933_v28 = vrot.slane %v932_v23, 2 }
 0x14a   : > { %v865_v29 = vrot.slane %v864_v12, 1  ;;  %v934_v32 = vadd.f32 %v933_v28, %v932_v23 }
 0x14c   : > { %v866_v34 = vadd.f32 %v865_v29, %v864_v12  ;;  %v935_v19 = vrot.slane %v934_v32, 1 }
 0x14e   : > { %867 = vst [vmem:[%s241_s25] sm:$0x1] %v866_v34  ;;  %v936_v35 = vadd.f32 %v935_v19, %v934_v32 }
 0x150   : > { %937 = vst [vmem:[%s244_s28] sm:$0x1] %v936_v35 }
 0x151 PF: > { %s16_s18 = sadd.s32 1, %s1365_s18  }
 0x152   : > { %p13_p5 = scmp.ge.s32.totalorder %s16_s18, 4  }
 0x154   :  { %15 = sbr.rel (!%p13_p5) target bundleno = 1 (0x1), region = 86 }

// kernel: inverted_residual_block.6
= control target key start
LH: loop header
LB: loop body
LE: loop exit
PB: predicated region body
PF: predicated region fallthrough
CT: control target
= control target key end

     0   :  { %s1540_s24 = smov 0   ;;  %s1821_s0 = inlined_call_operand.vmem [shape: bf16[512,128], index: 0, kind: input, shape index: {}]   ;;  %s1822_s1 = inlined_call_operand.vmem [shape: f32[1,128], index: 1, kind: input, shape index: {}]   ;;  %s1823_s2 = inlined_call_operand.vmem [shape: f32[1,128], index: 2, kind: input, shape index: {}]   ;;  %s1824_s3 = inlined_call_operand.vmem [shape: bf16[128,128], index: 3, kind: input, shape index: {}]   ;;  %s1825_s4 = inlined_call_operand.vmem [shape: f32[1,128], index: 4, kind: input, shape index: {}]   ;;  %s1826_s5 = inlined_call_operand.vmem [shape: bf16[512,128], index: 5, kind: output, shape index: {0}]   ;;  %s1827_s6 = inlined_call_operand.vmem [shape: f32[2,1,128], index: 6, kind: output, shape index: {1}]   ;;  %s1828_s7 = inlined_call_operand.vmem [shape: f32[2,1,128], index: 7, kind: output, shape index: {2}]  }
   0x1 LB: > { %s1546_s25 = sadd.s32 4294967295, %s1498_s24   ;;  %p1132_p0 = scmp.ge.s32.totalorder %s1498_s24, 1  ;;  %s1498_s24 = sphi %s1540_s24, %s18_s24  }
   0x2   : > { %p243_p1 = scmp.lt.s32.totalorder %s1498_s24, 3 }
   0x4   : > { %p244_p2 = pnand %p1132_p0, %p243_p1 }
   0x5   : > { %v1484_v0 = vld [vmem:[%s1824_s3] sm:$0xff] (!%p244_p2)   ;;  %s1133_s28 = sshll.u32 (!%p244_p2), %s1546_s25, 5  ;;  %v1485_v1 = vld [vmem:[%s1824_s3 + $0x8] sm:$0xff] (!%p244_p2)   ;;  %v1486_v2 = vld [vmem:[%s1824_s3 + $0x10] sm:$0xff] (!%p244_p2)   ;;  %p293_p4 = scmp.lt.s32.totalorder (!%p244_p2), %s1546_s25, 1 }
   0x6   : > { %247 = sbr.rel (%p244_p2) target bundleno = 337 (0x151), region = 40  ;;  %p282_p3 = scmp.lt.s32.totalorder (!%p244_p2), %s1133_s28, 63  ;;  %1412 = vmatprep.subr.bf16.mxu0 (!%p244_p2), %v1484_v0  ;;  %1460 = vmatprep.subr.bf16.mxu1 (!%p244_p2), %v1484_v0  ;;  %v1487_v3 = vld [vmem:[%s1824_s3 + $0x18] sm:$0xff] (!%p244_p2)   ;;  %v1577_v5 = vld [vmem:[%s1822_s1] ss:$0 sm:$0xff] (!%p244_p2)  ;;  %v1489_v22 = vld [vmem:[%s1824_s3 + $0x28] sm:$0xff] (!%p244_p2)  }
   0x7   : > { %1413 = vmatpush3.bf16.msra.mxu0 (!%p244_p2), %v1484_v0  ;;  %1468 = vmatpush3.bf16.msra.mxu1 (!%p244_p2), %v1484_v0  ;;  %v1582_v8 = vld [vmem:[%s1823_s2] ss:$0 sm:$0xff] (!%p244_p2)  ;;  %v1490_v30 = vld [vmem:[%s1824_s3 + $0x30] sm:$0xff] (!%p244_p2)   ;;  %v1491_v45 = vld [vmem:[%s1824_s3 + $0x38] sm:$0xff] (!%p244_p2)  }
   0x8   : > { %1414 = vmatprep.subr.bf16.mxu0 (!%p244_p2), %v1485_v1  ;;  %1461 = vmatprep.subr.bf16.mxu1 (!%p244_p2), %v1485_v1  ;;  %v1488_v12 = vld [vmem:[%s1824_s3 + $0x20] sm:$0xff] (!%p244_p2)  }
   0xb   : > { %1415 = vmatpush3.bf16.msra.mxu0 (!%p244_p2), %v1485_v1  ;;  %1469 = vmatpush3.bf16.msra.mxu1 (!%p244_p2), %v1485_v1 }
   0xc   : > { %1416 = vmatprep.subr.bf16.mxu0 (!%p244_p2), %v1486_v2  ;;  %1462 = vmatprep.subr.bf16.mxu1 (!%p244_p2), %v1486_v2 }
   0xd   : > { %s1830_s28 = smov (!%p282_p3, %s1133_s28), 63  ;;  %s1832_s25 = smov (!%p293_p4, %s1546_s25), 1 }
   0xe   : > { %s1134_s10 = sshll.u32 %s1830_s28, 2  ;;  %s295_s14 = scalar_lea.vmem %s1827_s6, %s1832_s25 }
   0xf   : > { %s1568_s13 = scalar_lea.vmem %s1821_s0, %s1134_s10  ;;  %1417 = vmatpush3.bf16.msra.mxu0 %v1486_v2  ;;  %1470 = vmatpush3.bf16.msra.mxu1 %v1486_v2  ;;  %s298_s17 = scalar_lea.vmem %s1828_s7, %s1832_s25 }
  0x10   : > { %v1215_v4 = vld [vmem:[%s1568_s13] sm:$0xff]   ;;  %v1358_v11 = vld [vmem:[%s1568_s13 + $0x8] sm:$0xff]   ;;  %1418 = vmatprep.subr.bf16.mxu0 %v1487_v3  ;;  %v1359_v13 = vld [vmem:[%s1568_s13 + $0x10] sm:$0xff]   ;;  %1463 = vmatprep.subr.bf16.mxu1 %v1487_v3 }
  0x11   : > { %v1216_v6 = vunpack.c.l.bf16 %v1215_v4  ;;  %v1217_v7 = vunpack.c.h.bf16 %v1215_v4  ;;  %v1220_v16 = vunpack.c.l.bf16 %v1358_v11  ;;  %v1360_v17 = vld [vmem:[%s1568_s13 + $0x18] sm:$0xff]   ;;  %v1221_v19 = vunpack.c.h.bf16 %v1358_v11  ;;  %v1365_v24 = vld [vmem:[%s1568_s13 + $0x40] sm:$0xff]   ;;  %v1366_v32 = vld [vmem:[%s1568_s13 + $0x48] sm:$0xff]  }
  0x12   : > { %v1224_v20 = vunpack.c.l.bf16 %v1359_v13  ;;  %v1225_v21 = vunpack.c.h.bf16 %v1359_v13  ;;  %v1228_v23 = vunpack.c.l.bf16 %v1360_v17  ;;  %v1229_v26 = vunpack.c.h.bf16 %v1360_v17  ;;  %v1361_v34 = vld [vmem:[%s1568_s13 + $0x20] sm:$0xff]   ;;  %v1367_v39 = vld [vmem:[%s1568_s13 + $0x50] sm:$0xff]   ;;  %v1368_v44 = vld [vmem:[%s1568_s13 + $0x58] sm:$0xff]  }
  0x13   : > { %v371_v9 = vmul.f32 %v1216_v6, %v1577_v5  ;;  %v372_v10 = vmul.f32 %v1217_v7, %v1577_v5  ;;  %1419 = vmatpush3.bf16.msra.mxu0 %v1487_v3  ;;  %1471 = vmatpush3.bf16.msra.mxu1 %v1487_v3  ;;  %v373_v25 = vmul.f32 %v1220_v16, %v1577_v5  ;;  %v1248_v31 = vunpack.c.l.bf16 %v1365_v24  ;;  %v1369_v50 = vld [vmem:[%s1568_s13 + $0x60] sm:$0xff]   ;;  %v1362_v6 = vld [vmem:[%s1568_s13 + $0x28] sm:$0xff]   ;;  %v1363_v11 = vld [vmem:[%s1568_s13 + $0x30] sm:$0xff]  }
  0x14   : > { %1420 = vmatprep.subr.bf16.mxu0 %v1488_v12  ;;  %1464 = vmatprep.subr.bf16.mxu1 %v1488_v12  ;;  %v374_v27 = vmul.f32 %v1221_v19, %v1577_v5  ;;  %v375_v28 = vmul.f32 %v1224_v20, %v1577_v5  ;;  %v376_v29 = vmul.f32 %v1225_v21, %v1577_v5  ;;  %v1249_v37 = vunpack.c.h.bf16 %v1365_v24 }
  0x15   : > { %v410_v14 = vadd.f32 %v1582_v8, %v371_v9  ;;  %v411_v15 = vadd.f32 %v1582_v8, %v372_v10  ;;  %v377_v33 = vmul.f32 %v1228_v23, %v1577_v5  ;;  %v1609_v35 = vadd.f32 %v1582_v8, %v373_v25  ;;  %v1371_v23 = vld [vmem:[%s1568_s13 + $0x70] sm:$0xff]  }
  0x16   : > { %v378_v36 = vmul.f32 %v1229_v26, %v1577_v5  ;;  %v387_v38 = vmul.f32 %v1248_v31, %v1577_v5  ;;  %v413_v40 = vadd.f32 %v1582_v8, %v374_v27  ;;  %v1616_v41 = vadd.f32 %v1582_v8, %v375_v28 }
  0x17   : > { %v442_v18 = vpack.c.bf16 %v411_v15, %v410_v14  ;;  %1421 = vmatpush3.bf16.msra.mxu0 %v1488_v12  ;;  %1472 = vmatpush3.bf16.msra.mxu1 %v1488_v12  ;;  %v1619_v42 = vadd.f32 %v1582_v8, %v376_v29  ;;  %v1252_v43 = vunpack.c.l.bf16 %v1366_v32  ;;  %v1232_v46 = vunpack.c.l.bf16 %v1361_v34 }
  0x18   : > { %1422 = vmatprep.subr.bf16.mxu0 %v1489_v22  ;;  %1465 = vmatprep.subr.bf16.mxu1 %v1489_v22  ;;  %v388_v47 = vmul.f32 %v1249_v37, %v1577_v5  ;;  %v426_v48 = vadd.f32 %v1582_v8, %v387_v38  ;;  %v1253_v49 = vunpack.c.h.bf16 %v1366_v32  ;;  %v1233_v51 = vunpack.c.h.bf16 %v1361_v34 }
  0x19   : > { %1428 = vmatprep.mubr.bf16.mxu0 %v442_v18  ;;  %v389_v52 = vmul.f32 %v1252_v43, %v1577_v5  ;;  %v1256_v53 = vunpack.c.l.bf16 %v1367_v39  ;;  %v1257_v54 = vunpack.c.h.bf16 %v1367_v39  ;;  %v1260_v57 = vunpack.c.l.bf16 %v1368_v44  ;;  %v1370_v18 = vld [vmem:[%s1568_s13 + $0x68] sm:$0xff]  }
  0x1a   : > { %v427_v55 = vadd.f32 %v1582_v8, %v388_v47  ;;  %v390_v56 = vmul.f32 %v1253_v49, %v1577_v5  ;;  %v1261_v58 = vunpack.c.h.bf16 %v1368_v44  ;;  %v1264_v62 = vunpack.c.l.bf16 %v1369_v50  ;;  %v1372_v49 = vld [vmem:[%s1568_s13 + $0x78] sm:$0xff]  }
  0x1b   : > { %1423 = vmatpush3.bf16.msra.mxu0 %v1489_v22  ;;  %1473 = vmatpush3.bf16.msra.mxu1 %v1489_v22  ;;  %v428_v59 = vadd.f32 %v1582_v8, %v389_v52  ;;  %v391_v60 = vmul.f32 %v1256_v53, %v1577_v5  ;;  %v392_v61 = vmul.f32 %v1257_v54, %v1577_v5  ;;  %v1265_v2 = vunpack.c.h.bf16 %v1369_v50 }
  0x1c   : > { %1424 = vmatprep.subr.bf16.mxu0 %v1490_v30  ;;  %1466 = vmatprep.subr.bf16.mxu1 %v1490_v30  ;;  %v443_v63 = vpack.c.bf16 %v413_v40, %v1609_v35  ;;  %v450_v0 = vpack.c.bf16 %v427_v55, %v426_v48  ;;  %v429_v1 = vadd.f32 %v1582_v8, %v390_v56  ;;  %v1236_v21 = vunpack.c.l.bf16 %v1362_v6  ;;  %v1364_v40 = vld [vmem:[%s1568_s13 + $0x38] sm:$0xff]   ;;  %s1708_s13 = scalar_lea.vmem %s1826_s5, %s1134_s10 }
  0x1d   : > { %v379_v3 = vmul.f32 %v1232_v46, %v1577_v5  ;;  %v380_v4 = vmul.f32 %v1233_v51, %v1577_v5  ;;  %v430_v7 = vadd.f32 %v1582_v8, %v391_v60  ;;  %v431_v9 = vadd.f32 %v1582_v8, %v392_v61 }
  0x1e   : > { %v444_v10 = vpack.c.bf16 %v1619_v42, %v1616_v41  ;;  %1444 = vmatprep.mubr.bf16.mxu1 %v450_v0  ;;  %v451_v12 = vpack.c.bf16 %v429_v1, %v428_v59  ;;  %v393_v13 = vmul.f32 %v1260_v57, %v1577_v5  ;;  %v394_v14 = vmul.f32 %v1261_v58, %v1577_v5 }
  0x1f   : > { %1425 = vmatpush3.bf16.msra.mxu0 %v1490_v30  ;;  %1474 = vmatpush3.bf16.msra.mxu1 %v1490_v30  ;;  %v452_v15 = vpack.c.bf16 %v431_v9, %v430_v7  ;;  %v395_v16 = vmul.f32 %v1264_v62, %v1577_v5  ;;  %v396_v17 = vmul.f32 %v1265_v2, %v1577_v5  ;;  %v1237_v22 = vunpack.c.h.bf16 %v1362_v6 }
  0x20   : > { %1426 = vmatprep.subr.bf16.mxu0 %v1491_v45  ;;  %1467 = vmatprep.subr.bf16.mxu1 %v1491_v45  ;;  %v416_v19 = vadd.f32 %v1582_v8, %v377_v33  ;;  %v417_v20 = vadd.f32 %v1582_v8, %v378_v36  ;;  %v418_v24 = vadd.f32 %v1582_v8, %v379_v3  ;;  %v1240_v26 = vunpack.c.l.bf16 %v1363_v11 }
  0x21   : > { %v419_v25 = vadd.f32 %v1582_v8, %v380_v4  ;;  %v1241_v27 = vunpack.c.h.bf16 %v1363_v11  ;;  %v432_v28 = vadd.f32 %v1582_v8, %v393_v13  ;;  %v433_v29 = vadd.f32 %v1582_v8, %v394_v14 }
  0x22   : > { %v1268_v30 = vunpack.c.l.bf16 %v1370_v18  ;;  %v1269_v31 = vunpack.c.h.bf16 %v1370_v18  ;;  %v434_v32 = vadd.f32 %v1582_v8, %v395_v16  ;;  %v435_v33 = vadd.f32 %v1582_v8, %v396_v17 }
  0x23   : > { %1427 = vmatpush3.bf16.msra.mxu0 %v1491_v45  ;;  %1475 = vmatpush3.bf16.msra.mxu1 %v1491_v45  ;;  %v1272_v34 = vunpack.c.l.bf16 %v1371_v23  ;;  %v1273_v35 = vunpack.c.h.bf16 %v1371_v23  ;;  %v445_v36 = vpack.c.bf16 %v417_v20, %v416_v19  ;;  %v381_v37 = vmul.f32 %v1236_v21, %v1577_v5 }
  0x24   : > { %v382_v38 = vmul.f32 %v1237_v22, %v1577_v5  ;;  %v383_v39 = vmul.f32 %v1240_v26, %v1577_v5  ;;  %v384_v41 = vmul.f32 %v1241_v27, %v1577_v5  ;;  %v453_v42 = vpack.c.bf16 %v433_v29, %v432_v28 }
  0x25   : > { %v397_v43 = vmul.f32 %v1268_v30, %v1577_v5  ;;  %v398_v44 = vmul.f32 %v1269_v31, %v1577_v5  ;;  %v446_v45 = vpack.c.bf16 %v419_v25, %v418_v24  ;;  %v454_v46 = vpack.c.bf16 %v435_v33, %v434_v32 }
  0x26   : > { %1429 = vmatmul.mubr.bf16.vlgmr.msra.gmra.mrb[0].mxu0 %v443_v63  ;;  %1445 = vmatmul.mubr.bf16.vlgmr.msra.gmra.mrb[0].mxu1 %v451_v12  ;;  %v399_v47 = vmul.f32 %v1272_v34, %v1577_v5  ;;  %v400_v48 = vmul.f32 %v1273_v35, %v1577_v5  ;;  %v1244_v50 = vunpack.c.l.bf16 %v1364_v40  ;;  %v420_v51 = vadd.f32 %v1582_v8, %v381_v37 }
  0x27   : > { %1432 = vmatprep.mubr.bf16.mxu0 %v444_v10  ;;  %1448 = vmatprep.mubr.bf16.mxu1 %v452_v15  ;;  %v421_v52 = vadd.f32 %v1582_v8, %v382_v38  ;;  %v422_v53 = vadd.f32 %v1582_v8, %v383_v39  ;;  %v1245_v54 = vunpack.c.h.bf16 %v1364_v40  ;;  %v436_v55 = vadd.f32 %v1582_v8, %v397_v43 }
  0x28   : > { %v437_v56 = vadd.f32 %v1582_v8, %v398_v44  ;;  %v1276_v57 = vunpack.c.l.bf16 %v1372_v49  ;;  %v1277_v58 = vunpack.c.h.bf16 %v1372_v49  ;;  %v423_v59 = vadd.f32 %v1582_v8, %v384_v41 }
  0x29   : > { %v438_v60 = vadd.f32 %v1582_v8, %v399_v47  ;;  %v439_v61 = vadd.f32 %v1582_v8, %v400_v48  ;;  %v385_v62 = vmul.f32 %v1244_v50, %v1577_v5  ;;  %v386_v63 = vmul.f32 %v1245_v54, %v1577_v5 }
  0x2a   : > { %v447_v0 = vpack.c.bf16 %v421_v52, %v420_v51  ;;  %v455_v1 = vpack.c.bf16 %v437_v56, %v436_v55  ;;  %v401_v2 = vmul.f32 %v1276_v57, %v1577_v5  ;;  %v402_v3 = vmul.f32 %v1277_v58, %v1577_v5  ;;  %v1687_v5 = vld [vmem:[%s1825_s4] ss:$0 sm:$0xff] }
  0x2b   : > { %v448_v4 = vpack.c.bf16 %v423_v59, %v422_v53  ;;  %v456_v6 = vpack.c.bf16 %v439_v61, %v438_v60  ;;  %v424_v7 = vadd.f32 %v1582_v8, %v385_v62  ;;  %v425_v9 = vadd.f32 %v1582_v8, %v386_v63 }
  0x2c   : > { %v440_v10 = vadd.f32 %v1582_v8, %v401_v2  ;;  %v441_v11 = vadd.f32 %v1582_v8, %v402_v3 }
  0x2d   : > { %v449_v12 = vpack.c.bf16 %v425_v9, %v424_v7 }
  0x2e   : > { %1433 = vmatmul.mubr.bf16.gmra.mrb[4].mxu0 %v445_v36  ;;  %1449 = vmatmul.mubr.bf16.gmra.mrb[4].mxu1 %v453_v42  ;;  %v457_v13 = vpack.c.bf16 %v441_v11, %v440_v10 }
  0x2f   : > { %1436 = vmatprep.mubr.bf16.mxu0 %v446_v45  ;;  %1452 = vmatprep.mubr.bf16.mxu1 %v454_v46 }
  0x36   : > { %1437 = vmatmul.mubr.bf16.gmra.mrb[8].mxu0 %v447_v0  ;;  %1453 = vmatmul.mubr.bf16.gmra.mrb[8].mxu1 %v455_v1 }
  0x37   : > { %1440 = vmatprep.mubr.bf16.mxu0 %v448_v4  ;;  %1456 = vmatprep.mubr.bf16.mxu1 %v456_v6 }
  0x3e   : > { %1441 = vmatmul.mubr.bf16.gmra.mrb[12].mxu0 %v449_v12  ;;  %1457 = vmatmul.mubr.bf16.gmra.mrb[12].mxu1 %v457_v13 }
  0xf9   : > { %v1430_v14 = vpop.f32.mrb[0].mxu0  ;;  %v1446_v15 = vpop.f32.mrb[0].mxu1 }
  0xfa   : > { %v572_v16 = vadd.f32 %v1430_v14, %v1687_v5  ;;  %v563_v17 = vpop.f32.mrb[1].mxu0  ;;  %v636_v18 = vadd.f32 %v1446_v15, %v1687_v5  ;;  %v627_v19 = vpop.f32.mrb[1].mxu1 }
  0xfb   : > { %v564_v8 = vadd.f32 %v1687_v5, %v563_v17  ;;  %v1431_v20 = vpop.f32.mrb[2].mxu0  ;;  %v628_v21 = vadd.f32 %v1687_v5, %v627_v19  ;;  %v1447_v22 = vpop.f32.mrb[2].mxu1 }
  0xfc   : > { %v692_v23 = vmax.f32 %v572_v16, 0.0  ;;  %v575_v24 = vadd.f32 %v1431_v20, %v1687_v5  ;;  %v566_v25 = vpop.f32.mrb[3].mxu0  ;;  %v708_v26 = vmax.f32 %v636_v18, 0.0  ;;  %v639_v27 = vadd.f32 %v1447_v22, %v1687_v5  ;;  %v630_v28 = vpop.f32.mrb[3].mxu1 }
  0xfd   : > { %v690_v29 = vmax.f32 %v564_v8, 0.0  ;;  %v567_v30 = vadd.f32 %v1687_v5, %v566_v25  ;;  %v706_v31 = vmax.f32 %v628_v21, 0.0  ;;  %v631_v32 = vadd.f32 %v1687_v5, %v630_v28 }
  0xfe   : > { %v693_v33 = vmax.f32 %v575_v24, 0.0  ;;  %v1697_v34 = vmin.f32 %v708_v26, 6.0  ;;  %v709_v35 = vmax.f32 %v639_v27, 0.0  ;;  %v724_v39 = vmin.f32 %v692_v23, 6.0 }
  0xff   : > { %v722_v36 = vmin.f32 %v690_v29, 6.0  ;;  %v691_v37 = vmax.f32 %v567_v30, 0.0  ;;  %v707_v38 = vmax.f32 %v631_v32, 0.0  ;;  %v1699_v41 = vmin.f32 %v706_v31, 6.0 }
 0x100   : > { %v725_v40 = vmin.f32 %v693_v33, 6.0  ;;  %v1701_v42 = vmin.f32 %v709_v35, 6.0  ;;  %v954_v59 = vmul.f32 %v724_v39, %v724_v39 }
 0x101   : > { %v723_v43 = vmin.f32 %v691_v37, 6.0  ;;  %v1434_v44 = vpop.f32.mrb[4].mxu0  ;;  %v1710_v45 = vmin.f32 %v707_v38, 6.0  ;;  %v1450_v46 = vpop.f32.mrb[4].mxu1  ;;  %v952_v47 = vmul.f32 %v722_v36, %v722_v36 }
 0x102   : > { %v1286_v48 = vpack.c.bf16 %v725_v40, %v724_v39  ;;  %v588_v49 = vadd.f32 %v1434_v44, %v1687_v5  ;;  %v579_v50 = vpop.f32.mrb[5].mxu0  ;;  %v1326_v51 = vpack.c.bf16 %v1701_v42, %v1697_v34  ;;  %v643_v52 = vpop.f32.mrb[5].mxu1  ;;  %v955_v6 = vmul.f32 %v725_v40, %v725_v40 }
 0x103   : > { %v1281_v53 = vpack.c.bf16 %v723_v43, %v722_v36  ;;  %v914_v54 = vadd.f32 %v723_v43, %v722_v36  ;;  %v953_v55 = vmul.f32 %v723_v43, %v723_v43  ;;  %v580_v56 = vadd.f32 %v1687_v5, %v579_v50  ;;  %v1435_v57 = vpop.f32.mrb[6].mxu0  ;;  %v1451_v58 = vpop.f32.mrb[6].mxu1 }
 0x104   : > { %1373 = vst [vmem:[%s1708_s13 + $0x8] sm:$0xff] %v1286_v48   ;;  %v696_v60 = vmax.f32 %v588_v49, 0.0  ;;  %v591_v61 = vadd.f32 %v1435_v57, %v1687_v5  ;;  %v582_v62 = vpop.f32.mrb[7].mxu0  ;;  %1381 = vst [vmem:[%s1708_s13 + $0x48] sm:$0xff] %v1326_v51   ;;  %v1321_v63 = vpack.c.bf16 %v1710_v45, %v1699_v41  ;;  %v646_v0 = vpop.f32.mrb[7].mxu1  ;;  %v652_v15 = vadd.f32 %v1450_v46, %v1687_v5 }
 0x105   : > { %1282 = vst [vmem:[%s1708_s13] sm:$0xff] %v1281_v53   ;;  %v915_v1 = vadd.f32 %v914_v54, %v724_v39  ;;  %v984_v2 = vadd.f32 %v953_v55, %v952_v47  ;;  %v694_v3 = vmax.f32 %v580_v56, 0.0  ;;  %v583_v4 = vadd.f32 %v1687_v5, %v582_v62 }
 0x106   : > { %v728_v7 = vmin.f32 %v696_v60, 6.0  ;;  %v697_v9 = vmax.f32 %v591_v61, 0.0  ;;  %1380 = vst [vmem:[%s1708_s13 + $0x40] sm:$0xff] %v1321_v63   ;;  %v644_v16 = vadd.f32 %v1687_v5, %v643_v52  ;;  %v712_v38 = vmax.f32 %v652_v15, 0.0 }
 0x107   : > { %v985_v10 = vadd.f32 %v984_v2, %v954_v59  ;;  %v726_v11 = vmin.f32 %v694_v3, 6.0  ;;  %v916_v12 = vadd.f32 %v915_v1, %v725_v40  ;;  %v695_v13 = vmax.f32 %v583_v4, 0.0 }
 0x108   : > { %v729_v14 = vmin.f32 %v697_v9, 6.0  ;;  %v958_v22 = vmul.f32 %v728_v7, %v728_v7  ;;  %v710_v46 = vmax.f32 %v644_v16, 0.0  ;;  %v655_v50 = vadd.f32 %v1451_v58, %v1687_v5 }
 0x109   : > { %v917_v17 = vadd.f32 %v916_v12, %v726_v11  ;;  %v956_v18 = vmul.f32 %v726_v11, %v726_v11  ;;  %v986_v19 = vadd.f32 %v985_v10, %v955_v6  ;;  %v727_v8 = vmin.f32 %v695_v13, 6.0  ;;  %v1438_v20 = vpop.f32.mrb[8].mxu0  ;;  %v1726_v21 = vpop.f32.mrb[8].mxu1 }
 0x10a   : > { %v1296_v23 = vpack.c.bf16 %v729_v14, %v728_v7  ;;  %v604_v24 = vadd.f32 %v1438_v20, %v1687_v5  ;;  %v595_v25 = vpop.f32.mrb[9].mxu0  ;;  %v1729_v26 = vpop.f32.mrb[9].mxu1  ;;  %v959_v51 = vmul.f32 %v729_v14, %v729_v14  ;;  %v1741_v57 = vmin.f32 %v712_v38, 6.0 }
 0x10b   : > { %v987_v27 = vadd.f32 %v986_v19, %v956_v18  ;;  %v1291_v28 = vpack.c.bf16 %v727_v8, %v726_v11  ;;  %v918_v29 = vadd.f32 %v917_v17, %v727_v8  ;;  %v957_v30 = vmul.f32 %v727_v8, %v727_v8  ;;  %v1439_v31 = vpop.f32.mrb[10].mxu0  ;;  %v1731_v32 = vpop.f32.mrb[10].mxu1 }
 0x10c   : > { %1375 = vst [vmem:[%s1708_s13 + $0x18] sm:$0xff] %v1296_v23   ;;  %v700_v33 = vmax.f32 %v604_v24, 0.0  ;;  %v596_v35 = vadd.f32 %v1687_v5, %v595_v25  ;;  %v607_v36 = vadd.f32 %v1439_v31, %v1687_v5  ;;  %v598_v37 = vpop.f32.mrb[11].mxu0  ;;  %v1736_v39 = vpop.f32.mrb[11].mxu1  ;;  %v713_v59 = vmax.f32 %v655_v50, 0.0 }
 0x10d   : > { %1374 = vst [vmem:[%s1708_s13 + $0x10] sm:$0xff] %v1291_v28   ;;  %v919_v40 = vadd.f32 %v918_v29, %v728_v7  ;;  %v988_v43 = vadd.f32 %v987_v27, %v957_v30  ;;  %v599_v44 = vadd.f32 %v1687_v5, %v598_v37  ;;  %v1743_v63 = vmin.f32 %v710_v46, 6.0 }
 0x10e   : > { %v732_v47 = vmin.f32 %v700_v33, 6.0  ;;  %v698_v48 = vmax.f32 %v596_v35, 0.0  ;;  %v701_v49 = vmax.f32 %v607_v36, 0.0  ;;  %v647_v1 = vadd.f32 %v1687_v5, %v646_v0 }
 0x10f   : > { %v989_v52 = vadd.f32 %v988_v43, %v958_v22  ;;  %v920_v53 = vadd.f32 %v919_v40, %v729_v14  ;;  %v699_v54 = vmax.f32 %v599_v44, 0.0  ;;  %v1752_v19 = vmin.f32 %v713_v59, 6.0 }
 0x110   : > { %v730_v55 = vmin.f32 %v698_v48, 6.0  ;;  %v733_v56 = vmin.f32 %v701_v49, 6.0  ;;  %v962_v3 = vmul.f32 %v732_v47, %v732_v47  ;;  %v711_v24 = vmax.f32 %v647_v1, 0.0 }
 0x111   : > { %v990_v60 = vadd.f32 %v989_v52, %v959_v51  ;;  %v731_v61 = vmin.f32 %v699_v54, 6.0  ;;  %v1442_v62 = vpop.f32.mrb[12].mxu0  ;;  %v1458_v2 = vpop.f32.mrb[12].mxu1  ;;  %v1336_v29 = vpack.c.bf16 %v1752_v19, %v1741_v57  ;;  %v668_v46 = vadd.f32 %v1726_v21, %v1687_v5 }
 0x112   : > { %v921_v58 = vadd.f32 %v920_v53, %v730_v55  ;;  %v960_v4 = vmul.f32 %v730_v55, %v730_v55  ;;  %v1306_v6 = vpack.c.bf16 %v733_v56, %v732_v47  ;;  %v611_v7 = vpop.f32.mrb[13].mxu0  ;;  %v675_v9 = vpop.f32.mrb[13].mxu1  ;;  %v620_v12 = vadd.f32 %v1442_v62, %v1687_v5 }
 0x113   : > { %v1301_v10 = vpack.c.bf16 %v731_v61, %v730_v55  ;;  %v961_v11 = vmul.f32 %v731_v61, %v731_v61  ;;  %v612_v13 = vadd.f32 %v1687_v5, %v611_v7  ;;  %v1443_v14 = vpop.f32.mrb[14].mxu0  ;;  %v1748_v15 = vpop.f32.mrb[14].mxu1  ;;  %v963_v30 = vmul.f32 %v733_v56, %v733_v56  ;;  %1383 = vst [vmem:[%s1708_s13 + $0x58] sm:$0xff] %v1336_v29  }
 0x114   : > { %v991_v16 = vadd.f32 %v990_v60, %v960_v4  ;;  %1377 = vst [vmem:[%s1708_s13 + $0x28] sm:$0xff] %v1306_v6   ;;  %v922_v0 = vadd.f32 %v921_v58, %v731_v61  ;;  %v623_v17 = vadd.f32 %v1443_v14, %v1687_v5  ;;  %v614_v18 = vpop.f32.mrb[15].mxu0  ;;  %v1754_v8 = vpop.f32.mrb[15].mxu1  ;;  %v704_v20 = vmax.f32 %v620_v12, 0.0 }
 0x115   : > { %1376 = vst [vmem:[%s1708_s13 + $0x20] sm:$0xff] %v1301_v10   ;;  %v702_v22 = vmax.f32 %v612_v13, 0.0  ;;  %v615_v23 = vadd.f32 %v1687_v5, %v614_v18  ;;  %v1761_v40 = vmin.f32 %v711_v24, 6.0  ;;  %v716_v55 = vmax.f32 %v668_v46, 0.0 }
 0x116   : > { %v923_v25 = vadd.f32 %v922_v0, %v732_v47  ;;  %v992_v27 = vadd.f32 %v991_v16, %v961_v11  ;;  %v705_v28 = vmax.f32 %v623_v17, 0.0  ;;  %v736_v31 = vmin.f32 %v704_v20, 6.0 }
 0x117   : > { %v734_v33 = vmin.f32 %v702_v22, 6.0  ;;  %v703_v35 = vmax.f32 %v615_v23, 0.0  ;;  %v1331_v52 = vpack.c.bf16 %v1761_v40, %v1743_v63  ;;  %v968_v59 = vmul.f32 %v1699_v41, %v1699_v41 }
 0x118   : > { %v993_v36 = vadd.f32 %v992_v27, %v962_v3  ;;  %v924_v37 = vadd.f32 %v923_v25, %v733_v56  ;;  %v737_v38 = vmin.f32 %v705_v28, 6.0  ;;  %v660_v56 = vadd.f32 %v1687_v5, %v1729_v26 }
 0x119   : > { %v964_v43 = vmul.f32 %v734_v33, %v734_v33  ;;  %v735_v44 = vmin.f32 %v703_v35, 6.0  ;;  %1382 = vst [vmem:[%s1708_s13 + $0x50] sm:$0xff] %v1331_v52   ;;  %v671_v21 = vadd.f32 %v1731_v32, %v1687_v5  ;;  %v663_v60 = vadd.f32 %v1687_v5, %v1736_v39 }
 0x11a   : > { %v925_v47 = vadd.f32 %v924_v37, %v734_v33  ;;  %v994_v48 = vadd.f32 %v993_v36, %v963_v30  ;;  %v1316_v49 = vpack.c.bf16 %v737_v38, %v736_v31  ;;  %v684_v61 = vadd.f32 %v1458_v2, %v1687_v5 }
 0x11b   : > { %v1311_v50 = vpack.c.bf16 %v735_v44, %v734_v33  ;;  %v965_v51 = vmul.f32 %v735_v44, %v735_v44  ;;  %v966_v62 = vmul.f32 %v736_v31, %v736_v31  ;;  %v714_v58 = vmax.f32 %v660_v56, 0.0 }
 0x11c   : > { %v995_v53 = vadd.f32 %v994_v48, %v964_v43  ;;  %1379 = vst [vmem:[%s1708_s13 + $0x38] sm:$0xff] %v1316_v49   ;;  %v926_v54 = vadd.f32 %v925_v47, %v735_v44  ;;  %v748_v4 = vmin.f32 %v716_v55, 6.0  ;;  %v717_v6 = vmax.f32 %v671_v21, 0.0 }
 0x11d   : > { %1378 = vst [vmem:[%s1708_s13 + $0x30] sm:$0xff] %v1311_v50   ;;  %v715_v26 = vmax.f32 %v663_v60, 0.0  ;;  %v676_v7 = vadd.f32 %v1687_v5, %v675_v9  ;;  %v967_v10 = vmul.f32 %v737_v38, %v737_v38  ;;  %v746_v32 = vmin.f32 %v714_v58, 6.0 }
 0x11e   : > { %v927_v1 = vadd.f32 %v926_v54, %v736_v31  ;;  %v996_v3 = vadd.f32 %v995_v53, %v965_v51  ;;  %v749_v13 = vmin.f32 %v717_v6, 6.0  ;;  %v720_v39 = vmax.f32 %v684_v61, 0.0 }
 0x11f   : > { %v747_v14 = vmin.f32 %v715_v26, 6.0  ;;  %v687_v0 = vadd.f32 %v1748_v15, %v1687_v5  ;;  %v718_v20 = vmax.f32 %v676_v7, 0.0  ;;  %v969_v23 = vmul.f32 %v1710_v45, %v1710_v45 }
 0x120   : > { %v997_v11 = vadd.f32 %v996_v3, %v966_v62  ;;  %v928_v12 = vadd.f32 %v927_v1, %v737_v38  ;;  %v1346_v17 = vpack.c.bf16 %v749_v13, %v748_v4  ;;  %v752_v24 = vmin.f32 %v720_v39, 6.0 }
 0x121   : > { %v1341_v18 = vpack.c.bf16 %v747_v14, %v746_v32  ;;  %v721_v25 = vmax.f32 %v687_v0, 0.0  ;;  %v970_v15 = vmul.f32 %v1697_v34, %v1697_v34  ;;  %v750_v29 = vmin.f32 %v718_v20, 6.0 }
 0x122   : > { %v929_v2 = vadd.f32 %v928_v12, %v1699_v41  ;;  %v998_v16 = vadd.f32 %v997_v11, %v967_v10  ;;  %1385 = vst [vmem:[%s1708_s13 + $0x68] sm:$0xff] %v1346_v17   ;;  %v679_v41 = vadd.f32 %v1687_v5, %v1754_v8  ;;  %v972_v36 = vmul.f32 %v1743_v63, %v1743_v63 }
 0x123   : > { %1384 = vst [vmem:[%s1708_s13 + $0x60] sm:$0xff] %v1341_v18   ;;  %v753_v30 = vmin.f32 %v721_v25, 6.0  ;;  %v973_v46 = vmul.f32 %v1761_v40, %v1761_v40  ;;  %v975_v49 = vmul.f32 %v1752_v19, %v1752_v19  ;;  %v976_v51 = vmul.f32 %v746_v32, %v746_v32 }
 0x124   : > { %v999_v22 = vadd.f32 %v998_v16, %v968_v59  ;;  %v930_v9 = vadd.f32 %v929_v2, %v1710_v45  ;;  %v719_v31 = vmax.f32 %v679_v41, 0.0  ;;  %v971_v45 = vmul.f32 %v1701_v42, %v1701_v42 }
 0x125   : > { %v1356_v5 = vpack.c.bf16 %v753_v30, %v752_v24  ;;  %v977_v56 = vmul.f32 %v747_v14, %v747_v14  ;;  %v979_v60 = vmul.f32 %v749_v13, %v749_v13  ;;  %v980_v62 = vmul.f32 %v750_v29, %v750_v29 }
 0x126   : > { %v931_v27 = vadd.f32 %v930_v9, %v1697_v34  ;;  %v1000_v28 = vadd.f32 %v999_v22, %v969_v23  ;;  %v751_v8 = vmin.f32 %v719_v31, 6.0  ;;  %v982_v26 = vmul.f32 %v752_v24, %v752_v24 }
 0x127   : > { %1387 = vst [vmem:[%s1708_s13 + $0x78] sm:$0xff] %v1356_v5   ;;  %v983_v11 = vmul.f32 %v753_v30, %v753_v30 }
 0x128   : > { %v1001_v33 = vadd.f32 %v1000_v28, %v970_v15  ;;  %v932_v35 = vadd.f32 %v931_v27, %v1701_v42  ;;  %v1351_v34 = vpack.c.bf16 %v751_v8, %v750_v29  ;;  %v974_v42 = vmul.f32 %v1741_v57, %v1741_v57 }
 0x12a   : > { %v933_v37 = vadd.f32 %v932_v35, %v1743_v63  ;;  %v1002_v38 = vadd.f32 %v1001_v33, %v971_v45  ;;  %1386 = vst [vmem:[%s1708_s13 + $0x70] sm:$0xff] %v1351_v34  }
 0x12c   : > { %v1003_v43 = vadd.f32 %v1002_v38, %v972_v36  ;;  %v934_v44 = vadd.f32 %v933_v37, %v1761_v40  ;;  %v978_v40 = vmul.f32 %v748_v4, %v748_v4 }
 0x12e   : > { %v935_v47 = vadd.f32 %v934_v44, %v1741_v57  ;;  %v1004_v48 = vadd.f32 %v1003_v43, %v973_v46 }
 0x130   : > { %v1005_v63 = vadd.f32 %v1004_v48, %v974_v42  ;;  %v936_v50 = vadd.f32 %v935_v47, %v1752_v19  ;;  %v981_v19 = vmul.f32 %v751_v8, %v751_v8 }
 0x132   : > { %v937_v52 = vadd.f32 %v936_v50, %v746_v32  ;;  %v1006_v53 = vadd.f32 %v1005_v63, %v975_v49 }
 0x134   : > { %v1007_v54 = vadd.f32 %v1006_v53, %v976_v51  ;;  %v938_v55 = vadd.f32 %v937_v52, %v747_v14 }
 0x136   : > { %v939_v59 = vadd.f32 %v938_v55, %v748_v4  ;;  %v1008_v21 = vadd.f32 %v1007_v54, %v977_v56 }
 0x138   : > { %v1009_v61 = vadd.f32 %v1008_v21, %v978_v40  ;;  %v940_v57 = vadd.f32 %v939_v59, %v749_v13 }
 0x13a   : > { %v941_v1 = vadd.f32 %v940_v57, %v750_v29  ;;  %v1010_v3 = vadd.f32 %v1009_v61, %v979_v60 }
 0x13c   : > { %v1011_v58 = vadd.f32 %v1010_v3, %v980_v62  ;;  %v942_v6 = vadd.f32 %v941_v1, %v751_v8 }
 0x13e   : > { %v943_v7 = vadd.f32 %v942_v6, %v752_v24  ;;  %v1012_v10 = vadd.f32 %v1011_v58, %v981_v19 }
 0x140   : > { %v944_v12 = vadd.f32 %v943_v7, %v753_v30  ;;  %v1013_v32 = vadd.f32 %v1012_v10, %v982_v26 }
 0x142   : > { %v945_v14 = vrot.slane %v944_v12, 4  ;;  %v1014_v4 = vadd.f32 %v1013_v32, %v983_v11 }
 0x144   : > { %v946_v39 = vadd.f32 %v945_v14, %v944_v12  ;;  %v1015_v2 = vrot.slane %v1014_v4, 4 }
 0x146   : > { %v947_v16 = vrot.slane %v946_v39, 2  ;;  %v1016_v13 = vadd.f32 %v1015_v2, %v1014_v4 }
 0x148   : > { %v948_v0 = vadd.f32 %v947_v16, %v946_v39  ;;  %v1017_v17 = vrot.slane %v1016_v13, 2 }
 0x14a   : > { %v949_v18 = vrot.slane %v948_v0, 1  ;;  %v1018_v20 = vadd.f32 %v1017_v17, %v1016_v13 }
 0x14c   : > { %v950_v22 = vadd.f32 %v949_v18, %v948_v0  ;;  %v1019_v9 = vrot.slane %v1018_v20, 1 }
 0x14e   : > { %951 = vst [vmem:[%s295_s14] sm:$0x1] %v950_v22  ;;  %v1020_v23 = vadd.f32 %v1019_v9, %v1018_v20 }
 0x150   : > { %1021 = vst [vmem:[%s298_s17] sm:$0x1] %v1020_v23 }
 0x151 PF: > { %s18_s24 = sadd.s32 1, %s1498_s24  }
 0x152   : > { %p15_p5 = scmp.ge.s32.totalorder %s18_s24, 4  }
 0x154   :  { %17 = sbr.rel (!%p15_p5) target bundleno = 1 (0x1), region = 94 }

// kernel: inverted_residual_block.5
= control target key start
LH: loop header
LB: loop body
LE: loop exit
PB: predicated region body
PF: predicated region fallthrough
CT: control target
= control target key end

     0   :  { %s2638_s24 = smov 0   ;;  %s3887_s0 = inlined_call_operand.vmem [shape: bf16[512,128], index: 0, kind: input, shape index: {}]   ;;  %s3888_s1 = inlined_call_operand.vmem [shape: f32[1,128], index: 1, kind: input, shape index: {}]   ;;  %s3889_s2 = inlined_call_operand.vmem [shape: f32[1,128], index: 2, kind: input, shape index: {}]   ;;  %s3890_s3 = inlined_call_operand.vmem [shape: f32[9,128], index: 3, kind: input, shape index: {}]   ;;  %s3891_s4 = inlined_call_operand.vmem [shape: f32[1,128], index: 4, kind: input, shape index: {}]   ;;  %s3892_s5 = inlined_call_operand.vmem [shape: bf16[512,128], index: 5, kind: output, shape index: {0}]   ;;  %s3893_s6 = inlined_call_operand.vmem [shape: f32[2,1,128], index: 6, kind: output, shape index: {1}]   ;;  %s3894_s7 = inlined_call_operand.vmem [shape: f32[2,1,128], index: 7, kind: output, shape index: {2}]  }
   0x1 LB: > { %s2644_s25 = sadd.s32 4294967295, %s2595_s24   ;;  %p2321_p0 = scmp.ge.s32.totalorder %s2595_s24, 1  ;;  %s2595_s24 = sphi %s2638_s24, %s18_s24  }
   0x2   : > { %p243_p1 = scmp.lt.s32.totalorder %s2595_s24, 3 }
   0x4   : > { %p244_p2 = pnand %p2321_p0, %p243_p1 }
   0x6   : > { %247 = sbr.rel (%p244_p2) target bundleno = 287 (0x11f), region = 40 }
   0xd   : > { %s2322_s26 = sshll.u32 %s2644_s25, 5  ;;  %v479_v0 = vlaneseq  ;;  %v2597_v1 = vmov 0.0   ;;  %v2656_v3 = vld [vmem:[%s3890_s3] sm:$0xff]  ;;  %p293_p4 = scmp.lt.s32.totalorder %s2644_s25, 1 }
   0xe   : > { %441 = vst [vmem:[#allocation2] sm:$0xff] %v2597_v1  ;;  %442 = vst [vmem:[#allocation2 + $0x8] sm:$0xff] %v2597_v1  ;;  %p282_p3 = scmp.lt.s32.totalorder %s2322_s26, 63  ;;  %v2677_v10 = vld [vmem:[%s3888_s1] ss:$0 sm:$0xff] }
   0xf   : > { %443 = vst [vmem:[#allocation2 + $0x10] sm:$0x1] %v2597_v1  ;;  %476 = vst [vmem:[#allocation2 + $0x111] sm:$0xff] %v2597_v1  ;;  %v2649_v2 = vshrl.u32 %v479_v0, 7  ;;  %v2704_v27 = vld [vmem:[%s3889_s2] ss:$0 sm:$0xff] }
  0x10   : > { %477 = vst [vmem:[#allocation2 + $0x119] sm:$0xff] %v2597_v1  ;;  %478 = vst [vmem:[#allocation2 + $0x121] sm:$0x1] %v2597_v1  ;;  %s3972_s26 = smov (!%p282_p3, %s2322_s26), 63  ;;  %s3974_s25 = smov (!%p293_p4, %s2644_s25), 1 }
  0x11   : > { %v2659_v4 = vadd.s32 8, %v2649_v2  ;;  %v996_v5 = vsub.s32 0, %v2649_v2  ;;  %v1096_v6 = vsub.s32 1, %v2649_v2  ;;  %s2323_s29 = sshll.u32 %s3972_s26, 2  ;;  %v1196_v7 = vsub.s32 2, %v2649_v2  ;;  %s295_s10 = scalar_lea.vmem %s3893_s6, %s3974_s25 }
  0x12   : > { %v1266_v8 = vsub.s32 3, %v2649_v2  ;;  %v1336_v9 = vsub.s32 4, %v2649_v2  ;;  %s2672_s9 = scalar_lea.vmem %s3887_s0, %s2323_s29  ;;  %v516_v11 = vand.u32 15, %v2649_v2  ;;  %v1406_v14 = vsub.s32 5, %v2649_v2  ;;  %s2939_s20 = scalar_lea.vmem %s3892_s5, %s2323_s29 }
  0x13   : > { %v523_v12 = vand.u32 15, %v2659_v4  ;;  %v2682_v13 = vrot.slane %v2656_v3, %v996_v5  ;;  %v2397_v15 = vld [vmem:[%s2672_s9] sm:$0xff]   ;;  %v2540_v16 = vld [vmem:[%s2672_s9 + $0x8] sm:$0xff]   ;;  %v2541_v17 = vld [vmem:[%s2672_s9 + $0x10] sm:$0xff]   ;;  %v2689_v18 = vrot.slane %v2656_v3, %v1096_v6  ;;  %v2692_v19 = vrot.slane %v2656_v3, %v1196_v7  ;;  %s298_s13 = scalar_lea.vmem %s3894_s7, %s3974_s25 }
  0x14   : > { %v2695_v20 = vrot.slane %v2656_v3, %v1266_v8  ;;  %v2698_v21 = vrot.slane %v2656_v3, %v1336_v9  ;;  %v2398_v22 = vunpack.c.l.bf16 %v2397_v15  ;;  %v2399_v23 = vunpack.c.h.bf16 %v2397_v15  ;;  %v2542_v26 = vld [vmem:[%s2672_s9 + $0x18] sm:$0xff]   ;;  %v2543_v40 = vld [vmem:[%s2672_s9 + $0x20] sm:$0xff]   ;;  %v2544_v41 = vld [vmem:[%s2672_s9 + $0x28] sm:$0xff]  }
  0x15   : > { %v2402_v24 = vunpack.c.l.bf16 %v2540_v16  ;;  %v2403_v25 = vunpack.c.h.bf16 %v2540_v16  ;;  %v2406_v28 = vunpack.c.l.bf16 %v2541_v17  ;;  %v2407_v29 = vunpack.c.h.bf16 %v2541_v17  ;;  %v2545_v46 = vld [vmem:[%s2672_s9 + $0x30] sm:$0xff]   ;;  %v2546_v47 = vld [vmem:[%s2672_s9 + $0x38] sm:$0xff]   ;;  %v2547_v7 = vld [vmem:[%s2672_s9 + $0x40] sm:$0xff]  }
  0x16   : > { %v2410_v30 = vunpack.c.l.bf16 %v2542_v26  ;;  %v2411_v31 = vunpack.c.h.bf16 %v2542_v26  ;;  %v370_v32 = vmul.f32 %v2398_v22, %v2677_v10  ;;  %v371_v33 = vmul.f32 %v2399_v23, %v2677_v10  ;;  %v2548_v8 = vld [vmem:[%s2672_s9 + $0x48] sm:$0xff]   ;;  %v2773_v22 = vld [vmem:[%s2672_s9 + $0x50] sm:$0xff]  }
  0x17   : > { %v372_v34 = vmul.f32 %v2402_v24, %v2677_v10  ;;  %v373_v35 = vmul.f32 %v2403_v25, %v2677_v10  ;;  %v374_v36 = vmul.f32 %v2406_v28, %v2677_v10  ;;  %v375_v37 = vmul.f32 %v2407_v29, %v2677_v10  ;;  %v1062_v23 = vld [vmem:[#allocation2 + $0x1] sm:$0xff] }
  0x18   : > { %v376_v38 = vmul.f32 %v2410_v30, %v2677_v10  ;;  %v377_v39 = vmul.f32 %v2411_v31, %v2677_v10  ;;  %v2717_v42 = vadd.f32 %v2704_v27, %v370_v32  ;;  %v2720_v43 = vadd.f32 %v2704_v27, %v371_v33  ;;  %v1063_v33 = vld [vmem:[#allocation2 + $0x9] sm:$0xff] }
  0x19   : > { %v2723_v44 = vadd.f32 %v2704_v27, %v372_v34  ;;  %v2726_v45 = vadd.f32 %v2704_v27, %v373_v35  ;;  %v2731_v48 = vadd.f32 %v2704_v27, %v374_v36  ;;  %v2734_v49 = vadd.f32 %v2704_v27, %v375_v37  ;;  %v1162_v34 = vld [vmem:[#allocation2 + $0x2] sm:$0xff] }
  0x1a   : > { %v2737_v50 = vadd.f32 %v2704_v27, %v376_v38  ;;  %v2740_v51 = vadd.f32 %v2704_v27, %v377_v39  ;;  %444 = vst [vmem:[#allocation2 + $0x11] sm:$0xff] %v2717_v42  ;;  %445 = vst [vmem:[#allocation2 + $0x19] sm:$0xff] %v2720_v43  ;;  %v2414_v52 = vunpack.c.l.bf16 %v2543_v40  ;;  %v2415_v53 = vunpack.c.h.bf16 %v2543_v40 }
  0x1b   : > { %446 = vst [vmem:[#allocation2 + $0x21] sm:$0xff] %v2723_v44  ;;  %447 = vst [vmem:[#allocation2 + $0x29] sm:$0xff] %v2726_v45  ;;  %v2418_v54 = vunpack.c.l.bf16 %v2544_v41  ;;  %v2419_v55 = vunpack.c.h.bf16 %v2544_v41  ;;  %v2422_v56 = vunpack.c.l.bf16 %v2545_v46  ;;  %v2423_v57 = vunpack.c.h.bf16 %v2545_v46 }
  0x1c   : > { %448 = vst [vmem:[#allocation2 + $0x31] sm:$0xff] %v2731_v48  ;;  %449 = vst [vmem:[#allocation2 + $0x39] sm:$0xff] %v2734_v49  ;;  %v2426_v58 = vunpack.c.l.bf16 %v2546_v47  ;;  %v2427_v59 = vunpack.c.h.bf16 %v2546_v47  ;;  %v378_v60 = vmul.f32 %v2414_v52, %v2677_v10  ;;  %v379_v61 = vmul.f32 %v2415_v53, %v2677_v10 }
  0x1d   : > { %450 = vst [vmem:[#allocation2 + $0x41] sm:$0xff] %v2737_v50  ;;  %451 = vst [vmem:[#allocation2 + $0x49] sm:$0xff] %v2740_v51  ;;  %v380_v62 = vmul.f32 %v2418_v54, %v2677_v10  ;;  %v381_v63 = vmul.f32 %v2419_v55, %v2677_v10  ;;  %v382_v0 = vmul.f32 %v2422_v56, %v2677_v10  ;;  %v2430_v29 = vunpack.c.l.bf16 %v2547_v7 }
  0x1e   : > { %v383_v1 = vmul.f32 %v2423_v57, %v2677_v10  ;;  %v384_v5 = vmul.f32 %v2426_v58, %v2677_v10  ;;  %v385_v6 = vmul.f32 %v2427_v59, %v2677_v10  ;;  %v2761_v9 = vadd.f32 %v2704_v27, %v378_v60 }
  0x1f   : > { %v2764_v15 = vadd.f32 %v2704_v27, %v379_v61  ;;  %v2767_v16 = vadd.f32 %v2704_v27, %v380_v62  ;;  %v2770_v17 = vadd.f32 %v2704_v27, %v381_v63  ;;  %v2776_v24 = vadd.f32 %v2704_v27, %v382_v0 }
  0x20   : > { %v2779_v25 = vadd.f32 %v2704_v27, %v383_v1  ;;  %v2782_v26 = vadd.f32 %v2704_v27, %v384_v5  ;;  %v2785_v28 = vadd.f32 %v2704_v27, %v385_v6  ;;  %452 = vst [vmem:[#allocation2 + $0x51] sm:$0xff] %v2761_v9  ;;  %v2431_v30 = vunpack.c.h.bf16 %v2547_v7  ;;  %v2831_v6 = vld [vmem:[%s3890_s3 + $0x8] ss:$0 sm:$0xff] }
  0x21   : > { %3903 = vst [vmem:[#allocation3_spill] sm:$0xff] %v2776_v24  ;;  %453 = vst [vmem:[#allocation2 + $0x59] sm:$0xff] %v2764_v15  ;;  %v2434_v31 = vunpack.c.l.bf16 %v2548_v8  ;;  %v2435_v32 = vunpack.c.h.bf16 %v2548_v8  ;;  %v2438_v35 = vunpack.c.l.bf16 %v2773_v22  ;;  %v998_v36 = vmul.f32 0.0, %v2682_v13  ;;  %v964_v47 = vld [vmem:[#allocation2 + $0x10] sm:$0xff]  ;;  %v965_v52 = vld [vmem:[#allocation2 + $0x18] sm:$0xff] }
  0x22   : > { %3904 = vst [vmem:[#allocation4_spill] sm:$0xff] %v2779_v25  ;;  %3905 = vst [vmem:[#allocation5_spill] sm:$0xff] %v2782_v26  ;;  %v1098_v37 = vmul.f32 %v2689_v18, %v1062_v23  ;;  %v2801_v38 = vrot.slane %v2656_v3, %v1406_v14  ;;  %v386_v39 = vmul.f32 %v2430_v29, %v2677_v10  ;;  %v1163_v53 = vld [vmem:[#allocation2 + $0xa] sm:$0xff]  ;;  %vm2810_vm0 = vcmp.ge.s32.totalorder %v516_v11, 1  ;;  %v1164_v56 = vld [vmem:[#allocation2 + $0x12] sm:$0xff] }
  0x23   : > { %3906 = vst [vmem:[#allocation6_spill] sm:$0xff] %v2785_v28  ;;  %454 = vst [vmem:[#allocation2 + $0x61] sm:$0xff] %v2767_v16  ;;  %v387_v40 = vmul.f32 %v2431_v30, %v2677_v10  ;;  %v388_v41 = vmul.f32 %v2434_v31, %v2677_v10  ;;  %v389_v46 = vmul.f32 %v2435_v32, %v2677_v10  ;;  %v2815_v57 = vld [vmem:[#allocation2 + $0x1a] sm:$0xff]  ;;  %v1476_v29 = vsub.s32 6, %v2649_v2  ;;  %v2839_v30 = vld [vmem:[#allocation2 + $0x2a] sm:$0xff] }
  0x24   : > { %455 = vst [vmem:[#allocation2 + $0x69] sm:$0xff] %v2770_v17  ;;  %456 = vst [vmem:[#allocation2 + $0x71] sm:$0xff] %v2776_v24  ;;  %v390_v54 = vmul.f32 %v2438_v35, %v2677_v10  ;;  %v1099_v14 = vmul.f32 %v2689_v18, %v1063_v33  ;;  %v1198_v58 = vmul.f32 %v2692_v19, %v1162_v34  ;;  %v2841_v31 = vld [vmem:[#allocation2 + $0x20] sm:$0xff]  ;;  %v1546_v35 = vsub.s32 7, %v2649_v2 }
  0x25   : > { %457 = vst [vmem:[#allocation2 + $0x79] sm:$0xff] %v2779_v25  ;;  %458 = vst [vmem:[#allocation2 + $0x81] sm:$0xff] %v2782_v26  ;;  %v1199_v59 = vmul.f32 %v2692_v19, %v1163_v53  ;;  %v425_v60 = vadd.f32 %v2704_v27, %v386_v39  ;;  %v426_v61 = vadd.f32 %v2704_v27, %v387_v40  ;;  %v2847_v53 = vld [vmem:[#allocation2 + $0x22] sm:$0xff]  ;;  %vm2861_vm1 = vcmp.le.s32.totalorder %v523_v12, 14 }
  0x26   : > { %459 = vst [vmem:[#allocation2 + $0x89] sm:$0xff] %v2785_v28  ;;  %v427_v62 = vadd.f32 %v2704_v27, %v388_v41  ;;  %v428_v11 = vadd.f32 %v2704_v27, %v389_v46  ;;  %v429_v63 = vadd.f32 %v2704_v27, %v390_v54  ;;  %v1268_v0 = vmul.f32 %v2695_v20, %v964_v47  ;;  %v2849_v54 = vld [vmem:[#allocation2 + $0x28] sm:$0xff] }
  0x27   : > { %v1269_v1 = vmul.f32 %v2695_v20, %v965_v52  ;;  %v1338_v5 = vmul.f32 %v2698_v21, %v2717_v42  ;;  %460 = vst [vmem:[#allocation2 + $0x91] sm:$0xff] %v425_v60  ;;  %461 = vst [vmem:[#allocation2 + $0x99] sm:$0xff] %v426_v61  ;;  %v1339_v7 = vmul.f32 %v2698_v21, %v2720_v43  ;;  %v2439_v25 = vunpack.c.h.bf16 %v2773_v22 }
  0x28   : > { %462 = vst [vmem:[#allocation2 + $0xa1] sm:$0xff] %v427_v62  ;;  %463 = vst [vmem:[#allocation2 + $0xa9] sm:$0xff] %v428_v11  ;;  %v1408_v8 = vmul.f32 %v2801_v38, %v1164_v56  ;;  %v1409_v23 = vmul.f32 %v2801_v38, %v2815_v57  ;;  %v1300_v32 = vadd.f32 %v1268_v0, %v998_v36  ;;  %v486_v24 = vadd.s32 48, %v2649_v2 }
  0x29   : > { %464 = vst [vmem:[#allocation2 + $0xb1] sm:$0xff] %v429_v63  ;;  %v1301_v33 = vadd.f32 %v1269_v1, %v998_v36  ;;  %v1370_v34 = vadd.f32 %v1338_v5, %v1098_v37  ;;  %v1371_v39 = vadd.f32 %v1339_v7, %v1099_v14  ;;  %v2845_v46 = vrot.slane %v2656_v3, %v1476_v29 }
  0x2a   : > { %v1440_v40 = vadd.f32 %v1408_v8, %v1198_v58  ;;  %v1441_v41 = vadd.f32 %v1409_v23, %v1199_v59  ;;  %v2852_v60 = vrot.slane %v2656_v3, %v1546_v35  ;;  %v1648_v61 = vmul.f32 %v2831_v6, %v2847_v53 }
  0x2b   : > { %v1649_v36 = vmul.f32 %v2831_v6, %v2839_v30  ;;  %v482_v37 = vadd.s32 16, %v2649_v2  ;;  %v1478_v58 = vmul.f32 %v2845_v46, %v2841_v31  ;;  %v1479_v3 = vmul.f32 %v2845_v46, %v2849_v54 }
  0x2c   : > { %v483_v59 = vadd.s32 24, %v2649_v2  ;;  %v1548_v62 = vmul.f32 %v2852_v60, %v2723_v44  ;;  %v1549_v11 = vmul.f32 %v2852_v60, %v2726_v45  ;;  %v1000_v4 = vmul.f32 %v2682_v13, %v964_v47 }
  0x2d   : > { %v1681_v63 = vadd.f32 %v1649_v36, %v1441_v41  ;;  %v1510_v12 = vadd.f32 %v1478_v58, %v1300_v32  ;;  %v1511_v0 = vadd.f32 %v1479_v3, %v1301_v33  ;;  %v530_v1 = vand.u32 15, %v482_v37 }
  0x2e   : > { %v537_v5 = vand.u32 15, %v483_v59  ;;  %v1580_v7 = vadd.f32 %v1548_v62, %v1370_v34  ;;  %v1581_v8 = vadd.f32 %v1549_v11, %v1371_v39  ;;  %v1680_v23 = vadd.f32 %v1648_v61, %v1440_v40  ;;  %v2896_v40 = vld [vmem:[%s3891_s4] ss:$0 sm:$0xff]  ;;  %v2914_v11 = vld [vmem:[#allocation2 + $0x32] sm:$0xff] }
  0x2f   : > { %v1777_v29 = vsel %vm2861_vm1, %v1681_v63, 0.0  ;;  %v1712_v35 = vsel %vm2810_vm0, %v1510_v12, 0.0  ;;  %vm2879_vm2 = vcmp.ge.s32.totalorder %v530_v1, 1  ;;  %v1001_v41 = vmul.f32 %v2682_v13, %v965_v52 }
  0x30   : > { %v1100_v47 = vmul.f32 %v2689_v18, %v2717_v42  ;;  %v1744_v32 = vadd.f32 %v1712_v35, %v1580_v7  ;;  %v1745_v33 = vadd.f32 %v1581_v8, %v1511_v0  ;;  %vm2886_vm3 = vcmp.le.s32.totalorder %v537_v5, 14  ;;  %v2918_v0 = vld [vmem:[#allocation2 + $0x30] sm:$0xff]  ;;  %v2920_v7 = vld [vmem:[#allocation2 + $0x3a] sm:$0xff] }
  0x31   : > { %v1101_v39 = vmul.f32 %v2689_v18, %v2720_v43  ;;  %v1200_v55 = vmul.f32 %v2692_v19, %v1164_v56  ;;  %v1201_v52 = vmul.f32 %v2692_v19, %v2815_v57  ;;  %v1270_v42 = vmul.f32 %v2695_v20, %v2841_v31  ;;  %v2906_v56 = vld [vmem:[#allocation2 + $0x38] sm:$0xff] }
  0x32   : > { %v1271_v61 = vmul.f32 %v2695_v20, %v2849_v54  ;;  %v1340_v36 = vmul.f32 %v2698_v21, %v2723_v44  ;;  %v1808_v43 = vadd.f32 %v1744_v32, %v1680_v23  ;;  %v1809_v37 = vadd.f32 %v1777_v29, %v1745_v33 }
  0x33   : > { %v1341_v14 = vmul.f32 %v2698_v21, %v2726_v45  ;;  %v1410_v58 = vmul.f32 %v2847_v53, %v2801_v38  ;;  %v1302_v57 = vadd.f32 %v1270_v42, %v1000_v4  ;;  %v1411_v62 = vmul.f32 %v2839_v30, %v2801_v38 }
  0x34   : > { %v1303_v3 = vadd.f32 %v1271_v61, %v1001_v41  ;;  %v1372_v59 = vadd.f32 %v1340_v36, %v1100_v47  ;;  %v1847_v63 = vadd.f32 %v2896_v40, %v1808_v43  ;;  %v1848_v12 = vadd.f32 %v2896_v40, %v1809_v37 }
  0x35   : > { %v1373_v1 = vadd.f32 %v1341_v14, %v1101_v39  ;;  %v1442_v5 = vadd.f32 %v1410_v58, %v1200_v55  ;;  %v1443_v8 = vadd.f32 %v1411_v62, %v1201_v52  ;;  %v1480_v4 = vmul.f32 %v2845_v46, %v2918_v0 }
  0x36   : > { %v1481_v23 = vmul.f32 %v2845_v46, %v2906_v56  ;;  %v1550_v29 = vmul.f32 %v2852_v60, %v2731_v48  ;;  %v1879_v35 = vmax.f32 %v1847_v63, 0.0  ;;  %v1880_v41 = vmax.f32 %v1848_v12, 0.0 }
  0x37   : > { %v1551_v47 = vmul.f32 %v2852_v60, %v2734_v49  ;;  %v1650_v32 = vmul.f32 %v2831_v6, %v2914_v11  ;;  %v1512_v33 = vadd.f32 %v1480_v4, %v1302_v57  ;;  %v1651_v52 = vmul.f32 %v2831_v6, %v2920_v7 }
  0x38   : > { %v1513_v39 = vadd.f32 %v1481_v23, %v1303_v3  ;;  %v1582_v55 = vadd.f32 %v1550_v29, %v1372_v59  ;;  %v1911_v42 = vmin.f32 %v1879_v35, 6.0  ;;  %v1912_v61 = vmin.f32 %v1880_v41, 6.0 }
  0x39   : > { %v1583_v36 = vadd.f32 %v1551_v47, %v1373_v1  ;;  %v1682_v43 = vadd.f32 %v1650_v32, %v1442_v5  ;;  %v1683_v37 = vadd.f32 %v1651_v52, %v1443_v8  ;;  %v1714_v14 = vsel %vm2879_vm2, %v1512_v33, 0.0 }
  0x3a   : > { %v484_v58 = vadd.s32 32, %v2649_v2  ;;  %v485_v57 = vadd.s32 40, %v2649_v2  ;;  %v2463_v3 = vpack.c.bf16 %v1912_v61, %v1911_v42  ;;  %v2103_v59 = vadd.f32 %v1912_v61, %v1911_v42 }
  0x3b   : > { %v2141_v62 = vmul.f32 %v1911_v42, %v1911_v42  ;;  %v2142_v63 = vmul.f32 %v1912_v61, %v1912_v61  ;;  %v1746_v12 = vadd.f32 %v1714_v14, %v1582_v55  ;;  %v1747_v1 = vadd.f32 %v1583_v36, %v1513_v39  ;;  %v2974_v42 = vld [vmem:[#allocation2 + $0x40] sm:$0xff]  ;;  %v2976_v61 = vld [vmem:[#allocation2 + $0x48] sm:$0xff] }
  0x3c   : > { %v1779_v5 = vsel %vm2886_vm3, %v1683_v37, 0.0  ;;  %v544_v4 = vand.u32 15, %v484_v58  ;;  %2464 = vst [vmem:[%s2939_s20] sm:$0xff] %v2463_v3   ;;  %v551_v8 = vand.u32 15, %v485_v57  ;;  %v1002_v28 = vmul.f32 %v2682_v13, %v2841_v31  ;;  %v2986_v57 = vld [vmem:[#allocation2 + $0x42] sm:$0xff]  ;;  %v2988_v3 = vld [vmem:[#allocation2 + $0x4a] sm:$0xff] }
  0x3d   : > { %v2173_v23 = vadd.f32 %v2142_v63, %v2141_v62  ;;  %v1003_v29 = vmul.f32 %v2682_v13, %v2849_v54  ;;  %v1810_v35 = vadd.f32 %v1746_v12, %v1682_v43  ;;  %v1811_v41 = vadd.f32 %v1779_v5, %v1747_v1 }
  0x3e   : > { %vm2952_vm4 = vcmp.ge.s32.totalorder %v544_v4, 1  ;;  %v1102_v34 = vmul.f32 %v2689_v18, %v2723_v44  ;;  %vm2958_vm5 = vcmp.le.s32.totalorder %v551_v8, 14  ;;  %v1103_v33 = vmul.f32 %v2689_v18, %v2726_v45 }
  0x3f   : > { %v1202_v31 = vmul.f32 %v2847_v53, %v2692_v19  ;;  %v1203_v54 = vmul.f32 %v2839_v30, %v2692_v19  ;;  %v1849_v39 = vadd.f32 %v2896_v40, %v1810_v35  ;;  %v1850_v55 = vadd.f32 %v2896_v40, %v1811_v41 }
  0x40   : > { %v1272_v44 = vmul.f32 %v2695_v20, %v2918_v0  ;;  %v1273_v52 = vmul.f32 %v2695_v20, %v2906_v56  ;;  %v1342_v45 = vmul.f32 %v2698_v21, %v2731_v48  ;;  %v1343_v30 = vmul.f32 %v2698_v21, %v2734_v49 }
  0x41   : > { %v1412_v53 = vmul.f32 %v2914_v11, %v2801_v38  ;;  %v1413_v36 = vmul.f32 %v2920_v7, %v2801_v38  ;;  %v1881_v43 = vmax.f32 %v1849_v39, 0.0  ;;  %v1882_v37 = vmax.f32 %v1850_v55, 0.0 }
  0x42   : > { %v1304_v14 = vadd.f32 %v1272_v44, %v1002_v28  ;;  %v1305_v58 = vadd.f32 %v1273_v52, %v1003_v29  ;;  %v1374_v62 = vadd.f32 %v1342_v45, %v1102_v34  ;;  %v1375_v63 = vadd.f32 %v1343_v30, %v1103_v33 }
  0x43   : > { %v1444_v12 = vadd.f32 %v1412_v53, %v1202_v31  ;;  %v1445_v1 = vadd.f32 %v1413_v36, %v1203_v54  ;;  %v1913_v5 = vmin.f32 %v1881_v43, 6.0  ;;  %v1914_v4 = vmin.f32 %v1882_v37, 6.0 }
  0x44   : > { %v1482_v8 = vmul.f32 %v2845_v46, %v2974_v42  ;;  %v1483_v35 = vmul.f32 %v2845_v46, %v2976_v61  ;;  %v1552_v28 = vmul.f32 %v2852_v60, %v2737_v50  ;;  %v1553_v29 = vmul.f32 %v2852_v60, %v2740_v51 }
  0x45   : > { %v1652_v41 = vmul.f32 %v2831_v6, %v2986_v57  ;;  %v1653_v34 = vmul.f32 %v2831_v6, %v2988_v3  ;;  %v2468_v33 = vpack.c.bf16 %v1914_v4, %v1913_v5  ;;  %v2104_v31 = vadd.f32 %v2103_v59, %v1913_v5 }
  0x46   : > { %v2143_v54 = vmul.f32 %v1913_v5, %v1913_v5  ;;  %v2144_v39 = vmul.f32 %v1914_v4, %v1914_v4  ;;  %v1514_v55 = vadd.f32 %v1482_v8, %v1304_v14  ;;  %v1515_v44 = vadd.f32 %v1483_v35, %v1305_v58 }
  0x47   : > { %v1584_v52 = vadd.f32 %v1552_v28, %v1374_v62  ;;  %v1585_v45 = vadd.f32 %v1553_v29, %v1375_v63  ;;  %2555 = vst [vmem:[%s2939_s20 + $0x8] sm:$0xff] %v2468_v33   ;;  %v2105_v30 = vadd.f32 %v2104_v31, %v1914_v4  ;;  %v1684_v36 = vadd.f32 %v1652_v41, %v1444_v12  ;;  %v3043_v41 = vld [vmem:[#allocation2 + $0x50] sm:$0xff] }
  0x48   : > { %v2174_v53 = vadd.f32 %v2173_v23, %v2143_v54  ;;  %v1685_v43 = vadd.f32 %v1653_v34, %v1445_v1  ;;  %v1716_v37 = vsel %vm2952_vm4, %v1514_v55, 0.0  ;;  %v487_v58 = vadd.s32 56, %v2649_v2 }
  0x49   : > { %v1749_v26 = vadd.f32 %v1585_v45, %v1515_v44  ;;  %v1748_v5 = vadd.f32 %v1716_v37, %v1584_v52  ;;  %v391_v23 = vmul.f32 %v2439_v25, %v2677_v10  ;;  %v558_v63 = vand.u32 15, %v486_v24 }
  0x4a   : > { %v2175_v59 = vadd.f32 %v2174_v53, %v2144_v39  ;;  %v1781_v14 = vsel %vm2958_vm5, %v1685_v43, 0.0  ;;  %v565_v1 = vand.u32 15, %v487_v58  ;;  %v1004_v47 = vmul.f32 %v2682_v13, %v2918_v0  ;;  %v3053_v43 = vld [vmem:[#allocation2 + $0x52] sm:$0xff] }
  0x4b   : > { %v1813_v62 = vadd.f32 %v1781_v14, %v1749_v26  ;;  %v1812_v12 = vadd.f32 %v1748_v5, %v1684_v36  ;;  %v1005_v22 = vmul.f32 %v2682_v13, %v2906_v56  ;;  %v3017_v8 = vadd.f32 %v2704_v27, %v391_v23 }
  0x4c   : > { %vm3019_vm6 = vcmp.ge.s32.totalorder %v558_v63, 1  ;;  %v1104_v24 = vmul.f32 %v2689_v18, %v2731_v48  ;;  %v1105_v26 = vmul.f32 %v2689_v18, %v2734_v49  ;;  %v1204_v56 = vmul.f32 %v2914_v11, %v2692_v19 }
  0x4d   : > { %v1852_v4 = vadd.f32 %v2896_v40, %v1813_v62  ;;  %v1851_v25 = vadd.f32 %v2896_v40, %v1812_v12  ;;  %v1205_v0 = vmul.f32 %v2920_v7, %v2692_v19  ;;  %465 = vst [vmem:[#allocation2 + $0xb9] sm:$0xff] %v3017_v8  ;;  %vm3033_vm7 = vcmp.le.s32.totalorder %v565_v1, 14  ;;  %v3045_v7 = vld [vmem:[#allocation2 + $0x58] sm:$0xff] }
  0x4e   : > { %v1274_v48 = vmul.f32 %v2695_v20, %v2974_v42  ;;  %v1275_v29 = vmul.f32 %v2695_v20, %v2976_v61  ;;  %v1344_v49 = vmul.f32 %v2698_v21, %v2737_v50  ;;  %v1345_v34 = vmul.f32 %v2698_v21, %v2740_v51  ;;  %v3061_v62 = vld [vmem:[#allocation2 + $0x5a] sm:$0xff] }
  0x4f   : > { %v1884_v35 = vmax.f32 %v1852_v4, 0.0  ;;  %v1883_v11 = vmax.f32 %v1851_v25, 0.0  ;;  %v1414_v33 = vmul.f32 %v2986_v57, %v2801_v38  ;;  %v1415_v31 = vmul.f32 %v2988_v3, %v2801_v38 }
  0x50   : > { %v1306_v39 = vadd.f32 %v1274_v48, %v1004_v47  ;;  %v1307_v55 = vadd.f32 %v1275_v29, %v1005_v22  ;;  %v1376_v44 = vadd.f32 %v1344_v49, %v1104_v24  ;;  %v1377_v45 = vadd.f32 %v1345_v34, %v1105_v26  ;;  %v2550_v47 = vld [vmem:[%s2672_s9 + $0x58] sm:$0xff]  }
  0x51   : > { %v1916_v54 = vmin.f32 %v1884_v35, 6.0  ;;  %v1915_v52 = vmin.f32 %v1883_v11, 6.0  ;;  %v1446_v53 = vadd.f32 %v1414_v33, %v1204_v56  ;;  %v1447_v36 = vadd.f32 %v1415_v31, %v1205_v0 }
  0x52   : > { %v1484_v5 = vmul.f32 %v2845_v46, %v3043_v41  ;;  %v1485_v14 = vmul.f32 %v2845_v46, %v3045_v7  ;;  %v1554_v58 = vmul.f32 %v2852_v60, %v2761_v9  ;;  %v1555_v1 = vmul.f32 %v2852_v60, %v2764_v15 }
  0x53   : > { %v2146_v37 = vmul.f32 %v1916_v54, %v1916_v54  ;;  %v2473_v23 = vpack.c.bf16 %v1916_v54, %v1915_v52  ;;  %v2106_v63 = vadd.f32 %v2105_v30, %v1915_v52  ;;  %v2145_v12 = vmul.f32 %v1915_v52, %v1915_v52 }
  0x54   : > { %v1516_v22 = vadd.f32 %v1484_v5, %v1306_v39  ;;  %v1517_v4 = vadd.f32 %v1485_v14, %v1307_v55  ;;  %v1586_v24 = vadd.f32 %v1554_v58, %v1376_v44  ;;  %v1654_v25 = vmul.f32 %v2831_v6, %v3053_v43 }
  0x55   : > { %2556 = vst [vmem:[%s2939_s20 + $0x10] sm:$0xff] %v2473_v23   ;;  %v2107_v26 = vadd.f32 %v2106_v63, %v1916_v54  ;;  %v2176_v56 = vadd.f32 %v2175_v59, %v2145_v12  ;;  %v1587_v0 = vadd.f32 %v1555_v1, %v1377_v45  ;;  %v1655_v35 = vmul.f32 %v2831_v6, %v3061_v62 }
  0x56   : > { %v1686_v48 = vadd.f32 %v1654_v25, %v1446_v53  ;;  %v1718_v30 = vsel %vm3019_vm6, %v1516_v22, 0.0  ;;  %v2442_v29 = vunpack.c.l.bf16 %v2550_v47  ;;  %v2443_v49 = vunpack.c.h.bf16 %v2550_v47 }
  0x57   : > { %v2177_v11 = vadd.f32 %v2176_v56, %v2146_v37  ;;  %v1687_v34 = vadd.f32 %v1655_v35, %v1447_v36  ;;  %v1750_v33 = vadd.f32 %v1718_v30, %v1586_v24  ;;  %v1751_v31 = vadd.f32 %v1587_v0, %v1517_v4  ;;  %v3113_v4 = vld [vmem:[#allocation2 + $0x60] sm:$0xff]  ;;  %v3121_v56 = vld [vmem:[#allocation2 + $0x68] sm:$0xff] }
  0x58   : > { %v392_v39 = vmul.f32 %v2442_v29, %v2677_v10  ;;  %v393_v55 = vmul.f32 %v2443_v49, %v2677_v10  ;;  %v488_v59 = vadd.s32 64, %v2649_v2  ;;  %v489_v54 = vadd.s32 72, %v2649_v2 }
  0x59   : > { %v1783_v44 = vsel %vm3033_vm7, %v1687_v34, 0.0  ;;  %v1814_v52 = vadd.f32 %v1750_v33, %v1686_v48  ;;  %v1006_v32 = vmul.f32 %v2682_v13, %v2974_v42  ;;  %v1007_v45 = vmul.f32 %v2682_v13, %v2976_v61 }
  0x5a   : > { %v1815_v53 = vadd.f32 %v1783_v44, %v1751_v31  ;;  %v3084_v36 = vadd.f32 %v2704_v27, %v392_v39  ;;  %v3087_v37 = vadd.f32 %v2704_v27, %v393_v55  ;;  %v572_v5 = vand.u32 15, %v488_v59  ;;  %v3127_v59 = vld [vmem:[#allocation2 + $0x62] sm:$0xff] }
  0x5b   : > { %v1853_v14 = vadd.f32 %v2896_v40, %v1814_v52  ;;  %v579_v58 = vand.u32 15, %v489_v54  ;;  %v1106_v28 = vmul.f32 %v2689_v18, %v2737_v50  ;;  %v1107_v42 = vmul.f32 %v2689_v18, %v2740_v51  ;;  %v3129_v54 = vld [vmem:[#allocation2 + $0x6a] sm:$0xff] }
  0x5c   : > { %v1854_v23 = vadd.f32 %v2896_v40, %v1815_v53  ;;  %466 = vst [vmem:[#allocation2 + $0xc1] sm:$0xff] %v3084_v36  ;;  %467 = vst [vmem:[#allocation2 + $0xc9] sm:$0xff] %v3087_v37  ;;  %vm3097_vm8 = vcmp.ge.s32.totalorder %v572_v5, 1  ;;  %v1206_v63 = vmul.f32 %v2986_v57, %v2692_v19  ;;  %v1207_v12 = vmul.f32 %v2988_v3, %v2692_v19  ;;  %v2551_v53 = vld [vmem:[%s2672_s9 + $0x60] sm:$0xff]  }
  0x5d   : > { %v1885_v50 = vmax.f32 %v1853_v14, 0.0  ;;  %vm3105_vm9 = vcmp.le.s32.totalorder %v579_v58, 14  ;;  %v1276_v51 = vmul.f32 %v2695_v20, %v3043_v41  ;;  %v1277_v47 = vmul.f32 %v2695_v20, %v3045_v7 }
  0x5e   : > { %v1886_v22 = vmax.f32 %v1854_v23, 0.0  ;;  %v1346_v57 = vmul.f32 %v2698_v21, %v2761_v9  ;;  %v1347_v3 = vmul.f32 %v2698_v21, %v2764_v15  ;;  %v1416_v24 = vmul.f32 %v3053_v43, %v2801_v38 }
  0x5f   : > { %v1917_v25 = vmin.f32 %v1885_v50, 6.0  ;;  %v1308_v0 = vadd.f32 %v1276_v51, %v1006_v32  ;;  %v1309_v35 = vadd.f32 %v1277_v47, %v1007_v45  ;;  %v1417_v48 = vmul.f32 %v3061_v62, %v2801_v38 }
  0x60   : > { %v1918_v30 = vmin.f32 %v1886_v22, 6.0  ;;  %v1378_v29 = vadd.f32 %v1346_v57, %v1106_v28  ;;  %v1379_v49 = vadd.f32 %v1347_v3, %v1107_v42  ;;  %v1448_v34 = vadd.f32 %v1416_v24, %v1206_v63 }
  0x61   : > { %v2108_v33 = vadd.f32 %v2107_v26, %v1917_v25  ;;  %v2147_v31 = vmul.f32 %v1917_v25, %v1917_v25  ;;  %v1449_v39 = vadd.f32 %v1417_v48, %v1207_v12  ;;  %v1486_v55 = vmul.f32 %v2845_v46, %v3113_v4 }
  0x62   : > { %v2478_v44 = vpack.c.bf16 %v1918_v30, %v1917_v25  ;;  %v2148_v52 = vmul.f32 %v1918_v30, %v1918_v30  ;;  %v1487_v32 = vmul.f32 %v2845_v46, %v3121_v56  ;;  %v1556_v45 = vmul.f32 %v2852_v60, %v2767_v16 }
  0x63   : > { %v2109_v5 = vadd.f32 %v2108_v33, %v1918_v30  ;;  %v2178_v26 = vadd.f32 %v2177_v11, %v2147_v31  ;;  %v1518_v14 = vadd.f32 %v1486_v55, %v1308_v0  ;;  %v1557_v58 = vmul.f32 %v2852_v60, %v2770_v17 }
  0x64   : > { %2557 = vst [vmem:[%s2939_s20 + $0x18] sm:$0xff] %v2478_v44   ;;  %v1519_v28 = vadd.f32 %v1487_v32, %v1309_v35  ;;  %v1588_v42 = vadd.f32 %v1556_v45, %v1378_v29  ;;  %v1656_v23 = vmul.f32 %v2831_v6, %v3127_v59  ;;  %v1657_v63 = vmul.f32 %v2831_v6, %v3129_v54 }
  0x65   : > { %v2179_v12 = vadd.f32 %v2178_v26, %v2148_v52  ;;  %v1589_v50 = vadd.f32 %v1557_v58, %v1379_v49  ;;  %v1720_v51 = vsel %vm3097_vm8, %v1518_v14, 0.0  ;;  %v2446_v47 = vunpack.c.l.bf16 %v2551_v53 }
  0x66   : > { %v1688_v11 = vadd.f32 %v1656_v23, %v1448_v34  ;;  %v1689_v22 = vadd.f32 %v1657_v63, %v1449_v39  ;;  %v1752_v57 = vadd.f32 %v1720_v51, %v1588_v42  ;;  %v2447_v3 = vunpack.c.h.bf16 %v2551_v53  ;;  %v3189_v23 = vld [vmem:[#allocation2 + $0x70] sm:$0xff] }
  0x67   : > { %v1753_v24 = vadd.f32 %v1589_v50, %v1519_v28  ;;  %v394_v25 = vmul.f32 %v2446_v47, %v2677_v10  ;;  %v490_v0 = vadd.s32 80, %v2649_v2  ;;  %v491_v35 = vadd.s32 88, %v2649_v2 }
  0x68   : > { %v1785_v48 = vsel %vm3105_vm9, %v1689_v22, 0.0  ;;  %v1816_v30 = vadd.f32 %v1752_v57, %v1688_v11  ;;  %v395_v29 = vmul.f32 %v2447_v3, %v2677_v10  ;;  %v1008_v55 = vmul.f32 %v2682_v13, %v3043_v41 }
  0x69   : > { %v1817_v61 = vadd.f32 %v1785_v48, %v1753_v24  ;;  %v3152_v49 = vadd.f32 %v2704_v27, %v394_v25  ;;  %v586_v34 = vand.u32 15, %v490_v0  ;;  %v593_v33 = vand.u32 15, %v491_v35  ;;  %v3197_v0 = vld [vmem:[#allocation2 + $0x72] sm:$0xff]  ;;  %v3199_v35 = vld [vmem:[#allocation2 + $0x7a] sm:$0xff] }
  0x6a   : > { %v1855_v31 = vadd.f32 %v2896_v40, %v1816_v30  ;;  %v3156_v39 = vadd.f32 %v2704_v27, %v395_v29  ;;  %v1009_v1 = vmul.f32 %v2682_v13, %v3045_v7  ;;  %v1108_v32 = vmul.f32 %v2689_v18, %v2761_v9 }
  0x6b   : > { %v1856_v44 = vadd.f32 %v2896_v40, %v1817_v61  ;;  %468 = vst [vmem:[#allocation2 + $0xd1] sm:$0xff] %v3152_v49  ;;  %vm3164_vm10 = vcmp.ge.s32.totalorder %v586_v34, 1  ;;  %v1109_v45 = vmul.f32 %v2689_v18, %v2764_v15  ;;  %vm3173_vm11 = vcmp.le.s32.totalorder %v593_v33, 14  ;;  %v2552_v34 = vld [vmem:[%s2672_s9 + $0x68] sm:$0xff]  }
  0x6c   : > { %v1887_v53 = vmax.f32 %v1855_v31, 0.0  ;;  %469 = vst [vmem:[#allocation2 + $0xd9] sm:$0xff] %v3156_v39  ;;  %v1208_v7 = vmul.f32 %v3053_v43, %v2692_v19  ;;  %v1209_v26 = vmul.f32 %v3061_v62, %v2692_v19  ;;  %v1278_v14 = vmul.f32 %v2695_v20, %v3113_v4  ;;  %v3191_v43 = vld [vmem:[#allocation2 + $0x78] sm:$0xff] }
  0x6d   : > { %v1888_v9 = vmax.f32 %v1856_v44, 0.0  ;;  %v1279_v15 = vmul.f32 %v2695_v20, %v3121_v56  ;;  %v1348_v58 = vmul.f32 %v2698_v21, %v2767_v16  ;;  %v1349_v28 = vmul.f32 %v2698_v21, %v2770_v17 }
  0x6e   : > { %v1919_v42 = vmin.f32 %v1887_v53, 6.0  ;;  %v1310_v63 = vadd.f32 %v1278_v14, %v1008_v55  ;;  %v1418_v62 = vmul.f32 %v3127_v59, %v2801_v38  ;;  %v1419_v50 = vmul.f32 %v3129_v54, %v2801_v38 }
  0x6f   : > { %v1920_v51 = vmin.f32 %v1888_v9, 6.0  ;;  %v1311_v47 = vadd.f32 %v1279_v15, %v1009_v1  ;;  %v1380_v11 = vadd.f32 %v1348_v58, %v1108_v32  ;;  %v1381_v22 = vadd.f32 %v1349_v28, %v1109_v45  ;;  %v3932_v1 = vld [vmem:[#allocation4_spill] sm:$0xff] }
  0x70   : > { %v2110_v57 = vadd.f32 %v2109_v5, %v1919_v42  ;;  %v2149_v3 = vmul.f32 %v1919_v42, %v1919_v42  ;;  %v1450_v24 = vadd.f32 %v1418_v62, %v1208_v7  ;;  %v1451_v25 = vadd.f32 %v1419_v50, %v1209_v26  ;;  %v3931_v5 = vld [vmem:[#allocation3_spill] sm:$0xff] }
  0x71   : > { %v2483_v48 = vpack.c.bf16 %v1920_v51, %v1919_v42  ;;  %v2150_v30 = vmul.f32 %v1920_v51, %v1920_v51  ;;  %v1488_v29 = vmul.f32 %v2845_v46, %v3189_v23  ;;  %v1489_v61 = vmul.f32 %v2845_v46, %v3191_v43 }
  0x72   : > { %v3206_v33 = vadd.f32 %v2110_v57, %v1920_v51  ;;  %v2180_v31 = vadd.f32 %v2179_v12, %v2149_v3  ;;  %v1558_v55 = vmul.f32 %v2852_v60, %v3931_v5  ;;  %v1559_v44 = vmul.f32 %v2852_v60, %v3932_v1 }
  0x73   : > { %2558 = vst [vmem:[%s2939_s20 + $0x20] sm:$0xff] %v2483_v48   ;;  %v1520_v32 = vadd.f32 %v1488_v29, %v1310_v63  ;;  %v1521_v45 = vadd.f32 %v1489_v61, %v1311_v47  ;;  %v1658_v53 = vmul.f32 %v2831_v6, %v3197_v0  ;;  %v1659_v7 = vmul.f32 %v2831_v6, %v3199_v35 }
  0x74   : > { %v3217_v26 = vadd.f32 %v2180_v31, %v2150_v30  ;;  %v1590_v14 = vadd.f32 %v1558_v55, %v1380_v11  ;;  %v1591_v9 = vadd.f32 %v1559_v44, %v1381_v22  ;;  %v2450_v12 = vunpack.c.l.bf16 %v2552_v34 }
  0x75   : > { %v1690_v15 = vadd.f32 %v1658_v53, %v1450_v24  ;;  %v1691_v58 = vadd.f32 %v1659_v7, %v1451_v25  ;;  %v1722_v28 = vsel %vm3164_vm10, %v1520_v32, 0.0  ;;  %v2451_v42 = vunpack.c.h.bf16 %v2552_v34  ;;  %v3259_v32 = vld [vmem:[#allocation2 + $0x80] sm:$0xff] }
  0x76   : > { %v1754_v62 = vadd.f32 %v1722_v28, %v1590_v14  ;;  %v1755_v63 = vadd.f32 %v1591_v9, %v1521_v45  ;;  %v396_v50 = vmul.f32 %v2450_v12, %v2677_v10  ;;  %v492_v51 = vadd.s32 96, %v2649_v2  ;;  %v3271_v12 = vld [vmem:[#allocation2 + $0x88] sm:$0xff] }
  0x77   : > { %v1787_v47 = vsel %vm3173_vm11, %v1691_v58, 0.0  ;;  %v397_v57 = vmul.f32 %v2451_v42, %v2677_v10  ;;  %v493_v11 = vadd.s32 104, %v2649_v2  ;;  %v1010_v22 = vmul.f32 %v2682_v13, %v3113_v4 }
  0x78   : > { %v1818_v3 = vadd.f32 %v1754_v62, %v1690_v15  ;;  %v1819_v52 = vadd.f32 %v1787_v47, %v1755_v63  ;;  %v3230_v24 = vadd.f32 %v2704_v27, %v396_v50  ;;  %v600_v25 = vand.u32 15, %v492_v51  ;;  %v3275_v50 = vld [vmem:[#allocation2 + $0x82] sm:$0xff]  ;;  %v3277_v51 = vld [vmem:[#allocation2 + $0x8a] sm:$0xff] }
  0x79   : > { %v3233_v48 = vadd.f32 %v2704_v27, %v397_v57  ;;  %v607_v30 = vand.u32 15, %v493_v11  ;;  %v1011_v41 = vmul.f32 %v2682_v13, %v3121_v56  ;;  %v1110_v10 = vmul.f32 %v2689_v18, %v2767_v16  ;;  %v3315_v56 = vld [vmem:[%s3889_s2] ss:$0 sm:$0xff] }
  0x7a   : > { %v1857_v29 = vadd.f32 %v2896_v40, %v1818_v3  ;;  %v1858_v4 = vadd.f32 %v2896_v40, %v1819_v52  ;;  %470 = vst [vmem:[#allocation2 + $0xe1] sm:$0xff] %v3230_v24  ;;  %vm3242_vm12 = vcmp.ge.s32.totalorder %v600_v25, 1  ;;  %v1111_v27 = vmul.f32 %v2689_v18, %v2770_v17  ;;  %v3937_v25 = vld [vmem:[#allocation5_spill] sm:$0xff] }
  0x7b   : > { %471 = vst [vmem:[#allocation2 + $0xe9] sm:$0xff] %v3233_v48  ;;  %vm3249_vm13 = vcmp.le.s32.totalorder %v607_v30, 14  ;;  %v1210_v16 = vmul.f32 %v3127_v59, %v2692_v19  ;;  %v1211_v34 = vmul.f32 %v3129_v54, %v2692_v19  ;;  %v1280_v31 = vmul.f32 %v2695_v20, %v3189_v23 }
  0x7c   : > { %v1889_v55 = vmax.f32 %v1857_v29, 0.0  ;;  %v1890_v44 = vmax.f32 %v1858_v4, 0.0  ;;  %v1281_v17 = vmul.f32 %v2695_v20, %v3191_v43  ;;  %v1350_v45 = vmul.f32 %v2698_v21, %v3931_v5  ;;  %v2553_v29 = vld [vmem:[%s2672_s9 + $0x70] sm:$0xff]  }
  0x7d   : > { %v1312_v53 = vadd.f32 %v1280_v31, %v1010_v22  ;;  %v1351_v59 = vmul.f32 %v2698_v21, %v3932_v1  ;;  %v1420_v54 = vmul.f32 %v3197_v0, %v2801_v38  ;;  %v1421_v7 = vmul.f32 %v3199_v35, %v2801_v38 }
  0x7e   : > { %v1921_v14 = vmin.f32 %v1889_v55, 6.0  ;;  %v1922_v9 = vmin.f32 %v1890_v44, 6.0  ;;  %v1313_v15 = vadd.f32 %v1281_v17, %v1011_v41  ;;  %v1382_v58 = vadd.f32 %v1350_v45, %v1110_v10  ;;  %v3938_v41 = vld [vmem:[#allocation6_spill] sm:$0xff] }
  0x7f   : > { %v1383_v28 = vadd.f32 %v1351_v59, %v1111_v27  ;;  %v1452_v42 = vadd.f32 %v1420_v54, %v1210_v16  ;;  %v1453_v62 = vadd.f32 %v1421_v7, %v1211_v34  ;;  %v1490_v63 = vmul.f32 %v2845_v46, %v3259_v32 }
  0x80   : > { %v2488_v47 = vpack.c.bf16 %v1922_v9, %v1921_v14  ;;  %v2112_v57 = vadd.f32 %v3206_v33, %v1921_v14  ;;  %v2151_v11 = vmul.f32 %v1921_v14, %v1921_v14  ;;  %v2152_v22 = vmul.f32 %v1922_v9, %v1922_v9 }
  0x81   : > { %v1491_v3 = vmul.f32 %v2845_v46, %v3271_v12  ;;  %v1522_v52 = vadd.f32 %v1490_v63, %v1312_v53  ;;  %v1560_v30 = vmul.f32 %v2852_v60, %v3937_v25  ;;  %v1561_v10 = vmul.f32 %v2852_v60, %v3938_v41 }
  0x82   : > { %2559 = vst [vmem:[%s2939_s20 + $0x28] sm:$0xff] %v2488_v47   ;;  %v3288_v4 = vadd.f32 %v2112_v57, %v1922_v9  ;;  %v2182_v27 = vadd.f32 %v3217_v26, %v2151_v11  ;;  %v1660_v33 = vmul.f32 %v2831_v6, %v3275_v50  ;;  %v1661_v16 = vmul.f32 %v2831_v6, %v3277_v51 }
  0x83   : > { %v1523_v34 = vadd.f32 %v1491_v3, %v1313_v15  ;;  %v1592_v31 = vadd.f32 %v1560_v30, %v1382_v58  ;;  %v1593_v55 = vadd.f32 %v1561_v10, %v1383_v28  ;;  %v1724_v44 = vsel %vm3242_vm12, %v1522_v52, 0.0  ;;  %v3305_v15 = vld [vmem:[%s3888_s1] ss:$0 sm:$0xff] }
  0x84   : > { %v3297_v17 = vadd.f32 %v2182_v27, %v2152_v22  ;;  %v1692_v45 = vadd.f32 %v1660_v33, %v1452_v42  ;;  %v1693_v53 = vadd.f32 %v1661_v16, %v1453_v62  ;;  %v2454_v59 = vunpack.c.l.bf16 %v2553_v29 }
  0x85   : > { %v1756_v54 = vadd.f32 %v1724_v44, %v1592_v31  ;;  %v1757_v7 = vadd.f32 %v1593_v55, %v1523_v34  ;;  %v2455_v26 = vunpack.c.h.bf16 %v2553_v29  ;;  %v494_v14 = vadd.s32 112, %v2649_v2  ;;  %v3349_v55 = vld [vmem:[#allocation2 + $0x90] sm:$0xff] }
  0x86   : > { %v1789_v9 = vsel %vm3249_vm13, %v1693_v53, 0.0  ;;  %v398_v61 = vmul.f32 %v3305_v15, %v2454_v59  ;;  %v495_v58 = vadd.s32 120, %v2649_v2  ;;  %v1012_v28 = vmul.f32 %v2682_v13, %v3189_v23  ;;  %v3359_v59 = vld [vmem:[#allocation2 + $0x98] sm:$0xff] }
  0x87   : > { %v1820_v42 = vadd.f32 %v1756_v54, %v1692_v45  ;;  %v1821_v62 = vadd.f32 %v1789_v9, %v1757_v7  ;;  %v399_v63 = vmul.f32 %v3305_v15, %v2455_v26  ;;  %v614_v47 = vand.u32 15, %v494_v14  ;;  %v3361_v54 = vld [vmem:[#allocation2 + $0x91] sm:$0xff]  ;;  %v3363_v7 = vld [vmem:[#allocation2 + $0x99] sm:$0xff] }
  0x88   : > { %v3318_v57 = vadd.f32 %v3315_v56, %v398_v61  ;;  %v621_v11 = vand.u32 15, %v495_v58  ;;  %v1013_v22 = vmul.f32 %v2682_v13, %v3191_v43  ;;  %v1112_v23 = vmul.f32 %v2689_v18, %v3931_v5  ;;  %v3365_v58 = vld [vmem:[#allocation2 + $0x92] sm:$0xff] }
  0x89   : > { %v1859_v3 = vadd.f32 %v2896_v40, %v1820_v42  ;;  %v1860_v52 = vadd.f32 %v2896_v40, %v1821_v62  ;;  %v3327_v30 = vadd.f32 %v3315_v56, %v399_v63  ;;  %vm3329_vm14 = vcmp.ge.s32.totalorder %v614_v47, 1  ;;  %v3367_v42 = vld [vmem:[#allocation2 + $0x9a] sm:$0xff] }
  0x8a   : > { %472 = vst [vmem:[#allocation2 + $0xf1] sm:$0xff] %v3318_v57  ;;  %vm3334_vm15 = vcmp.le.s32.totalorder %v621_v11, 14  ;;  %v1113_v43 = vmul.f32 %v2689_v18, %v3932_v1  ;;  %v1212_v5 = vmul.f32 %v3197_v0, %v2692_v19  ;;  %v1213_v27 = vmul.f32 %v3199_v35, %v2692_v19 }
  0x8b   : > { %v1891_v33 = vmax.f32 %v1859_v3, 0.0  ;;  %v1892_v16 = vmax.f32 %v1860_v52, 0.0  ;;  %473 = vst [vmem:[#allocation2 + $0xf9] sm:$0xff] %v3327_v30  ;;  %v1282_v34 = vmul.f32 %v2695_v20, %v3259_v32  ;;  %v1283_v31 = vmul.f32 %v2695_v20, %v3271_v12  ;;  %v2554_v52 = vld [vmem:[%s2672_s9 + $0x78] sm:$0xff]  }
  0x8c   : > { %v1352_v1 = vmul.f32 %v2698_v21, %v3937_v25  ;;  %v1353_v0 = vmul.f32 %v2698_v21, %v3938_v41  ;;  %v1422_v35 = vmul.f32 %v3275_v50, %v2801_v38  ;;  %v1423_v44 = vmul.f32 %v3277_v51, %v2801_v38 }
  0x8d   : > { %v1923_v45 = vmin.f32 %v1891_v33, 6.0  ;;  %v1924_v53 = vmin.f32 %v1892_v16, 6.0  ;;  %v1314_v26 = vadd.f32 %v1282_v34, %v1012_v28  ;;  %v1315_v25 = vadd.f32 %v1283_v31, %v1013_v22 }
  0x8e   : > { %v1384_v14 = vadd.f32 %v1352_v1, %v1112_v23  ;;  %v1385_v41 = vadd.f32 %v1353_v0, %v1113_v43  ;;  %v1454_v9 = vadd.f32 %v1422_v35, %v1212_v5  ;;  %v1455_v61 = vadd.f32 %v1423_v44, %v1213_v27 }
  0x8f   : > { %v2493_v62 = vpack.c.bf16 %v1924_v53, %v1923_v45  ;;  %v2114_v63 = vadd.f32 %v3288_v4, %v1923_v45  ;;  %v2153_v47 = vmul.f32 %v1923_v45, %v1923_v45  ;;  %v2154_v11 = vmul.f32 %v1924_v53, %v1924_v53 }
  0x90   : > { %v1492_v3 = vmul.f32 %v2845_v46, %v3349_v55  ;;  %v1493_v28 = vmul.f32 %v2845_v46, %v3359_v59  ;;  %v1562_v22 = vmul.f32 %v2852_v60, %v3361_v54  ;;  %v1563_v23 = vmul.f32 %v2852_v60, %v3363_v7 }
  0x91   : > { %2560 = vst [vmem:[%s2939_s20 + $0x30] sm:$0xff] %v2493_v62   ;;  %v3380_v43 = vadd.f32 %v2114_v63, %v1924_v53  ;;  %v2184_v4 = vadd.f32 %v3297_v17, %v2153_v47  ;;  %v1662_v5 = vmul.f32 %v2831_v6, %v3365_v58  ;;  %v1663_v27 = vmul.f32 %v2831_v6, %v3367_v42 }
  0x92   : > { %v1524_v33 = vadd.f32 %v1492_v3, %v1314_v26  ;;  %v1525_v16 = vadd.f32 %v1493_v28, %v1315_v25  ;;  %v1594_v34 = vadd.f32 %v1562_v22, %v1384_v14  ;;  %v1595_v31 = vadd.f32 %v1563_v23, %v1385_v41  ;;  %v2581_v23 = vld [vmem:[#allocation2 + $0x81] sm:$0xff] }
  0x93   : > { %v3387_v1 = vadd.f32 %v2184_v4, %v2154_v11  ;;  %v1694_v0 = vadd.f32 %v1662_v5, %v1454_v9  ;;  %v1695_v35 = vadd.f32 %v1663_v27, %v1455_v61  ;;  %v2458_v44 = vunpack.c.l.bf16 %v2554_v52 }
  0x94   : > { %v1726_v45 = vsel %vm3329_vm14, %v1524_v33, 0.0  ;;  %v1759_v53 = vadd.f32 %v1595_v31, %v1525_v16  ;;  %v2459_v17 = vunpack.c.h.bf16 %v2554_v52  ;;  %v496_v62 = vadd.s32 128, %v2649_v2 }
  0x95   : > { %v1758_v63 = vadd.f32 %v1726_v45, %v1594_v34  ;;  %v1791_v6 = vsel %vm3334_vm15, %v1695_v35, 0.0  ;;  %v400_v26 = vmul.f32 %v3305_v15, %v2458_v44  ;;  %v497_v25 = vadd.s32 136, %v2649_v2  ;;  %v3429_v34 = vld [vmem:[#allocation2 + $0xa0] sm:$0xff] }
  0x96   : > { %v1823_v14 = vadd.f32 %v1791_v6, %v1759_v53  ;;  %v401_v41 = vmul.f32 %v3305_v15, %v2459_v17  ;;  %v628_v9 = vand.u32 15, %v496_v62  ;;  %v1014_v11 = vmul.f32 %v2682_v13, %v3259_v32  ;;  %v2582_v32 = vld [vmem:[#allocation2 + $0x89] sm:$0xff]  ;;  %v3439_v44 = vld [vmem:[#allocation2 + $0xa1] sm:$0xff] }
  0x97   : > { %v1822_v61 = vadd.f32 %v1758_v63, %v1694_v0  ;;  %v3398_v10 = vadd.f32 %v3315_v56, %v400_v26  ;;  %v635_v47 = vand.u32 15, %v497_v25  ;;  %v1015_v15 = vmul.f32 %v2682_v13, %v3271_v12  ;;  %v3443_v63 = vld [vmem:[#allocation2 + $0xa9] sm:$0xff] }
  0x98   : > { %v1862_v3 = vadd.f32 %v2896_v40, %v1823_v14  ;;  %v3404_v29 = vadd.f32 %v3315_v56, %v401_v41  ;;  %vm3406_vm0 = vcmp.ge.s32.totalorder %v628_v9, 1  ;;  %v1114_v52 = vmul.f32 %v2581_v23, %v2689_v18  ;;  %v3445_v14 = vld [vmem:[#allocation2 + $0xa2] sm:$0xff] }
  0x99   : > { %v1861_v22 = vadd.f32 %v2896_v40, %v1822_v61  ;;  %474 = vst [vmem:[#allocation2 + $0x101] sm:$0xff] %v3398_v10  ;;  %v1115_v4 = vmul.f32 %v2582_v32, %v2689_v18  ;;  %v1214_v56 = vmul.f32 %v3275_v50, %v2692_v19  ;;  %vm3419_vm1 = vcmp.le.s32.totalorder %v635_v47, 14  ;;  %v3431_v50 = vld [vmem:[#allocation2 + $0xa8] sm:$0xff] }
  0x9a   : > { %v1894_v5 = vmax.f32 %v1862_v3, 0.0  ;;  %475 = vst [vmem:[#allocation2 + $0x109] sm:$0xff] %v3404_v29  ;;  %v1215_v40 = vmul.f32 %v3277_v51, %v2692_v19  ;;  %v1284_v12 = vmul.f32 %v2695_v20, %v3349_v55  ;;  %v1285_v33 = vmul.f32 %v2695_v20, %v3359_v59 }
  0x9b   : > { %v1893_v16 = vmax.f32 %v1861_v22, 0.0  ;;  %v1354_v31 = vmul.f32 %v2698_v21, %v3361_v54  ;;  %v1355_v0 = vmul.f32 %v2698_v21, %v3363_v7  ;;  %v1424_v51 = vmul.f32 %v3365_v58, %v2801_v38 }
  0x9c   : > { %v1926_v35 = vmin.f32 %v1894_v5, 6.0  ;;  %v1316_v45 = vadd.f32 %v1284_v12, %v1014_v11  ;;  %v1317_v53 = vadd.f32 %v1285_v33, %v1015_v15  ;;  %v1425_v17 = vmul.f32 %v3367_v42, %v2801_v38  ;;  %v3451_v11 = vld [vmem:[#allocation2 + $0xaa] sm:$0xff] }
  0x9d   : > { %v1925_v62 = vmin.f32 %v1893_v16, 6.0  ;;  %v1386_v6 = vadd.f32 %v1354_v31, %v1114_v52  ;;  %v1387_v26 = vadd.f32 %v1355_v0, %v1115_v4  ;;  %v1456_v25 = vadd.f32 %v1424_v51, %v1214_v56  ;;  %v3461_v56 = vld [vmem:[%s3890_s3 + $0x8] ss:$0 sm:$0xff] }
  0x9e   : > { %v2156_v41 = vmul.f32 %v1926_v35, %v1926_v35  ;;  %v1457_v9 = vadd.f32 %v1425_v17, %v1215_v40  ;;  %v1494_v61 = vmul.f32 %v2845_v46, %v3429_v34  ;;  %v1495_v47 = vmul.f32 %v2845_v46, %v3431_v50 }
  0x9f   : > { %v2498_v3 = vpack.c.bf16 %v1926_v35, %v1925_v62  ;;  %v2116_v15 = vadd.f32 %v3380_v43, %v1925_v62  ;;  %v2155_v22 = vmul.f32 %v1925_v62, %v1925_v62  ;;  %v1564_v23 = vmul.f32 %v2852_v60, %v3439_v44 }
  0xa0   : > { %v1526_v52 = vadd.f32 %v1494_v61, %v1316_v45  ;;  %v1527_v32 = vadd.f32 %v1495_v47, %v1317_v53  ;;  %v1565_v4 = vmul.f32 %v2852_v60, %v3443_v63  ;;  %v1664_v5 = vmul.f32 %v3461_v56, %v3445_v14 }
  0xa1   : > { %2561 = vst [vmem:[%s2939_s20 + $0x38] sm:$0xff] %v2498_v3   ;;  %v2117_v40 = vadd.f32 %v2116_v15, %v1926_v35  ;;  %v2186_v43 = vadd.f32 %v3387_v1, %v2155_v22  ;;  %v1596_v12 = vadd.f32 %v1564_v23, %v1386_v6  ;;  %v1665_v33 = vmul.f32 %v3461_v56, %v3451_v11  ;;  %v3504_v23 = vld [vmem:[#allocation2 + $0xb0] sm:$0xff] }
  0xa2   : > { %v1597_v16 = vadd.f32 %v1565_v4, %v1387_v26  ;;  %v1696_v31 = vadd.f32 %v1664_v5, %v1456_v25  ;;  %v1728_v0 = vsel %vm3406_vm0, %v1526_v52, 0.0  ;;  %v498_v51 = vadd.s32 144, %v2649_v2  ;;  %v3512_v4 = vld [vmem:[#allocation2 + $0xb8] sm:$0xff] }
  0xa3   : > { %v2187_v45 = vadd.f32 %v2186_v43, %v2156_v41  ;;  %v1697_v53 = vadd.f32 %v1665_v33, %v1457_v9  ;;  %v1760_v17 = vadd.f32 %v1728_v0, %v1596_v12  ;;  %v499_v62 = vadd.s32 152, %v2649_v2  ;;  %v3514_v5 = vld [vmem:[#allocation2 + $0xb1] sm:$0xff] }
  0xa4   : > { %v1761_v61 = vadd.f32 %v1597_v16, %v1527_v32  ;;  %v642_v35 = vand.u32 15, %v498_v51  ;;  %v1016_v1 = vmul.f32 %v2682_v13, %v3349_v55  ;;  %v1017_v28 = vmul.f32 %v2682_v13, %v3359_v59  ;;  %v3490_v55 = vld [vmem:[%s3891_s4] ss:$0 sm:$0xff] }
  0xa5   : > { %v1793_v6 = vsel %vm3419_vm1, %v1697_v53, 0.0  ;;  %v1824_v26 = vadd.f32 %v1760_v17, %v1696_v31  ;;  %v649_v25 = vand.u32 15, %v499_v62  ;;  %v1116_v9 = vmul.f32 %v2689_v18, %v3361_v54  ;;  %v3520_v53 = vld [vmem:[#allocation2 + $0xb2] sm:$0xff] }
  0xa6   : > { %v1825_v47 = vadd.f32 %v1793_v6, %v1761_v61  ;;  %vm3479_vm2 = vcmp.ge.s32.totalorder %v642_v35, 1  ;;  %v1117_v3 = vmul.f32 %v2689_v18, %v3363_v7  ;;  %v1216_v59 = vmul.f32 %v3365_v58, %v2692_v19 }
  0xa7   : > { %v1863_v27 = vadd.f32 %v3490_v55, %v1824_v26  ;;  %v1217_v15 = vmul.f32 %v3367_v42, %v2692_v19  ;;  %v1286_v22 = vmul.f32 %v2695_v20, %v3429_v34  ;;  %vm3500_vm3 = vcmp.le.s32.totalorder %v649_v25, 14 }
  0xa8   : > { %v1864_v54 = vadd.f32 %v3490_v55, %v1825_v47  ;;  %v1287_v52 = vmul.f32 %v2695_v20, %v3431_v50  ;;  %v1356_v58 = vmul.f32 %v2698_v21, %v3439_v44  ;;  %v1357_v42 = vmul.f32 %v2698_v21, %v3443_v63 }
  0xa9   : > { %v1895_v32 = vmax.f32 %v1863_v27, 0.0  ;;  %v1318_v43 = vadd.f32 %v1286_v22, %v1016_v1  ;;  %v1426_v12 = vmul.f32 %v3445_v14, %v2801_v38  ;;  %v1427_v33 = vmul.f32 %v3451_v11, %v2801_v38 }
  0xaa   : > { %v1896_v16 = vmax.f32 %v1864_v54, 0.0  ;;  %v1319_v31 = vadd.f32 %v1287_v52, %v1017_v28  ;;  %v1388_v0 = vadd.f32 %v1356_v58, %v1116_v9  ;;  %v1389_v51 = vadd.f32 %v1357_v42, %v1117_v3  ;;  %v3530_v28 = vld [vmem:[#allocation2 + $0xba] sm:$0xff] }
  0xab   : > { %v1927_v17 = vmin.f32 %v1895_v32, 6.0  ;;  %v1458_v62 = vadd.f32 %v1426_v12, %v1216_v59  ;;  %v1459_v61 = vadd.f32 %v1427_v33, %v1217_v15  ;;  %v1496_v35 = vmul.f32 %v2845_v46, %v3504_v23 }
  0xac   : > { %v1928_v6 = vmin.f32 %v1896_v16, 6.0  ;;  %v1497_v1 = vmul.f32 %v2845_v46, %v3512_v4  ;;  %v1566_v26 = vmul.f32 %v2852_v60, %v3514_v5  ;;  %v1567_v25 = vmul.f32 %v2852_v60, %v3017_v8 }
  0xad   : > { %v2118_v47 = vadd.f32 %v2117_v40, %v1927_v17  ;;  %v2157_v9 = vmul.f32 %v1927_v17, %v1927_v17  ;;  %v1528_v3 = vadd.f32 %v1496_v35, %v1318_v43  ;;  %v1666_v27 = vmul.f32 %v3461_v56, %v3520_v53 }
  0xae   : > { %v2503_v59 = vpack.c.bf16 %v1928_v6, %v1927_v17  ;;  %v2158_v15 = vmul.f32 %v1928_v6, %v1928_v6  ;;  %v1529_v22 = vadd.f32 %v1497_v1, %v1319_v31  ;;  %v1598_v54 = vadd.f32 %v1566_v26, %v1388_v0 }
  0xaf   : > { %v2119_v52 = vadd.f32 %v2118_v47, %v1928_v6  ;;  %v2188_v58 = vadd.f32 %v2187_v45, %v2157_v9  ;;  %v1599_v42 = vadd.f32 %v1567_v25, %v1389_v51  ;;  %v1667_v32 = vmul.f32 %v3461_v56, %v3530_v28 }
  0xb0   : > { %2562 = vst [vmem:[%s2939_s20 + $0x40] sm:$0xff] %v2503_v59   ;;  %v1698_v12 = vadd.f32 %v1666_v27, %v1458_v62  ;;  %v1730_v40 = vsel %vm3479_vm2, %v1528_v3, 0.0  ;;  %v500_v43 = vadd.s32 160, %v2649_v2  ;;  %v501_v33 = vadd.s32 168, %v2649_v2  ;;  %v3565_v3 = vld [vmem:[#allocation2 + $0xc0] sm:$0xff]  ;;  %v3567_v27 = vld [vmem:[#allocation2 + $0xc8] sm:$0xff] }
  0xb1   : > { %v2189_v16 = vadd.f32 %v2188_v58, %v2158_v15  ;;  %v1699_v17 = vadd.f32 %v1667_v32, %v1459_v61  ;;  %v1762_v35 = vadd.f32 %v1730_v40, %v1598_v54  ;;  %v1763_v31 = vadd.f32 %v1599_v42, %v1529_v22  ;;  %v3577_v58 = vld [vmem:[#allocation2 + $0xc2] sm:$0xff] }
  0xb2   : > { %v656_v0 = vand.u32 15, %v500_v43  ;;  %v663_v6 = vand.u32 15, %v501_v33  ;;  %v1018_v45 = vmul.f32 %v2682_v13, %v3429_v34  ;;  %v1019_v41 = vmul.f32 %v2682_v13, %v3431_v50 }
  0xb3   : > { %v1795_v51 = vsel %vm3500_vm3, %v1699_v17, 0.0  ;;  %v1826_v62 = vadd.f32 %v1762_v35, %v1698_v12  ;;  %v1118_v1 = vmul.f32 %v2689_v18, %v3439_v44  ;;  %v1119_v25 = vmul.f32 %v2689_v18, %v3443_v63 }
  0xb4   : > { %v1827_v26 = vadd.f32 %v1795_v51, %v1763_v31  ;;  %vm3549_vm4 = vcmp.ge.s32.totalorder %v656_v0, 1  ;;  %v1218_v34 = vmul.f32 %v3445_v14, %v2692_v19  ;;  %v1219_v47 = vmul.f32 %v3451_v11, %v2692_v19 }
  0xb5   : > { %v1865_v7 = vadd.f32 %v3490_v55, %v1826_v62  ;;  %v1288_v50 = vmul.f32 %v2695_v20, %v3504_v23  ;;  %v1289_v44 = vmul.f32 %v2695_v20, %v3512_v4  ;;  %v1358_v63 = vmul.f32 %v2698_v21, %v3514_v5 }
  0xb6   : > { %v1866_v9 = vadd.f32 %v3490_v55, %v1827_v26  ;;  %v1359_v14 = vmul.f32 %v2698_v21, %v3017_v8  ;;  %v1428_v11 = vmul.f32 %v3520_v53, %v2801_v38  ;;  %v1429_v54 = vmul.f32 %v3530_v28, %v2801_v38 }
  0xb7   : > { %v1897_v59 = vmax.f32 %v1865_v7, 0.0  ;;  %v1320_v15 = vadd.f32 %v1288_v50, %v1018_v45  ;;  %v1321_v22 = vadd.f32 %v1289_v44, %v1019_v41  ;;  %v1390_v32 = vadd.f32 %v1358_v63, %v1118_v1  ;;  %v3587_v45 = vld [vmem:[#allocation2 + $0xca] sm:$0xff] }
  0xb8   : > { %v1898_v42 = vmax.f32 %v1866_v9, 0.0  ;;  %v1391_v12 = vadd.f32 %v1359_v14, %v1119_v25  ;;  %v1460_v40 = vadd.f32 %v1428_v11, %v1218_v34  ;;  %v1461_v33 = vadd.f32 %v1429_v54, %v1219_v47 }
  0xb9   : > { %v1929_v43 = vmin.f32 %v1897_v59, 6.0  ;;  %v1498_v8 = vmul.f32 %v2845_v46, %v3565_v3  ;;  %v1499_v17 = vmul.f32 %v2845_v46, %v3567_v27  ;;  %v1568_v31 = vmul.f32 %v2852_v60, %v3084_v36 }
  0xba   : > { %v1930_v35 = vmin.f32 %v1898_v42, 6.0  ;;  %v1569_v0 = vmul.f32 %v2852_v60, %v3087_v37  ;;  %v1668_v51 = vmul.f32 %v3461_v56, %v3577_v58  ;;  %vm3591_vm5 = vcmp.le.s32.totalorder %v663_v6, 14 }
  0xbb   : > { %v2120_v62 = vadd.f32 %v2119_v52, %v1929_v43  ;;  %v2159_v41 = vmul.f32 %v1929_v43, %v1929_v43  ;;  %v1530_v1 = vadd.f32 %v1498_v8, %v1320_v15  ;;  %v1531_v26 = vadd.f32 %v1499_v17, %v1321_v22  ;;  %v2585_v8 = vld [vmem:[#allocation2 + $0xb9] sm:$0xff] }
  0xbc   : > { %v2508_v25 = vpack.c.bf16 %v1930_v35, %v1929_v43  ;;  %v1600_v7 = vadd.f32 %v1568_v31, %v1390_v32  ;;  %v1601_v47 = vadd.f32 %v1569_v0, %v1391_v12  ;;  %v2160_v50 = vmul.f32 %v1930_v35, %v1930_v35 }
  0xbd   : > { %v2190_v44 = vadd.f32 %v2189_v16, %v2159_v41  ;;  %v1669_v9 = vmul.f32 %v3461_v56, %v3587_v45  ;;  %v1700_v63 = vadd.f32 %v1668_v51, %v1460_v40  ;;  %v1732_v52 = vsel %vm3549_vm4, %v1530_v1, 0.0  ;;  %v3627_v41 = vld [vmem:[#allocation2 + $0xd0] sm:$0xff]  ;;  %v3629_v1 = vld [vmem:[#allocation2 + $0xd8] sm:$0xff] }
  0xbe   : > { %2563 = vst [vmem:[%s2939_s20 + $0x48] sm:$0xff] %v2508_v25   ;;  %v1765_v14 = vadd.f32 %v1601_v47, %v1531_v26  ;;  %v502_v11 = vadd.s32 176, %v2649_v2  ;;  %v503_v6 = vadd.s32 184, %v2649_v2  ;;  %v2121_v59 = vadd.f32 %v2120_v62, %v1930_v35 }
  0xbf   : > { %v2191_v15 = vadd.f32 %v2190_v44, %v2160_v50  ;;  %v1701_v22 = vadd.f32 %v1669_v9, %v1461_v33  ;;  %v1764_v54 = vadd.f32 %v1732_v52, %v1600_v7  ;;  %v1020_v16 = vmul.f32 %v2682_v13, %v3504_v23  ;;  %v3639_v50 = vld [vmem:[#allocation2 + $0xda] sm:$0xff] }
  0xc0   : > { %v670_v42 = vand.u32 15, %v502_v11  ;;  %v677_v32 = vand.u32 15, %v503_v6  ;;  %v1021_v12 = vmul.f32 %v2682_v13, %v3512_v4  ;;  %v1120_v43 = vmul.f32 %v2689_v18, %v3514_v5 }
  0xc1   : > { %v1797_v61 = vsel %vm3591_vm5, %v1701_v22, 0.0  ;;  %v1828_v40 = vadd.f32 %v1764_v54, %v1700_v63  ;;  %v1121_v17 = vmul.f32 %v2585_v8, %v2689_v18  ;;  %v1220_v23 = vmul.f32 %v3520_v53, %v2692_v19 }
  0xc2   : > { %v1829_v33 = vadd.f32 %v1797_v61, %v1765_v14  ;;  %vm3611_vm6 = vcmp.ge.s32.totalorder %v670_v42, 1  ;;  %v1221_v4 = vmul.f32 %v3530_v28, %v2692_v19  ;;  %v1290_v0 = vmul.f32 %v2695_v20, %v3565_v3 }
  0xc3   : > { %v1867_v31 = vadd.f32 %v3490_v55, %v1828_v40  ;;  %v1291_v5 = vmul.f32 %v2695_v20, %v3567_v27  ;;  %v1360_v51 = vmul.f32 %v2698_v21, %v3084_v36  ;;  %v1361_v53 = vmul.f32 %v2698_v21, %v3087_v37  ;;  %v3637_v36 = vld [vmem:[#allocation2 + $0xd2] sm:$0xff] }
  0xc4   : > { %v1868_v62 = vadd.f32 %v3490_v55, %v1829_v33  ;;  %v1430_v28 = vmul.f32 %v3577_v58, %v2801_v38  ;;  %v1431_v26 = vmul.f32 %v3587_v45, %v2801_v38  ;;  %v1322_v34 = vadd.f32 %v1290_v0, %v1020_v16 }
  0xc5   : > { %v1899_v25 = vmax.f32 %v1867_v31, 0.0  ;;  %v1323_v7 = vadd.f32 %v1291_v5, %v1021_v12  ;;  %v1392_v47 = vadd.f32 %v1360_v51, %v1120_v43  ;;  %v1393_v9 = vadd.f32 %v1361_v53, %v1121_v17 }
  0xc6   : > { %v1900_v44 = vmax.f32 %v1868_v62, 0.0  ;;  %v1462_v63 = vadd.f32 %v1430_v28, %v1220_v23  ;;  %v1463_v52 = vadd.f32 %v1431_v26, %v1221_v4  ;;  %v1500_v37 = vmul.f32 %v2845_v46, %v3627_v41 }
  0xc7   : > { %v1931_v14 = vmin.f32 %v1899_v25, 6.0  ;;  %v1501_v11 = vmul.f32 %v2845_v46, %v3629_v1  ;;  %v1570_v6 = vmul.f32 %v2852_v60, %v3152_v49  ;;  %v1571_v54 = vmul.f32 %v2852_v60, %v3156_v39 }
  0xc8   : > { %v1932_v22 = vmin.f32 %v1900_v44, 6.0  ;;  %v1670_v42 = vmul.f32 %v3461_v56, %v3637_v36  ;;  %v1671_v16 = vmul.f32 %v3461_v56, %v3639_v50  ;;  %v1532_v40 = vadd.f32 %v1500_v37, %v1322_v34 }
  0xc9   : > { %v2122_v12 = vadd.f32 %v2121_v59, %v1931_v14  ;;  %v2161_v61 = vmul.f32 %v1931_v14, %v1931_v14  ;;  %v1533_v43 = vadd.f32 %v1501_v11, %v1323_v7  ;;  %vm3653_vm7 = vcmp.le.s32.totalorder %v677_v32, 14 }
  0xca   : > { %v2513_v8 = vpack.c.bf16 %v1932_v22, %v1931_v14  ;;  %v1602_v33 = vadd.f32 %v1570_v6, %v1392_v47  ;;  %v1603_v23 = vadd.f32 %v1571_v54, %v1393_v9  ;;  %v2162_v4 = vmul.f32 %v1932_v22, %v1932_v22  ;;  %v2586_v9 = vld [vmem:[#allocation2 + $0xc1] sm:$0xff] }
  0xcb   : > { %v2192_v31 = vadd.f32 %v2191_v15, %v2161_v61  ;;  %v1702_v0 = vadd.f32 %v1670_v42, %v1462_v63  ;;  %v1703_v5 = vadd.f32 %v1671_v16, %v1463_v52  ;;  %v1734_v51 = vsel %vm3611_vm6, %v1532_v40, 0.0  ;;  %v2587_v52 = vld [vmem:[#allocation2 + $0xc9] sm:$0xff] }
  0xcc   : > { %2564 = vst [vmem:[%s2939_s20 + $0x50] sm:$0xff] %v2513_v8   ;;  %v1767_v62 = vadd.f32 %v1603_v23, %v1533_v43  ;;  %v504_v59 = vadd.s32 192, %v2649_v2  ;;  %v505_v53 = vadd.s32 200, %v2649_v2  ;;  %v2123_v28 = vadd.f32 %v2122_v12, %v1932_v22  ;;  %v3686_v12 = vld [vmem:[#allocation2 + $0xe0] sm:$0xff]  ;;  %v3688_v61 = vld [vmem:[#allocation2 + $0xe8] sm:$0xff] }
  0xcd   : > { %v2193_v32 = vadd.f32 %v2192_v31, %v2162_v4  ;;  %v1766_v26 = vadd.f32 %v1734_v51, %v1602_v33  ;;  %v1799_v25 = vsel %vm3653_vm7, %v1703_v5, 0.0  ;;  %v1022_v47 = vmul.f32 %v2682_v13, %v3565_v3  ;;  %v3696_v23 = vld [vmem:[#allocation2 + $0xe2] sm:$0xff]  ;;  %v3698_v4 = vld [vmem:[#allocation2 + $0xea] sm:$0xff] }
  0xce   : > { %v1831_v34 = vadd.f32 %v1799_v25, %v1767_v62  ;;  %v684_v7 = vand.u32 15, %v504_v59  ;;  %v691_v15 = vand.u32 15, %v505_v53  ;;  %v1023_v35 = vmul.f32 %v2682_v13, %v3567_v27 }
  0xcf   : > { %v1830_v44 = vadd.f32 %v1766_v26, %v1702_v0  ;;  %v1122_v63 = vmul.f32 %v2586_v9, %v2689_v18  ;;  %v1123_v14 = vmul.f32 %v2587_v52, %v2689_v18  ;;  %v1222_v6 = vmul.f32 %v3577_v58, %v2692_v19 }
  0xd0   : > { %v1870_v37 = vadd.f32 %v3490_v55, %v1831_v34  ;;  %vm3671_vm8 = vcmp.ge.s32.totalorder %v684_v7, 1  ;;  %v1223_v3 = vmul.f32 %v3587_v45, %v2692_v19  ;;  %v1292_v22 = vmul.f32 %v2695_v20, %v3627_v41 }
  0xd1   : > { %v1869_v27 = vadd.f32 %v3490_v55, %v1830_v44  ;;  %v1293_v54 = vmul.f32 %v2695_v20, %v3629_v1  ;;  %v1362_v42 = vmul.f32 %v2698_v21, %v3152_v49  ;;  %v1363_v58 = vmul.f32 %v2698_v21, %v3156_v39 }
  0xd2   : > { %v1902_v16 = vmax.f32 %v1870_v37, 0.0  ;;  %v1432_v45 = vmul.f32 %v3637_v36, %v2801_v38  ;;  %v1433_v40 = vmul.f32 %v3639_v50, %v2801_v38  ;;  %v1324_v8 = vadd.f32 %v1292_v22, %v1022_v47 }
  0xd3   : > { %v1901_v43 = vmax.f32 %v1869_v27, 0.0  ;;  %v1325_v17 = vadd.f32 %v1293_v54, %v1023_v35  ;;  %v1394_v33 = vadd.f32 %v1362_v42, %v1122_v63  ;;  %v1395_v0 = vadd.f32 %v1363_v58, %v1123_v14 }
  0xd4   : > { %v1934_v31 = vmin.f32 %v1902_v16, 6.0  ;;  %v1464_v5 = vadd.f32 %v1432_v45, %v1222_v6  ;;  %v1465_v51 = vadd.f32 %v1433_v40, %v1223_v3  ;;  %v1502_v59 = vmul.f32 %v2845_v46, %v3686_v12 }
  0xd5   : > { %v1933_v62 = vmin.f32 %v1901_v43, 6.0  ;;  %v1503_v53 = vmul.f32 %v2845_v46, %v3688_v61  ;;  %v1572_v26 = vmul.f32 %v2852_v60, %v3230_v24  ;;  %vm3706_vm9 = vcmp.le.s32.totalorder %v691_v15, 14 }
  0xd6   : > { %v1573_v34 = vmul.f32 %v2852_v60, %v3233_v48  ;;  %v1672_v7 = vmul.f32 %v3461_v56, %v3696_v23  ;;  %v1673_v47 = vmul.f32 %v3461_v56, %v3698_v4  ;;  %v1534_v63 = vadd.f32 %v1502_v59, %v1324_v8 }
  0xd7   : > { %v2518_v44 = vpack.c.bf16 %v1934_v31, %v1933_v62  ;;  %v2124_v35 = vadd.f32 %v2123_v28, %v1933_v62  ;;  %v2163_v9 = vmul.f32 %v1933_v62, %v1933_v62  ;;  %v1535_v52 = vadd.f32 %v1503_v53, %v1325_v17 }
  0xd8   : > { %v1604_v14 = vadd.f32 %v1572_v26, %v1394_v33  ;;  %v1605_v37 = vadd.f32 %v1573_v34, %v1395_v0  ;;  %v1704_v15 = vadd.f32 %v1672_v7, %v1464_v5  ;;  %v1705_v3 = vadd.f32 %v1673_v47, %v1465_v51  ;;  %v3745_v26 = vld [vmem:[#allocation2 + $0xf0] sm:$0xff] }
  0xd9   : > { %2565 = vst [vmem:[%s2939_s20 + $0x58] sm:$0xff] %v2518_v44   ;;  %v2194_v6 = vadd.f32 %v2193_v32, %v2163_v9  ;;  %v1736_v27 = vsel %vm3671_vm8, %v1534_v63, 0.0  ;;  %v2164_v22 = vmul.f32 %v1934_v31, %v1934_v31  ;;  %v506_v16 = vadd.s32 208, %v2649_v2 }
  0xda   : > { %v1768_v54 = vadd.f32 %v1736_v27, %v1604_v14  ;;  %v1769_v42 = vadd.f32 %v1605_v37, %v1535_v52  ;;  %v2125_v58 = vadd.f32 %v2124_v35, %v1934_v31  ;;  %v1801_v28 = vsel %vm3706_vm9, %v1705_v3, 0.0  ;;  %v3767_v3 = vld [vmem:[#allocation2 + $0xf2] sm:$0xff]  ;;  %v3769_v27 = vld [vmem:[#allocation2 + $0xfa] sm:$0xff]  ;;  %v1263_v52 = vld [vmem:[#allocation2 + $0x108] sm:$0xff] }
  0xdb   : > { %v507_v45 = vadd.s32 216, %v2649_v2  ;;  %v2195_v40 = vadd.f32 %v2194_v6, %v2164_v22  ;;  %v1024_v32 = vmul.f32 %v2682_v13, %v3627_v41  ;;  %v698_v17 = vand.u32 15, %v506_v16 }
  0xdc   : > { %v1832_v43 = vadd.f32 %v1768_v54, %v1704_v15  ;;  %v1833_v8 = vadd.f32 %v1801_v28, %v1769_v42  ;;  %v1025_v11 = vmul.f32 %v2682_v13, %v3629_v1  ;;  %v1124_v33 = vmul.f32 %v2689_v18, %v3152_v49 }
  0xdd   : > { %v1125_v31 = vmul.f32 %v2689_v18, %v3156_v39  ;;  %v1224_v51 = vmul.f32 %v3637_v36, %v2692_v19  ;;  %v1225_v41 = vmul.f32 %v3639_v50, %v2692_v19  ;;  %v1294_v62 = vmul.f32 %v2695_v20, %v3686_v12  ;;  %v3747_v36 = vld [vmem:[#allocation2 + $0xf8] sm:$0xff] }
  0xde   : > { %v1871_v0 = vadd.f32 %v3490_v55, %v1832_v43  ;;  %v1872_v5 = vadd.f32 %v3490_v55, %v1833_v8  ;;  %v1295_v1 = vmul.f32 %v2695_v20, %v3688_v61  ;;  %v1364_v49 = vmul.f32 %v2698_v21, %v3230_v24 }
  0xdf   : > { %v1365_v39 = vmul.f32 %v2698_v21, %v3233_v48  ;;  %v1434_v50 = vmul.f32 %v3696_v23, %v2801_v38  ;;  %v1435_v25 = vmul.f32 %v3698_v4, %v2801_v38  ;;  %v1326_v34 = vadd.f32 %v1294_v62, %v1024_v32 }
  0xe0   : > { %v1903_v59 = vmax.f32 %v1871_v0, 0.0  ;;  %v1904_v53 = vmax.f32 %v1872_v5, 0.0  ;;  %v1327_v7 = vadd.f32 %v1295_v1, %v1025_v11  ;;  %v1396_v47 = vadd.f32 %v1364_v49, %v1124_v33 }
  0xe1   : > { %v1397_v44 = vadd.f32 %v1365_v39, %v1125_v31  ;;  %v705_v63 = vand.u32 15, %v507_v45  ;;  %vm3755_vm10 = vcmp.ge.s32.totalorder %v698_v17, 1  ;;  %v1504_v14 = vmul.f32 %v2845_v46, %v3745_v26 }
  0xe2   : > { %v1935_v35 = vmin.f32 %v1903_v59, 6.0  ;;  %v3753_v9 = vmin.f32 %v1904_v53, 6.0  ;;  %v1505_v37 = vmul.f32 %v2845_v46, %v3747_v36  ;;  %v1574_v15 = vmul.f32 %v2852_v60, %v3318_v57 }
  0xe3   : > { %v1575_v6 = vmul.f32 %v2852_v60, %v3327_v30  ;;  %v1466_v42 = vadd.f32 %v1434_v50, %v1224_v51  ;;  %v1467_v16 = vadd.f32 %v1435_v25, %v1225_v41  ;;  %v1536_v28 = vadd.f32 %v1504_v14, %v1326_v34 }
  0xe4   : > { %v2523_v22 = vpack.c.bf16 %v3753_v9, %v1935_v35  ;;  %v2126_v54 = vadd.f32 %v2125_v58, %v1935_v35  ;;  %v1537_v45 = vadd.f32 %v1505_v37, %v1327_v7  ;;  %v1606_v43 = vadd.f32 %v1574_v15, %v1396_v47 }
  0xe5   : > { %v1607_v8 = vadd.f32 %v1575_v6, %v1397_v44  ;;  %vm3773_vm11 = vcmp.le.s32.totalorder %v705_v63, 14  ;;  %v1674_v17 = vmul.f32 %v3461_v56, %v3767_v3  ;;  %v1675_v11 = vmul.f32 %v3461_v56, %v3769_v27 }
  0xe6   : > { %2566 = vst [vmem:[%s2939_s20 + $0x60] sm:$0xff] %v2523_v22   ;;  %v2165_v33 = vmul.f32 %v1935_v35, %v1935_v35  ;;  %v1738_v58 = vsel %vm3755_vm10, %v1536_v28, 0.0  ;;  %v508_v0 = vadd.s32 224, %v2649_v2  ;;  %v2127_v62 = vadd.f32 %v2126_v54, %v3753_v9  ;;  %v1640_v22 = vld [vmem:[#allocation2 + $0x102] sm:$0xff] }
  0xe7   : > { %v1771_v31 = vadd.f32 %v1607_v8, %v1537_v45  ;;  %v1706_v5 = vadd.f32 %v1674_v17, %v1466_v42  ;;  %v1707_v51 = vadd.f32 %v1675_v11, %v1467_v16  ;;  %v1770_v41 = vadd.f32 %v1738_v58, %v1606_v43  ;;  %v1641_v58 = vld [vmem:[#allocation2 + $0x10a] sm:$0xff] }
  0xe8   : > { %v2196_v1 = vadd.f32 %v2195_v40, %v2165_v33  ;;  %v509_v49 = vadd.s32 232, %v2649_v2  ;;  %v712_v39 = vand.u32 15, %v508_v0  ;;  %v1026_v50 = vmul.f32 %v2682_v13, %v3686_v12 }
  0xe9   : > { %v1803_v59 = vsel %vm3773_vm11, %v1707_v51, 0.0  ;;  %v1834_v53 = vadd.f32 %v1770_v41, %v1706_v5  ;;  %v1027_v25 = vmul.f32 %v2682_v13, %v3688_v61  ;;  %v1126_v7 = vmul.f32 %v2689_v18, %v3230_v24  ;;  %v1262_v24 = vld [vmem:[#allocation2 + $0x100] sm:$0xff] }
  0xea   : > { %v1835_v34 = vadd.f32 %v1803_v59, %v1771_v31  ;;  %v1127_v40 = vmul.f32 %v2689_v18, %v3233_v48  ;;  %v1226_v47 = vmul.f32 %v3696_v23, %v2692_v19  ;;  %v1227_v35 = vmul.f32 %v3698_v4, %v2692_v19 }
  0xeb   : > { %v1873_v44 = vadd.f32 %v3490_v55, %v1834_v53  ;;  %v1296_v12 = vmul.f32 %v2695_v20, %v3745_v26  ;;  %v1297_v61 = vmul.f32 %v2695_v20, %v3747_v36  ;;  %v1366_v48 = vmul.f32 %v2698_v21, %v3318_v57 }
  0xec   : > { %v1874_v63 = vadd.f32 %v3490_v55, %v1835_v34  ;;  %v1367_v23 = vmul.f32 %v2698_v21, %v3327_v30  ;;  %v1436_v14 = vmul.f32 %v3767_v3, %v2801_v38  ;;  %v1437_v6 = vmul.f32 %v3769_v27, %v2801_v38 }
  0xed   : > { %v1905_v4 = vmax.f32 %v1873_v44, 0.0  ;;  %v1328_v37 = vadd.f32 %v1296_v12, %v1026_v50  ;;  %v1329_v15 = vadd.f32 %v1297_v61, %v1027_v25  ;;  %v719_v42 = vand.u32 15, %v509_v49 }
  0xee   : > { %v1906_v54 = vmax.f32 %v1874_v63, 0.0  ;;  %v1398_v16 = vadd.f32 %v1366_v48, %v1126_v7  ;;  %v1399_v28 = vadd.f32 %v1367_v23, %v1127_v40  ;;  %v1468_v43 = vadd.f32 %v1436_v14, %v1226_v47 }
  0xef   : > { %v1937_v45 = vmin.f32 %v1905_v4, 6.0  ;;  %v1506_v8 = vmul.f32 %v2845_v46, %v1262_v24  ;;  %v1507_v32 = vmul.f32 %v2845_v46, %v1263_v52  ;;  %v1576_v11 = vmul.f32 %v2852_v60, %v3398_v10 }
  0xf0   : > { %v3816_v17 = vmin.f32 %v1906_v54, 6.0  ;;  %v1577_v33 = vmul.f32 %v2852_v60, %v3404_v29  ;;  %v1676_v31 = vmul.f32 %v3461_v56, %v1640_v22  ;;  %vm3823_vm12 = vcmp.ge.s32.totalorder %v712_v39, 1 }
  0xf1   : > { %v1469_v5 = vadd.f32 %v1437_v6, %v1227_v35  ;;  %v1538_v51 = vadd.f32 %v1506_v8, %v1328_v37  ;;  %v1539_v41 = vadd.f32 %v1507_v32, %v1329_v15  ;;  %v1608_v59 = vadd.f32 %v1576_v11, %v1398_v16 }
  0xf2   : > { %v2528_v49 = vpack.c.bf16 %v3816_v17, %v1937_v45  ;;  %v1609_v53 = vadd.f32 %v1577_v33, %v1399_v28  ;;  %v2166_v50 = vmul.f32 %v3753_v9, %v3753_v9  ;;  %vm3830_vm13 = vcmp.le.s32.totalorder %v719_v42, 14 }
  0xf3   : > { %v1677_v34 = vmul.f32 %v3461_v56, %v1641_v58  ;;  %v1708_v39 = vadd.f32 %v1676_v31, %v1468_v43  ;;  %v1740_v7 = vsel %vm3823_vm12, %v1538_v51, 0.0  ;;  %v510_v47 = vadd.s32 240, %v2649_v2  ;;  %v1642_v43 = vld [vmem:[#allocation2 + $0x112] sm:$0xff] }
  0xf4   : > { %2567 = vst [vmem:[%s2939_s20 + $0x68] sm:$0xff] %v2528_v49   ;;  %v1773_v40 = vadd.f32 %v1609_v53, %v1539_v41  ;;  %v511_v44 = vadd.s32 248, %v2649_v2  ;;  %v2197_v35 = vadd.f32 %v2196_v1, %v2166_v50  ;;  %v2128_v12 = vadd.f32 %v2127_v62, %v1937_v45 }
  0xf5   : > { %v1709_v61 = vadd.f32 %v1677_v34, %v1469_v5  ;;  %v1772_v9 = vadd.f32 %v1740_v7, %v1608_v59  ;;  %v2167_v63 = vmul.f32 %v1937_v45, %v1937_v45  ;;  %v726_v48 = vand.u32 15, %v510_v47 }
  0xf6   : > { %v733_v23 = vand.u32 15, %v511_v44  ;;  %v1028_v14 = vmul.f32 %v2682_v13, %v3745_v26  ;;  %v1029_v15 = vmul.f32 %v2682_v13, %v3747_v36  ;;  %v1128_v2 = vmul.f32 %v2689_v18, %v3318_v57 }
  0xf7   : > { %v1805_v4 = vsel %vm3830_vm13, %v1709_v61, 0.0  ;;  %v1836_v37 = vadd.f32 %v1772_v9, %v1708_v39  ;;  %v1129_v62 = vmul.f32 %v2689_v18, %v3327_v30  ;;  %v1228_v6 = vmul.f32 %v3767_v3, %v2692_v19  ;;  %v1472_v3 = vld [vmem:[#allocation2 + $0x110] sm:$0xff] }
  0xf8   : > { %v1837_v1 = vadd.f32 %v1805_v4, %v1773_v40  ;;  %v1229_v26 = vmul.f32 %v3769_v27, %v2692_v19  ;;  %v1298_v42 = vmul.f32 %v2695_v20, %v1262_v24  ;;  %v1299_v16 = vmul.f32 %v2695_v20, %v1263_v52  ;;  %v1473_v19 = vld [vmem:[#allocation2 + $0x118] sm:$0xff] }
  0xf9   : > { %v1875_v54 = vadd.f32 %v3490_v55, %v1836_v37  ;;  %v1368_v13 = vmul.f32 %v2698_v21, %v3398_v10  ;;  %v1369_v18 = vmul.f32 %v2698_v21, %v3404_v29  ;;  %v1438_v30 = vmul.f32 %v1640_v22, %v2801_v38  ;;  %v1643_v20 = vld [vmem:[#allocation2 + $0x11a] sm:$0xff] }
  0xfa   : > { %v1876_v57 = vadd.f32 %v3490_v55, %v1837_v1  ;;  %v1439_v36 = vmul.f32 %v1641_v58, %v2801_v38  ;;  %v1330_v28 = vadd.f32 %v1298_v42, %v1028_v14  ;;  %v1331_v45 = vadd.f32 %v1299_v16, %v1029_v15  ;;  %v2588_v29 = vld [vmem:[#allocation2] sm:$0xff] }
  0xfb   : > { %v1907_v27 = vmax.f32 %v1875_v54, 0.0  ;;  %v1400_v24 = vadd.f32 %v1368_v13, %v1128_v2  ;;  %v1401_v8 = vadd.f32 %v1369_v18, %v1129_v62  ;;  %v1470_v10 = vadd.f32 %v1438_v30, %v1228_v6 }
  0xfc   : > { %v1908_v52 = vmax.f32 %v1876_v57, 0.0  ;;  %v1471_v32 = vadd.f32 %v1439_v36, %v1229_v26  ;;  %v1508_v33 = vmul.f32 %v2845_v46, %v1472_v3  ;;  %v1509_v21 = vmul.f32 %v2845_v46, %v1473_v19 }
  0xfd   : > { %v1939_v11 = vmin.f32 %v1907_v27, 6.0  ;;  %v1578_v38 = vmul.f32 %v2588_v29, %v2852_v60  ;;  %v1678_v58 = vmul.f32 %v3461_v56, %v1642_v43  ;;  %v1679_v31 = vmul.f32 %v3461_v56, %v1643_v20 }
  0xfe   : > { %v1940_v22 = vmin.f32 %v1908_v52, 6.0  ;;  %v2198_v0 = vadd.f32 %v2197_v35, %v2167_v63  ;;  %vm926_vm14 = vcmp.ge.s32.totalorder %v726_v48, 1  ;;  %v1540_v5 = vadd.f32 %v1508_v33, %v1330_v28 }
  0xff   : > { %v1541_v51 = vadd.f32 %v1509_v21, %v1331_v45  ;;  %vm959_vm15 = vcmp.le.s32.totalorder %v733_v23, 14  ;;  %v1610_v49 = vadd.f32 %v1578_v38, %v1400_v24  ;;  %v1611_v59 = vadd.f32 %v1578_v38, %v1401_v8 }
 0x100   : > { %v2533_v41 = vpack.c.bf16 %v1940_v22, %v1939_v11  ;;  %v2129_v53 = vadd.f32 %v2128_v12, %v3816_v17  ;;  %v2168_v46 = vmul.f32 %v3816_v17, %v3816_v17  ;;  %v1710_v60 = vadd.f32 %v1678_v58, %v1470_v10 }
 0x101   : > { %v1711_v50 = vadd.f32 %v1679_v31, %v1471_v32  ;;  %v1742_v25 = vsel %vm926_vm14, %v1540_v5, 0.0  ;;  %v1775_v34 = vadd.f32 %v1611_v59, %v1541_v51  ;;  %v2169_v44 = vmul.f32 %v1939_v11, %v1939_v11 }
 0x102   : > { %2568 = vst [vmem:[%s2939_s20 + $0x70] sm:$0xff] %v2533_v41   ;;  %v2199_v39 = vadd.f32 %v2198_v0, %v2168_v46  ;;  %v1774_v56 = vadd.f32 %v1742_v25, %v1610_v49  ;;  %v2130_v47 = vadd.f32 %v2129_v53, %v1939_v11  ;;  %v2170_v48 = vmul.f32 %v1940_v22, %v1940_v22 }
 0x103   : > { %v1807_v7 = vsel %vm959_vm15, %v1711_v50, 0.0 }
 0x104   : > { %v1839_v40 = vadd.f32 %v1807_v7, %v1775_v34  ;;  %v1838_v35 = vadd.f32 %v1774_v56, %v1710_v60  ;;  %v2200_v9 = vadd.f32 %v2199_v39, %v2169_v44  ;;  %v2131_v17 = vadd.f32 %v2130_v47, %v1940_v22 }
 0x106   : > { %v1878_v61 = vadd.f32 %v3490_v55, %v1839_v40  ;;  %v1877_v12 = vadd.f32 %v3490_v55, %v1838_v35  ;;  %v2201_v37 = vadd.f32 %v2200_v9, %v2170_v48 }
 0x108   : > { %v1910_v63 = vmax.f32 %v1878_v61, 0.0  ;;  %v1909_v23 = vmax.f32 %v1877_v12, 0.0 }
 0x10a   : > { %v1942_v14 = vmin.f32 %v1910_v63, 6.0  ;;  %v1941_v4 = vmin.f32 %v1909_v23, 6.0 }
 0x10c   : > { %v2538_v15 = vpack.c.bf16 %v1942_v14, %v1941_v4  ;;  %v2171_v2 = vmul.f32 %v1941_v4, %v1941_v4  ;;  %v2132_v1 = vadd.f32 %v2131_v17, %v1941_v4  ;;  %v2172_v6 = vmul.f32 %v1942_v14, %v1942_v14 }
 0x10e   : > { %2569 = vst [vmem:[%s2939_s20 + $0x78] sm:$0xff] %v2538_v15   ;;  %v2133_v62 = vadd.f32 %v2132_v1, %v1942_v14  ;;  %v2202_v26 = vadd.f32 %v2201_v37, %v2171_v2 }
 0x110   : > { %v2134_v54 = vrot.slane %v2133_v62, 4  ;;  %v2203_v42 = vadd.f32 %v2202_v26, %v2172_v6 }
 0x112   : > { %v2135_v55 = vadd.f32 %v2134_v54, %v2133_v62  ;;  %v2204_v16 = vrot.slane %v2203_v42, 4 }
 0x114   : > { %v2136_v13 = vrot.slane %v2135_v55, 2  ;;  %v2205_v57 = vadd.f32 %v2204_v16, %v2203_v42 }
 0x116   : > { %v2137_v18 = vadd.f32 %v2136_v13, %v2135_v55  ;;  %v2206_v30 = vrot.slane %v2205_v57, 2 }
 0x118   : > { %v2138_v36 = vrot.slane %v2137_v18, 1  ;;  %v2207_v3 = vadd.f32 %v2206_v30, %v2205_v57 }
 0x11a   : > { %v2139_v19 = vadd.f32 %v2138_v36, %v2137_v18  ;;  %v2208_v27 = vrot.slane %v2207_v3, 1 }
 0x11c   : > { %2140 = vst [vmem:[%s295_s10] sm:$0x1] %v2139_v19  ;;  %v2209_v28 = vadd.f32 %v2208_v27, %v2207_v3 }
 0x11e   : > { %2210 = vst [vmem:[%s298_s13] sm:$0x1] %v2209_v28 }
 0x11f PF: > { %s18_s24 = sadd.s32 1, %s2595_s24  }
 0x120   : > { %p15_p5 = scmp.ge.s32.totalorder %s18_s24, 4  }
 0x122   :  { %17 = sbr.rel (!%p15_p5) target bundleno = 1 (0x1), region = 94 }

</bundles_post_ra>
